<compile_context>
chip_gen: v5e
topology: v5e:2x2
jax: 0.10.0
libtpu: 0.0.40
codegen_flags: <defaults>
</compile_context>

<pallas_src>
import functools

import jax
import jax.numpy as jnp
from jax import lax
from jax.experimental import pallas as pl
from jax.experimental.pallas import tpu as pltpu


_BN_EPS = 1e-5


def _divisors(n):
    ds = set()
    d = 1
    while d * d <= n:
        if n % d == 0:
            ds.add(d)
            ds.add(n // d)
        d += 1
    return sorted(ds, reverse=True)


def _vmem_limit_bytes():
    """Scoped-VMEM limit derived from the chip (v5e/v6e: ~90 MiB, v7x: ~45 MiB)."""
    cap = 128 * 1024 * 1024
    try:
        cap = int(pltpu.get_tpu_info().vmem_capacity_bytes)
    except Exception:
        pass
    return max(32 * 1024 * 1024, min(int(cap * 0.7), 96 * 1024 * 1024))


# ---------------------------------------------------------------------------
# Kernel 1: 3x3 conv (stride 1, pad 1) as ONE fused-K MXU matmul per row-tile
#           + per-tile partial BN statistics.  No im2col buffer touches HBM.
#
#   x_ref     (1, H+2, W+2, Cin)   padded NHWC slab of one batch element (bf16),
#                                  VMEM-resident across the row-block axis.
#   w_ref     (KH*KW*Cin, Cout)    weights, contraction-major (bf16).
#   out_ref   (1, Cout, th*W)      conv output, channel-major, lane-dense (bf16).
#   stats_ref (1, 2, Cout)         per-tile [sum(x), sum((x - tile_mean)^2)] f32.
#   patch_ref (th*W, KH*KW*Cin)    VMEM scratch: stacked shifted 3x3 windows.
# ---------------------------------------------------------------------------
def conv_stats_kernel(x_ref, w_ref, out_ref, stats_ref, patch_ref, *, th, W, KH, KW):
    hb = pl.program_id(1)
    h0 = hb * th                      # first output row handled by this tile
    cin = x_ref.shape[3]
    ts = th * W

    # Build the stacked im2col patch: one shifted-window copy per tap.  Cin
    # stays in lanes end-to-end -> no XLU transposes feed the matmul.
    for kh in range(KH):              # static 3x3 -> fully unrolled
        for kw in range(KW):
            tap = kh * KW + kw
            win = x_ref[0, pl.ds(h0 + kh, th), kw:kw + W, :].reshape(ts, cin)
            patch_ref[:, tap * cin:(tap + 1) * cin] = win

    # Single MXU matmul, K = KH*KW*Cin, f32 accumulation.  Natural operand
    # orientation (LHS K in lanes, RHS K in sublanes) -> no operand transposes
    # and no VMEM accumulator read-modify-write.
    acc = jnp.dot(patch_ref[...], w_ref[...], preferred_element_type=jnp.float32)

    # Per-tile BN partials from the f32 accumulator, packed lane-dense into one
    # output stream.  Centered second moment avoids E[x^2]-E[x]^2 cancellation
    # when the wrapper combines tiles (Chan/Welford).
    s = jnp.sum(acc, axis=0, keepdims=True)                     # (1, Cout)
    mu = s * (1.0 / ts)
    d = acc - mu
    stats_ref[0, 0:1, :] = s
    stats_ref[0, 1:2, :] = jnp.sum(d * d, axis=0, keepdims=True)

    # Channel-major store: lane dim = th*W (multiple of 128 by construction).
    # TODO(synk): cast to bf16 before the transpose (packed XLU transpose) to
    # halve the transpose traffic once validated on the target toolchain.
    out_ref[0] = jnp.transpose(acc, (1, 0)).astype(out_ref.dtype)


# ---------------------------------------------------------------------------
# Kernel 2: BN (precomputed scale/shift) + ReLU, channel-major, lane-dense.
#   x/o: (1, Cout, ts2) bf16   scale/shift: (Cout, 1) f32
# ---------------------------------------------------------------------------
def bn_relu_kernel(x_ref, scale_ref, shift_ref, o_ref):
    y = x_ref[0].astype(jnp.float32) * scale_ref[...] + shift_ref[...]
    o_ref[0] = jnp.maximum(y, 0.0).astype(o_ref.dtype)


def _pick_rows_per_tile(N, H, W, Cin, Cout, vmem_limit, requested=None):
    """Output rows per grid step for kernel 1.

    th must divide H and give a lane-aligned spatial tile (th*W % 128 == 0, or
    the full image).  Preference: (a) fits the VMEM budget with >= 2 total grid
    steps (keeps both v7x TensorCores busy), (b) fits the budget, (c) smallest
    legal tile (may still overflow VMEM for huge layers -- see halo TODO).
    """
    k9 = 9 * Cin

    def legal(th):
        return H % th == 0 and ((th * W) % 128 == 0 or th == H)

    if requested is not None:
        if not legal(requested):
            raise ValueError("rows_per_tile must divide H and give a lane-aligned tile")
        return requested

    # double-buffered padded input slab + weights (bf16)
    fixed = 2 * (H + 2) * (W + 2) * Cin * 2 + 2 * k9 * Cout * 2

    def per_tile(th):
        ts = th * W
        # patch scratch (bf16) + double-buffered bf16 output block
        # + f32 acc / transpose temps + window-slice temps
        return ts * (k9 * 2 + 2 * Cout * 2 + Cout * 8 + Cin * 4)

    budget = int(vmem_limit * 0.75)
    cands = [d for d in _divisors(H) if legal(d)]               # descending
    fitting = [d for d in cands if fixed + per_tile(d) <= budget]
    for d in fitting:
        if N * (H // d) >= 2:
            return d
    if fitting:
        return fitting[0]
    return cands[-1]


def _pick_bn_chunk(N, hw, Cout, vmem_limit):
    """Spatial elements per grid step for the mem-bound BN+ReLU pass."""
    def legal(ts):
        return hw % ts == 0 and (ts % 128 == 0 or ts == hw)

    def per_tile(ts):
        # double-buffered bf16 in + aliased bf16 out + f32 temps
        return ts * Cout * (2 * 2 + 2 * 2 + 4)

    budget = int(vmem_limit * 0.75)
    cands = [d for d in _divisors(hw) if legal(d)]
    fitting = [d for d in cands if per_tile(d) <= budget]
    for d in fitting:
        if N * (hw // d) >= 2:
            return d
    if fitting:
        return fitting[0]
    return cands[-1]


@functools.partial(jax.jit, static_argnames=("rows_per_tile", "out_dtype"))
def conv_block_forward(x_nchw, weight, bias, gamma, beta, *,
                       rows_per_tile=None, out_dtype=jnp.bfloat16):
    """ConvBlock forward: Conv2d(3x3, s=1, p=1) -> BatchNorm2d(train) -> ReLU.

    x_nchw: (N, Cin, H, W); weight: (Cout, Cin, 3, 3); bias/gamma/beta: (Cout,).
    Conv operands run on the MXU in bf16 with f32 accumulation; the activation
    output is bf16 by default (pass out_dtype=jnp.float32 for f32 parity).
    NOTE: `bias` is accepted for API parity but intentionally unused -- a
    per-channel constant shift is exactly cancelled by the training-mode
    BatchNorm mean subtraction, so the forward output does not depend on it.
    """
    del bias
    N, Cin, H, W = x_nchw.shape
    Cout, _, KH, KW = weight.shape
    if (KH, KW) != (3, 3):
        raise ValueError("kernel is specialized to 3x3 / stride 1 / pad 1")
    hw = H * W
    k9 = KH * KW * Cin

    vmem_limit = _vmem_limit_bytes()
    th = _pick_rows_per_tile(N, H, W, Cin, Cout, vmem_limit, rows_per_tile)
    n_hb = H // th
    ts = th * W
    n_tiles = N * n_hb

    # --- glue: NCHW -> padded NHWC bf16 slab; weights -> contraction-major ----
    # TODO(synk): in a full DenseUNet keep activations NHWC (and pre-padded)
    # end-to-end so this one layout pass (extra HBM read+write) disappears.
    x_nhwc = jnp.transpose(x_nchw, (0, 2, 3, 1)).astype(jnp.bfloat16)
    xp = jnp.pad(x_nhwc, ((0, 0), (1, 1), (1, 1), (0, 0)))      # (N, H+2, W+2, Cin)
    # weight (Cout, Cin, KH, KW) -> (KH, KW, Cin, Cout) -> (KH*KW*Cin, Cout);
    # the row order matches the patch column order (kh-major, kw, cin-minor).
    w_r = jnp.transpose(weight, (2, 3, 1, 0)).astype(jnp.bfloat16).reshape(k9, Cout)

    # --- kernel 1: conv + per-tile BN partials --------------------------------
    # TODO(synk): for layers whose padded slab does not fit VMEM (large H*W*Cin
    # on v7x's 64 MiB), switch the input spec to halo'd row-blocks fetched with
    # manual make_async_copy instead of keeping the whole slab resident.
    conv_t, stats = pl.pallas_call(
        functools.partial(conv_stats_kernel, th=th, W=W, KH=KH, KW=KW),
        out_shape=(
            jax.ShapeDtypeStruct((N, Cout, hw), jnp.bfloat16),
            jax.ShapeDtypeStruct((n_tiles, 2, Cout), jnp.float32),
        ),
        grid_spec=pltpu.PrefetchScalarGridSpec(
            num_scalar_prefetch=0,
            grid=(N, n_hb),
            in_specs=[
                # Whole padded image of batch element n stays resident across
                # the row-block axis -> each input byte is DMA'd exactly once.
                pl.BlockSpec((1, H + 2, W + 2, Cin), lambda n, hb: (n, 0, 0, 0)),
                pl.BlockSpec((k9, Cout), lambda n, hb: (0, 0)),
            ],
            out_specs=(
                pl.BlockSpec((1, Cout, ts), lambda n, hb: (n, 0, hb)),
                pl.BlockSpec((1, 2, Cout), lambda n, hb: (n * n_hb + hb, 0, 0)),
            ),
            scratch_shapes=[pltpu.VMEM((ts, k9), jnp.bfloat16)],
        ),
        compiler_params=pltpu.CompilerParams(
            dimension_semantics=("parallel", "parallel"),
            vmem_limit_bytes=vmem_limit),
    )(xp, w_r)

    # --- glue: combine per-tile partials (Chan/Welford) -> scale / shift ------
    tile_cnt = jnp.float32(ts)
    total = jnp.float32(N * hw)
    tile_sum = stats[:, 0, :]                                   # (n_tiles, Cout)
    tile_m2 = stats[:, 1, :]
    mean = jnp.sum(tile_sum, axis=0) / total                    # (Cout,)
    tile_mean = tile_sum / tile_cnt
    m2 = jnp.sum(tile_m2, axis=0) + jnp.sum(
        tile_cnt * (tile_mean - mean[None, :]) ** 2, axis=0)
    var = m2 / total                                            # biased (BN norm)
    inv_std = lax.rsqrt(var + jnp.float32(_BN_EPS))
    g = gamma.astype(jnp.float32) * inv_std
    scale = g.reshape(Cout, 1)
    shift = (beta.astype(jnp.float32) - mean * g).reshape(Cout, 1)

    # --- kernel 2: y = max(x*scale + shift, 0), bf16 in/out, aliased in place -
    # TODO(synk): in a full DenseUNet fuse this scale/shift/ReLU into the next
    # ConvBlock's conv kernel and delete this HBM pass entirely.
    ts2 = _pick_bn_chunk(N, hw, Cout, vmem_limit)
    alias = {0: 0} if jnp.dtype(out_dtype) == jnp.dtype(jnp.bfloat16) else {}
    y = pl.pallas_call(
        bn_relu_kernel,
        out_shape=jax.ShapeDtypeStruct((N, Cout, hw), out_dtype),
        grid_spec=pltpu.PrefetchScalarGridSpec(
            num_scalar_prefetch=0,
            grid=(N, hw // ts2),
            in_specs=[
                pl.BlockSpec((1, Cout, ts2), lambda n, s: (n, 0, s)),
                pl.BlockSpec((Cout, 1), lambda n, s: (0, 0)),
                pl.BlockSpec((Cout, 1), lambda n, s: (0, 0)),
            ],
            out_specs=pl.BlockSpec((1, Cout, ts2), lambda n, s: (n, 0, s)),
        ),
        input_output_aliases=alias,          # overwrite the conv buffer in place
        compiler_params=pltpu.CompilerParams(
            dimension_semantics=("parallel", "parallel"),
            vmem_limit_bytes=vmem_limit),
    )(conv_t, scale, shift)

    # Channel-major (N, Cout, H*W) -> NCHW is a free reshape (no transpose).
    return y.reshape(N, Cout, H, W)


# ---------------------------------------------------------------------------
# Pure-JAX reference (includes the conv bias -> also validates that training-
# mode BN exactly cancels it, since the kernel drops the bias).
# ---------------------------------------------------------------------------
def conv_block_ref(x_nchw, weight, bias, gamma, beta):
    y = lax.conv_general_dilated(
        x_nchw.astype(jnp.float32), weight.astype(jnp.float32),
        window_strides=(1, 1), padding=((1, 1), (1, 1)),
        dimension_numbers=("NCHW", "OIHW", "NCHW"))
    y = y + bias.reshape(1, -1, 1, 1)
    mean = jnp.mean(y, axis=(0, 2, 3), keepdims=True)
    var = jnp.mean((y - mean) ** 2, axis=(0, 2, 3), keepdims=True)
    y = (y - mean) / jnp.sqrt(var + _BN_EPS)
    y = y * gamma.reshape(1, -1, 1, 1) + beta.reshape(1, -1, 1, 1)
    return jnp.maximum(y, 0.0)


if __name__ == "__main__":
    # ConvBlock(in_ch=4, out_ch=8), input (N=2, C=4, H=16, W=16)
    N, Cin, H, W = 2, 4, 16, 16
    Cout, KH, KW = 8, 3, 3

    key = jax.random.PRNGKey(0)
    k_x, k_w, k_b = jax.random.split(key, 3)

    x = jax.random.normal(k_x, (N, Cin, H, W), dtype=jnp.float32)
    weight = 0.1 * jax.random.normal(k_w, (Cout, Cin, KH, KW), dtype=jnp.float32)
    bias = 0.1 * jax.random.normal(k_b, (Cout,), dtype=jnp.float32)
    gamma = jnp.ones((Cout,), dtype=jnp.float32)   # BatchNorm2d weight init
    beta = jnp.zeros((Cout,), dtype=jnp.float32)   # BatchNorm2d bias init

    # Round conv operands to bf16-representable values so the kernel's bf16 MXU
    # path can be compared tightly against the exact f32 reference (note for
    # production parity: the kernel intentionally quantizes conv operands and
    # the intermediate/output activations to bf16).
    x = x.astype(jnp.bfloat16).astype(jnp.float32)
    weight = weight.astype(jnp.bfloat16).astype(jnp.float32)

    out = conv_block_forward(x, weight, bias, gamma, beta)
    out = jax.block_until_ready(out)

    ref = conv_block_ref(x, weight, bias, gamma, beta)
    assert out.shape == (N, Cout, H, W), out.shape
    out_f32 = out.astype(jnp.float32)
    err = float(jnp.max(jnp.abs(out_f32 - ref)))
    # Tolerance covers the bf16 activation storage + final bf16 cast.
    assert jnp.allclose(out_f32, ref, atol=3e-2, rtol=3e-2), err

    print("KERNEL_OK")
</pallas_src>

<mosaic_0001>
module attributes {stable_mosaic.version = 11 : i64} {
  func.func @conv_stats_kernel(%arg0: i32, %arg1: i32, %arg2: memref<1x18x18x4xbf16, #tpu.memory_space<vmem>>, %arg3: memref<36x8xbf16, #tpu.memory_space<vmem>>, %arg4: memref<1x8x256xbf16, #tpu.memory_space<vmem>>, %arg5: memref<1x2x8xf32, #tpu.memory_space<vmem>>, %arg6: memref<256x36xbf16, #tpu.memory_space<vmem>>) attributes {dimension_semantics = [#tpu.dimension_semantics<parallel>, #tpu.dimension_semantics<parallel>], iteration_bounds = array<i64: 2, 1>, scalar_prefetch = 0 : i64, scratch_operands = 1 : i64, tpu.core_type = #tpu.core_type<tc>, window_params = [{transform_indices = @transform_0, window_bounds = array<i64: 1, 18, 18, 4>}, {pipeline_mode = #tpu.pipeline_mode<synchronous>, transform_indices = @transform_1, window_bounds = array<i64: 36, 8>}, {transform_indices = @transform_2, window_bounds = array<i64: 1, 8, 256>}, {transform_indices = @transform_3, window_bounds = array<i64: 1, 2, 8>}]} {
    %c16_i32 = arith.constant 16 : i32
    %0 = arith.muli %arg1, %c16_i32 : i32
    %c0_i32 = arith.constant 0 : i32
    %1 = arith.addi %0, %c0_i32 : i32
    %c0 = arith.constant 0 : index
    %2 = arith.index_cast %1 : i32 to index
    %c0_0 = arith.constant 0 : index
    %c0_1 = arith.constant 0 : index
    %3 = vector.load %arg2[%c0, %2, %c0_0, %c0_1] : memref<1x18x18x4xbf16, #tpu.memory_space<vmem>>, vector<1x16x16x4xbf16>
    %4 = vector.shape_cast %3 : vector<1x16x16x4xbf16> to vector<16x16x4xbf16>
    %5 = vector.shape_cast %4 : vector<16x16x4xbf16> to vector<256x4xbf16>
    %c0_2 = arith.constant 0 : index
    %c0_3 = arith.constant 0 : index
    %6 = vector.load %arg6[%c0_2, %c0_3] : memref<256x36xbf16, #tpu.memory_space<vmem>>, vector<256x4xbf16>
    tpu.vector_store %arg6[%c0_2, %c0_3], %5 {strides = array<i32>} : memref<256x36xbf16, #tpu.memory_space<vmem>>, vector<256x4xbf16>,
    %c0_i32_4 = arith.constant 0 : i32
    %7 = arith.addi %0, %c0_i32_4 : i32
    %c0_5 = arith.constant 0 : index
    %8 = arith.index_cast %7 : i32 to index
    %c1 = arith.constant 1 : index
    %c0_6 = arith.constant 0 : index
    %9 = vector.load %arg2[%c0_5, %8, %c1, %c0_6] : memref<1x18x18x4xbf16, #tpu.memory_space<vmem>>, vector<1x16x16x4xbf16>
    %10 = vector.shape_cast %9 : vector<1x16x16x4xbf16> to vector<16x16x4xbf16>
    %11 = vector.shape_cast %10 : vector<16x16x4xbf16> to vector<256x4xbf16>
    %c0_7 = arith.constant 0 : index
    %c4 = arith.constant 4 : index
    %12 = vector.load %arg6[%c0_7, %c4] : memref<256x36xbf16, #tpu.memory_space<vmem>>, vector<256x4xbf16>
    tpu.vector_store %arg6[%c0_7, %c4], %11 {strides = array<i32>} : memref<256x36xbf16, #tpu.memory_space<vmem>>, vector<256x4xbf16>,
    %c0_i32_8 = arith.constant 0 : i32
    %13 = arith.addi %0, %c0_i32_8 : i32
    %c0_9 = arith.constant 0 : index
    %14 = arith.index_cast %13 : i32 to index
    %c2 = arith.constant 2 : index
    %c0_10 = arith.constant 0 : index
    %15 = vector.load %arg2[%c0_9, %14, %c2, %c0_10] : memref<1x18x18x4xbf16, #tpu.memory_space<vmem>>, vector<1x16x16x4xbf16>
    %16 = vector.shape_cast %15 : vector<1x16x16x4xbf16> to vector<16x16x4xbf16>
    %17 = vector.shape_cast %16 : vector<16x16x4xbf16> to vector<256x4xbf16>
    %c0_11 = arith.constant 0 : index
    %c8 = arith.constant 8 : index
    %18 = vector.load %arg6[%c0_11, %c8] : memref<256x36xbf16, #tpu.memory_space<vmem>>, vector<256x4xbf16>
    tpu.vector_store %arg6[%c0_11, %c8], %17 {strides = array<i32>} : memref<256x36xbf16, #tpu.memory_space<vmem>>, vector<256x4xbf16>,
    %c1_i32 = arith.constant 1 : i32
    %19 = arith.addi %0, %c1_i32 : i32
    %c0_12 = arith.constant 0 : index
    %20 = arith.index_cast %19 : i32 to index
    %c0_13 = arith.constant 0 : index
    %c0_14 = arith.constant 0 : index
    %21 = vector.load %arg2[%c0_12, %20, %c0_13, %c0_14] : memref<1x18x18x4xbf16, #tpu.memory_space<vmem>>, vector<1x16x16x4xbf16>
    %22 = vector.shape_cast %21 : vector<1x16x16x4xbf16> to vector<16x16x4xbf16>
    %23 = vector.shape_cast %22 : vector<16x16x4xbf16> to vector<256x4xbf16>
    %c0_15 = arith.constant 0 : index
    %c12 = arith.constant 12 : index
    %24 = vector.load %arg6[%c0_15, %c12] : memref<256x36xbf16, #tpu.memory_space<vmem>>, vector<256x4xbf16>
    tpu.vector_store %arg6[%c0_15, %c12], %23 {strides = array<i32>} : memref<256x36xbf16, #tpu.memory_space<vmem>>, vector<256x4xbf16>,
    %c1_i32_16 = arith.constant 1 : i32
    %25 = arith.addi %0, %c1_i32_16 : i32
    %c0_17 = arith.constant 0 : index
    %26 = arith.index_cast %25 : i32 to index
    %c1_18 = arith.constant 1 : index
    %c0_19 = arith.constant 0 : index
    %27 = vector.load %arg2[%c0_17, %26, %c1_18, %c0_19] : memref<1x18x18x4xbf16, #tpu.memory_space<vmem>>, vector<1x16x16x4xbf16>
    %28 = vector.shape_cast %27 : vector<1x16x16x4xbf16> to vector<16x16x4xbf16>
    %29 = vector.shape_cast %28 : vector<16x16x4xbf16> to vector<256x4xbf16>
    %c0_20 = arith.constant 0 : index
    %c16 = arith.constant 16 : index
    %30 = vector.load %arg6[%c0_20, %c16] : memref<256x36xbf16, #tpu.memory_space<vmem>>, vector<256x4xbf16>
    tpu.vector_store %arg6[%c0_20, %c16], %29 {strides = array<i32>} : memref<256x36xbf16, #tpu.memory_space<vmem>>, vector<256x4xbf16>,
    %c1_i32_21 = arith.constant 1 : i32
    %31 = arith.addi %0, %c1_i32_21 : i32
    %c0_22 = arith.constant 0 : index
    %32 = arith.index_cast %31 : i32 to index
    %c2_23 = arith.constant 2 : index
    %c0_24 = arith.constant 0 : index
    %33 = vector.load %arg2[%c0_22, %32, %c2_23, %c0_24] : memref<1x18x18x4xbf16, #tpu.memory_space<vmem>>, vector<1x16x16x4xbf16>
    %34 = vector.shape_cast %33 : vector<1x16x16x4xbf16> to vector<16x16x4xbf16>
    %35 = vector.shape_cast %34 : vector<16x16x4xbf16> to vector<256x4xbf16>
    %c0_25 = arith.constant 0 : index
    %c20 = arith.constant 20 : index
    %36 = vector.load %arg6[%c0_25, %c20] : memref<256x36xbf16, #tpu.memory_space<vmem>>, vector<256x4xbf16>
    tpu.vector_store %arg6[%c0_25, %c20], %35 {strides = array<i32>} : memref<256x36xbf16, #tpu.memory_space<vmem>>, vector<256x4xbf16>,
    %c2_i32 = arith.constant 2 : i32
    %37 = arith.addi %0, %c2_i32 : i32
    %c0_26 = arith.constant 0 : index
    %38 = arith.index_cast %37 : i32 to index
    %c0_27 = arith.constant 0 : index
    %c0_28 = arith.constant 0 : index
    %39 = vector.load %arg2[%c0_26, %38, %c0_27, %c0_28] : memref<1x18x18x4xbf16, #tpu.memory_space<vmem>>, vector<1x16x16x4xbf16>
    %40 = vector.shape_cast %39 : vector<1x16x16x4xbf16> to vector<16x16x4xbf16>
    %41 = vector.shape_cast %40 : vector<16x16x4xbf16> to vector<256x4xbf16>
    %c0_29 = arith.constant 0 : index
    %c24 = arith.constant 24 : index
    %42 = vector.load %arg6[%c0_29, %c24] : memref<256x36xbf16, #tpu.memory_space<vmem>>, vector<256x4xbf16>
    tpu.vector_store %arg6[%c0_29, %c24], %41 {strides = array<i32>} : memref<256x36xbf16, #tpu.memory_space<vmem>>, vector<256x4xbf16>,
    %c2_i32_30 = arith.constant 2 : i32
    %43 = arith.addi %0, %c2_i32_30 : i32
    %c0_31 = arith.constant 0 : index
    %44 = arith.index_cast %43 : i32 to index
    %c1_32 = arith.constant 1 : index
    %c0_33 = arith.constant 0 : index
    %45 = vector.load %arg2[%c0_31, %44, %c1_32, %c0_33] : memref<1x18x18x4xbf16, #tpu.memory_space<vmem>>, vector<1x16x16x4xbf16>
    %46 = vector.shape_cast %45 : vector<1x16x16x4xbf16> to vector<16x16x4xbf16>
    %47 = vector.shape_cast %46 : vector<16x16x4xbf16> to vector<256x4xbf16>
    %c0_34 = arith.constant 0 : index
    %c28 = arith.constant 28 : index
    %48 = vector.load %arg6[%c0_34, %c28] : memref<256x36xbf16, #tpu.memory_space<vmem>>, vector<256x4xbf16>
    tpu.vector_store %arg6[%c0_34, %c28], %47 {strides = array<i32>} : memref<256x36xbf16, #tpu.memory_space<vmem>>, vector<256x4xbf16>,
    %c2_i32_35 = arith.constant 2 : i32
    %49 = arith.addi %0, %c2_i32_35 : i32
    %c0_36 = arith.constant 0 : index
    %50 = arith.index_cast %49 : i32 to index
    %c2_37 = arith.constant 2 : index
    %c0_38 = arith.constant 0 : index
    %51 = vector.load %arg2[%c0_36, %50, %c2_37, %c0_38] : memref<1x18x18x4xbf16, #tpu.memory_space<vmem>>, vector<1x16x16x4xbf16>
    %52 = vector.shape_cast %51 : vector<1x16x16x4xbf16> to vector<16x16x4xbf16>
    %53 = vector.shape_cast %52 : vector<16x16x4xbf16> to vector<256x4xbf16>
    %c0_39 = arith.constant 0 : index
    %c32 = arith.constant 32 : index
    %54 = vector.load %arg6[%c0_39, %c32] : memref<256x36xbf16, #tpu.memory_space<vmem>>, vector<256x4xbf16>
    tpu.vector_store %arg6[%c0_39, %c32], %53 {strides = array<i32>} : memref<256x36xbf16, #tpu.memory_space<vmem>>, vector<256x4xbf16>,
    %c0_40 = arith.constant 0 : index
    %c0_41 = arith.constant 0 : index
    %55 = vector.load %arg6[%c0_40, %c0_41] : memref<256x36xbf16, #tpu.memory_space<vmem>>, vector<256x36xbf16>
    %c0_42 = arith.constant 0 : index
    %c0_43 = arith.constant 0 : index
    %56 = vector.load %arg3[%c0_42, %c0_43] : memref<36x8xbf16, #tpu.memory_space<vmem>>, vector<36x8xbf16>
    %cst = arith.constant dense<0.000000e+00> : vector<256x8xf32>
    %57 = tpu.matmul %55, %56, %cst {dimension_numbers = #tpu.dot_dimension_numbers<[1], [0], [0], [1], [0, 0, 1, 1], [], []>} : vector<256x36xbf16>, vector<36x8xbf16>, vector<256x8xf32> -> vector<256x8xf32>
    %cst_44 = arith.constant dense<0.000000e+00> : vector<8xf32>
    %58 = vector.multi_reduction <add>, %57, %cst_44 [0] : vector<256x8xf32> to vector<8xf32>
    %59 = vector.shape_cast %58 : vector<8xf32> to vector<1x8xf32>
    %cst_45 = arith.constant 3.906250e-03 : f32
    %60 = vector.broadcast %cst_45 : f32 to vector<1x8xf32>
    %61 = arith.mulf %59, %60 : vector<1x8xf32>
    %62 = vector.broadcast %61 : vector<1x8xf32> to vector<256x8xf32>
    %63 = arith.subf %57, %62 : vector<256x8xf32>
    %c0_46 = arith.constant 0 : index
    %c0_47 = arith.constant 0 : index
    %c0_48 = arith.constant 0 : index
    %64 = vector.load %arg5[%c0_46, %c0_47, %c0_48] : memref<1x2x8xf32, #tpu.memory_space<vmem>>, vector<1x1x8xf32>
    %65 = vector.shape_cast %64 : vector<1x1x8xf32> to vector<1x8xf32>
    %66 = vector.shape_cast %59 : vector<1x8xf32> to vector<1x1x8xf32>
    tpu.vector_store %arg5[%c0_46, %c0_47, %c0_48], %66 {strides = array<i32>} : memref<1x2x8xf32, #tpu.memory_space<vmem>>, vector<1x1x8xf32>,
    %67 = arith.mulf %63, %63 : vector<256x8xf32>
    %cst_49 = arith.constant dense<0.000000e+00> : vector<8xf32>
    %68 = vector.multi_reduction <add>, %67, %cst_49 [0] : vector<256x8xf32> to vector<8xf32>
    %69 = vector.shape_cast %68 : vector<8xf32> to vector<1x8xf32>
    %c0_50 = arith.constant 0 : index
    %c1_51 = arith.constant 1 : index
    %c0_52 = arith.constant 0 : index
    %70 = vector.load %arg5[%c0_50, %c1_51, %c0_52] : memref<1x2x8xf32, #tpu.memory_space<vmem>>, vector<1x1x8xf32>
    %71 = vector.shape_cast %70 : vector<1x1x8xf32> to vector<1x8xf32>
    %72 = vector.shape_cast %69 : vector<1x8xf32> to vector<1x1x8xf32>
    tpu.vector_store %arg5[%c0_50, %c1_51, %c0_52], %72 {strides = array<i32>} : memref<1x2x8xf32, #tpu.memory_space<vmem>>, vector<1x1x8xf32>,
    %73 = tpu.transpose %57, [1, 0] : vector<256x8xf32> -> vector<8x256xf32>
    %74 = arith.truncf %73 : vector<8x256xf32> to vector<8x256xbf16>
    %c0_53 = arith.constant 0 : index
    %c0_54 = arith.constant 0 : index
    %c0_55 = arith.constant 0 : index
    %75 = vector.load %arg4[%c0_53, %c0_54, %c0_55] : memref<1x8x256xbf16, #tpu.memory_space<vmem>>, vector<1x8x256xbf16>
    %76 = vector.shape_cast %75 : vector<1x8x256xbf16> to vector<8x256xbf16>
    %77 = vector.shape_cast %74 : vector<8x256xbf16> to vector<1x8x256xbf16>
    tpu.vector_store %arg4[%c0_53, %c0_54, %c0_55], %77 {strides = array<i32>} : memref<1x8x256xbf16, #tpu.memory_space<vmem>>, vector<1x8x256xbf16>,
    return
  }
  func.func @transform_0(%arg0: i32, %arg1: i32) -> (i32, i32, i32, i32) {
    %c0_i32 = arith.constant 0 : i32
    %c0_i32_0 = arith.constant 0 : i32
    %c0_i32_1 = arith.constant 0 : i32
    %c0_i32_2 = arith.constant 0 : i32
    return %arg0, %c0_i32, %c0_i32_0, %c0_i32_1 : i32, i32, i32, i32
  }
  func.func @transform_1(%arg0: i32, %arg1: i32) -> (i32, i32) {
    %c0_i32 = arith.constant 0 : i32
    %c0_i32_0 = arith.constant 0 : i32
    %c0_i32_1 = arith.constant 0 : i32
    return %c0_i32, %c0_i32_0 : i32, i32
  }
  func.func @transform_2(%arg0: i32, %arg1: i32) -> (i32, i32, i32) {
    %c0_i32 = arith.constant 0 : i32
    %c0_i32_0 = arith.constant 0 : i32
    return %arg0, %c0_i32, %arg1 : i32, i32, i32
  }
  func.func @transform_3(%arg0: i32, %arg1: i32) -> (i32, i32, i32) {
    %c1_i32 = arith.constant 1 : i32
    %0 = arith.muli %arg0, %c1_i32 : i32
    %1 = arith.addi %0, %arg1 : i32
    %c0_i32 = arith.constant 0 : i32
    %c0_i32_0 = arith.constant 0 : i32
    %c0_i32_1 = arith.constant 0 : i32
    return %1, %c0_i32, %c0_i32_0 : i32, i32, i32
  }
}

module attributes {stable_mosaic.version = 11 : i64} {
  func.func @bn_relu_kernel(%arg0: i32, %arg1: i32, %arg2: memref<1x8x256xbf16, #tpu.memory_space<vmem>>, %arg3: memref<8x1xf32, #tpu.memory_space<vmem>>, %arg4: memref<8x1xf32, #tpu.memory_space<vmem>>, %arg5: memref<1x8x256xbf16, #tpu.memory_space<vmem>>) attributes {dimension_semantics = [#tpu.dimension_semantics<parallel>, #tpu.dimension_semantics<parallel>], iteration_bounds = array<i64: 2, 1>, scalar_prefetch = 0 : i64, scratch_operands = 0 : i64, tpu.core_type = #tpu.core_type<tc>, window_params = [{transform_indices = @transform_0, window_bounds = array<i64: 1, 8, 256>}, {pipeline_mode = #tpu.pipeline_mode<synchronous>, transform_indices = @transform_1, window_bounds = array<i64: 8, 1>}, {pipeline_mode = #tpu.pipeline_mode<synchronous>, transform_indices = @transform_2, window_bounds = array<i64: 8, 1>}, {transform_indices = @transform_3, window_bounds = array<i64: 1, 8, 256>}]} {
    %c0 = arith.constant 0 : index
    %c0_0 = arith.constant 0 : index
    %c0_1 = arith.constant 0 : index
    %0 = vector.load %arg2[%c0, %c0_0, %c0_1] : memref<1x8x256xbf16, #tpu.memory_space<vmem>>, vector<1x8x256xbf16>
    %1 = vector.shape_cast %0 : vector<1x8x256xbf16> to vector<8x256xbf16>
    %2 = arith.extf %1 : vector<8x256xbf16> to vector<8x256xf32>
    %c0_2 = arith.constant 0 : index
    %c0_3 = arith.constant 0 : index
    %3 = vector.load %arg3[%c0_2, %c0_3] : memref<8x1xf32, #tpu.memory_space<vmem>>, vector<8x1xf32>
    %4 = vector.broadcast %3 : vector<8x1xf32> to vector<8x256xf32>
    %5 = arith.mulf %2, %4 : vector<8x256xf32>
    %c0_4 = arith.constant 0 : index
    %c0_5 = arith.constant 0 : index
    %6 = vector.load %arg4[%c0_4, %c0_5] : memref<8x1xf32, #tpu.memory_space<vmem>>, vector<8x1xf32>
    %7 = vector.broadcast %6 : vector<8x1xf32> to vector<8x256xf32>
    %8 = arith.addf %5, %7 : vector<8x256xf32>
    %cst = arith.constant 0.000000e+00 : f32
    %9 = vector.broadcast %cst : f32 to vector<8x256xf32>
    %10 = arith.maximumf %8, %9 : vector<8x256xf32>
    %11 = arith.truncf %10 : vector<8x256xf32> to vector<8x256xbf16>
    %c0_6 = arith.constant 0 : index
    %c0_7 = arith.constant 0 : index
    %c0_8 = arith.constant 0 : index
    %12 = vector.load %arg5[%c0_6, %c0_7, %c0_8] : memref<1x8x256xbf16, #tpu.memory_space<vmem>>, vector<1x8x256xbf16>
    %13 = vector.shape_cast %12 : vector<1x8x256xbf16> to vector<8x256xbf16>
    %14 = vector.shape_cast %11 : vector<8x256xbf16> to vector<1x8x256xbf16>
    tpu.vector_store %arg5[%c0_6, %c0_7, %c0_8], %14 {strides = array<i32>} : memref<1x8x256xbf16, #tpu.memory_space<vmem>>, vector<1x8x256xbf16>,
    return
  }
  func.func @transform_0(%arg0: i32, %arg1: i32) -> (i32, i32, i32) {
    %c0_i32 = arith.constant 0 : i32
    %c0_i32_0 = arith.constant 0 : i32
    return %arg0, %c0_i32, %arg1 : i32, i32, i32
  }
  func.func @transform_1(%arg0: i32, %arg1: i32) -> (i32, i32) {
    %c0_i32 = arith.constant 0 : i32
    %c0_i32_0 = arith.constant 0 : i32
    %c0_i32_1 = arith.constant 0 : i32
    return %c0_i32, %c0_i32_0 : i32, i32
  }
  func.func @transform_2(%arg0: i32, %arg1: i32) -> (i32, i32) {
    %c0_i32 = arith.constant 0 : i32
    %c0_i32_0 = arith.constant 0 : i32
    %c0_i32_1 = arith.constant 0 : i32
    return %c0_i32, %c0_i32_0 : i32, i32
  }
  func.func @transform_3(%arg0: i32, %arg1: i32) -> (i32, i32, i32) {
    %c0_i32 = arith.constant 0 : i32
    %c0_i32_0 = arith.constant 0 : i32
    return %arg0, %c0_i32, %arg1 : i32, i32, i32
  }
}

</mosaic_0001>

<bundles_post_ra>
// kernel: conv_block_forward.3
= control target key start
LH: loop header
LB: loop body
LE: loop exit
PB: predicated region body
PF: predicated region fallthrough
CT: control target
= control target key end

     0   :  { %s404_s12 = smov 0   ;;  %s406_s13 = smov 0   ;;  %s443_s0 = inlined_call_operand.vmem [shape: bf16[2,8,256], index: 0, kind: input, shape index: {}, may-alias: {0,3}]   ;;  %s444_s1 = inlined_call_operand.vmem [shape: f32[8,1], index: 1, kind: input, shape index: {}]   ;;  %s445_s2 = inlined_call_operand.vmem [shape: f32[8,1], index: 2, kind: input, shape index: {}]   ;;  %s446_s3 = inlined_call_operand.vmem [shape: bf16[2,8,256], index: 3, kind: output, shape index: {}, may-alias: {0,3}]  }
   0x1   :  { %s408_s14 = smov 0  }
   0x2 LB: > { %s25_s15 = sadd.s32 1, %s377_s13  ;;  %p324_p0 = scmp.ge.s32.totalorder %s381_s14, 1  ;;  %s381_s14 = sphi %s408_s14, %s13_s14   ;;  %s377_s13 = sphi %s406_s13, %s448_s13   ;;  %s373_s12 = sphi %s404_s12, %s447_s12  }
   0x3   : > { %p27_p1 = scmp.ge.s32.totalorder %s25_s15, 2  ;;  %p158_p2 = scmp.lt.s32.totalorder %s381_s14, 3 }
   0x5   : > { %s450_s15 = smov (%p27_p1, %s25_s15), 0  ;;  %p159_p3 = pnand %p324_p0, %p158_p2 }
   0x6   : > { %p191_p4 = scmp.lt.s32.totalorder (!%p159_p3), %s373_s12, 1 }
   0x7   : > { %162 = sbr.rel (%p159_p3) target bundleno = 144 (0x90), region = 32 }
   0xc   : > { %v213_v0 = vld [vmem:[%s444_s1] sm:$0xff]  ;;  %v383_v1 = vmov 0   ;;  %s452_s12 = smov (!%p191_p4, %s373_s12), 1 }
   0xd   : > { %358 = vset.pattern.permute.xlu0 %v383_v1  ;;  %v221_v2 = vld [vmem:[%s445_s2] sm:$0xff]  ;;  %s331_s20 = sshll.u32 %s452_s12, 3 }
   0xe   : > { %216 = vperm.xlu0 %358, %v213_v0   ;;  %s198_s23 = scalar_lea.vmem %s443_s0, %s331_s20  ;;  %s208_s26 = scalar_lea.vmem %s446_s3, %s331_s20 }
   0xf   : > { %v210_v4 = vld [vmem:[%s198_s23] sm:$0xff] }
  0x10   : > { %v211_v5 = vunpack.c.l.bf16 %v210_v4  ;;  %v212_v6 = vunpack.c.h.bf16 %v210_v4 }
  0x16   : > { %224 = vperm.xlu0 %358, %v221_v2  }
  0x80   : > { %v217_v3 = vpop.permute.xlu0 %216 }
  0x81   : > { %v219_v7 = vmul.f32 %v217_v3, %v211_v5  ;;  %v220_v8 = vmul.f32 %v217_v3, %v212_v6 }
  0x88   : > { %v225_v9 = vpop.permute.xlu0 %224 }
  0x89   : > { %v227_v10 = vadd.f32 %v225_v9, %v219_v7  ;;  %v228_v11 = vadd.f32 %v225_v9, %v220_v8 }
  0x8b   : > { %v229_v12 = vmax.f32 %v227_v10, 0.0  ;;  %v230_v13 = vmax.f32 %v228_v11, 0.0 }
  0x8d   : > { %v231_v14 = vpack.c.bf16 %v230_v13, %v229_v12 }
  0x8f   : > { %232 = vst [vmem:[%s208_s26] sm:$0xff] %v231_v14 }
  0x90 PF: > { %s13_s14 = sadd.s32 1, %s381_s14   ;;  %s447_s12 = smov %s377_s13 }
  0x91   : > { %p10_p5 = scmp.ge.s32.totalorder %s13_s14, 4   ;;  %s448_s13 = smov %s450_s15 }
  0x93   :  { %12 = sbr.rel (!%p10_p5) target bundleno = 2 (0x2), region = 62 }

// kernel: conv_block_forward.2
= control target key start
LH: loop header
LB: loop body
LE: loop exit
PB: predicated region body
PF: predicated region fallthrough
CT: control target
= control target key end

     0   :  { %s4599_s12 = smov 0   ;;  %s4601_s13 = smov 0   ;;  %s6321_s0 = inlined_call_operand.vmem [shape: bf16[2,18,18,4], index: 0, kind: input, shape index: {}]   ;;  %s6322_s1 = inlined_call_operand.vmem [shape: bf16[36,8], index: 1, kind: input, shape index: {}]   ;;  %s6323_s2 = inlined_call_operand.vmem [shape: bf16[2,8,256], index: 2, kind: output, shape index: {0}]   ;;  %s6324_s3 = inlined_call_operand.vmem [shape: f32[2,2,8], index: 3, kind: output, shape index: {1}]  }
   0x1   :  { %s4603_s14 = smov 0  }
   0x2 LB: > { %s26_s15 = sadd.s32 1, %s4565_s13  ;;  %p4050_p0 = scmp.ge.s32.totalorder %s4569_s14, 1  ;;  %s4569_s14 = sphi %s4603_s14, %s14_s14   ;;  %s4565_s13 = sphi %s4601_s13, %s6330_s13   ;;  %s4561_s12 = sphi %s4599_s12, %s6329_s12  }
   0x3   : > { %p28_p1 = scmp.ge.s32.totalorder %s26_s15, 2  ;;  %p156_p2 = scmp.lt.s32.totalorder %s4569_s14, 3 }
   0x5   : > { %s6332_s15 = smov (%p28_p1, %s26_s15), 0  ;;  %p157_p3 = pnand %p4050_p0, %p156_p2 }
   0x6   : > { %p189_p4 = scmp.lt.s32.totalorder (!%p157_p3), %s4561_s12, 1  ;;  %s4571_s20 = smov (!%p157_p3), 4  }
   0x7   : > { %160 = sbr.rel (%p157_p3) target bundleno = 1067 (0x42b), region = 28  ;;  %s4572_s21 = smov (!%p157_p3), 8  }
   0x8   : > { %s4573_s22 = smov (!%p157_p3), 12   ;;  %s4574_s23 = smov (!%p157_p3), 16  }
   0x9   : > { %s4575_s24 = smov (!%p157_p3), 20   ;;  %s4576_s25 = smov (!%p157_p3), 24  }
   0xa   : > { %s4577_s26 = smov (!%p157_p3), 28   ;;  %s4578_s27 = smov (!%p157_p3), 32  }
   0xc   : > { %s6334_s12 = smov (!%p189_p4, %s4561_s12), 1  ;;  %vm328_vm0 = vsmask.f32 3328  ;;  %vm329_vm1 = vsmask.f32 7440  ;;  %vm940_vm3 = vcmask 1042432  }
   0xd   : > { %s4477_s16 = smul.u32 216, %s6334_s12  ;;  %vm4634_vm2 = vmor %vm328_vm0, %vm329_vm1  ;;  %vm941_vm4 = vcmask 1046532   ;;  %vm247_vm5 = vcmask 27648   ;;  %vm811_vm7 = vcmask 60448   ;;  %vm1151_vm8 = vcmask 93248   ;;  %s4054_s7 = sshll.u32 %s6334_s12, 1 }
   0xe   : > { %vm4809_vm6 = vmor %vm940_vm3, %vm941_vm4  ;;  %vm1348_vm9 = vcmask 126048   ;;  %vm1909_vm10 = vcmask 158848   ;;  %vm2246_vm11 = vcmask 191648   ;;  %vm2443_vm12 = vcmask 224448   ;;  %s6196_s10 = scalar_lea.vmem %s6324_s3, %s4054_s7  ;;  %s4449_s11 = sshll.u32 %s6334_s12, 3 }
   0xf   : > { %s4623_s19 = scalar_lea.vmem %s6321_s0, %s4477_s16  ;;  %vm3555_vm13 = vcmask 1041408   ;;  %vm3004_vm14 = vcmask 257248   ;;  %vm3341_vm15 = vcmask 290048   ;;  %vm3506_vm0 = vcmask 293888   ;;  %s202_s18 = scalar_lea.vmem %s6323_s2, %s4449_s11 }
  0x10   : > { %v283_v0 = vld [vmem:[%s4623_s19 + $0xc] sm:$0xf]  ;;  %v284_v1 = vld [vmem:[%s4623_s19 + $0x10] sm:$0xf]  ;;  %v280_v2 = vld [vmem:[%s4623_s19] sm:$0xf] }
  0x11   : > { %v356_v3 = vshrl.u32 %v283_v0, 16  ;;  %v359_v4 = vshll.u32 %v283_v0, 16  ;;  %v365_v5 = vshll.u32 %v284_v1, 16  ;;  %v369_v6 = vshrl.u32 %v284_v1, 16  ;;  %v281_v7 = vld [vmem:[%s4623_s19 + $0x4] sm:$0xf] }
  0x12   : > { %v332_v8 = vshrl.u32 %v280_v2, 16  ;;  %v335_v9 = vshll.u32 %v280_v2, 16  ;;  %v341_v10 = vshll.u32 %v281_v7, 16  ;;  %v345_v11 = vshrl.u32 %v281_v7, 16  ;;  %v285_v12 = vld [vmem:[%s4623_s19 + $0x14] sm:$0x1] }
  0x13   : > { %v358_v13 = vrot.slane %v356_v3, 4  ;;  %v361_v14 = vrot.slane %v359_v4, 5  ;;  %v367_v15 = vrot.slane %v365_v5, 5  ;;  %v371_v16 = vrot.slane %v369_v6, 4  ;;  %v282_v17 = vld [vmem:[%s4623_s19 + $0x8] sm:$0x1] }
  0x14   : > { %v334_v18 = vrot.slane %v332_v8, 4  ;;  %v337_v19 = vrot.slane %v335_v9, 5  ;;  %v347_v20 = vrot.slane %v345_v11, 4  ;;  %v290_v21 = vld [vmem:[%s4623_s19 + $0x28] sm:$0xf]  ;;  %v375_v24 = vshll.u32 %v285_v12, 16 }
  0x15   : > { %v362_v22 = vor.u32 %v361_v14, %v358_v13  ;;  %v372_v23 = vor.u32 %v371_v16, %v367_v15  ;;  %v343_v27 = vrot.slane %v341_v10, 5  ;;  %v413_v28 = vshll.u32 %v290_v21, 16  ;;  %v289_v30 = vld [vmem:[%s4623_s19 + $0x24] sm:$0xf]  ;;  %v286_v35 = vld [vmem:[%s4623_s19 + $0x18] sm:$0xf] }
  0x16   : > { %v338_v26 = vor.u32 %v337_v19, %v334_v18  ;;  %v417_v29 = vshrl.u32 %v290_v21, 16  ;;  %v351_v32 = vshll.u32 %v282_v17, 16  ;;  %v377_v38 = vrot.slane %v375_v24, 5  ;;  %v287_v40 = vld [vmem:[%s4623_s19 + $0x1c] sm:$0xf] }
  0x17   : > { %v363_v31 = vrot.slane %v362_v22, 4  ;;  %v348_v34 = vor.u32 %v347_v20, %v343_v27  ;;  %v373_v37 = vrot.slane %v372_v23, 4  ;;  %v404_v39 = vshrl.u32 %v289_v30, 16  ;;  %v291_v42 = vld [vmem:[%s4623_s19 + $0x2c] sm:$0x1] }
  0x18   : > { %v339_v33 = vrot.slane %v338_v26, 4  ;;  %v4647_v43 = vrot.slane %v413_v28, 5  ;;  %v419_v44 = vrot.slane %v417_v29, 4  ;;  %v407_v45 = vshll.u32 %v289_v30, 16  ;;  %v295_v50 = vld [vmem:[%s4623_s19 + $0x3c] sm:$0xf] }
  0x19   : > { %v368_v36 = vsel %vm4634_vm2, %v363_v31, %v367_v15  ;;  %v353_v46 = vrot.slane %v351_v32, 5  ;;  %v406_v47 = vrot.slane %v404_v39, 4  ;;  %v380_v48 = vshrl.u32 %v286_v35, 16  ;;  %v293_v58 = vld [vmem:[%s4623_s19 + $0x34] sm:$0xf] }
  0x1a   : > { %719 = vrot.lane.b32.xlu1 %v368_v36, %s4571_s20  ;;  %v344_v41 = vsel %vm4634_vm2, %v339_v33, %v343_v27  ;;  %v383_v49 = vshll.u32 %v286_v35, 16  ;;  %v349_v51 = vrot.slane %v348_v34, 4  ;;  %v409_v52 = vrot.slane %v407_v45, 5  ;;  %v288_v6 = vld [vmem:[%s4623_s19 + $0x20] sm:$0x1] }
  0x1b   : > { %715 = vrot.lane.b32.xlu0 %v344_v41, %s4571_s20  ;;  %v389_v53 = vshll.u32 %v287_v40, 16  ;;  %v393_v54 = vshrl.u32 %v287_v40, 16  ;;  %v423_v55 = vshll.u32 %v291_v42, 16  ;;  %v382_v56 = vrot.slane %v380_v48, 4  ;;  %v296_v15 = vld [vmem:[%s4623_s19 + $0x40] sm:$0xf] }
  0x1c   : > { %v385_v57 = vrot.slane %v383_v49, 5  ;;  %v420_v59 = vor.u32 %v419_v44, %v4647_v43  ;;  %v452_v61 = vshrl.u32 %v295_v50, 16  ;;  %v455_v62 = vshll.u32 %v295_v50, 16  ;;  %v294_v16 = vld [vmem:[%s4623_s19 + $0x38] sm:$0x1] }
  0x1d   : > { %v395_v60 = vrot.slane %v393_v54, 4  ;;  %v378_v63 = vsel %vm4634_vm2, %v373_v37, %v377_v38  ;;  %v410_v0 = vor.u32 %v409_v52, %v406_v47  ;;  %v391_v2 = vrot.slane %v389_v53, 5  ;;  %v299_v20 = vld [vmem:[%s4623_s19 + $0x4c] sm:$0xf]  ;;  %v292_v21 = vld [vmem:[%s4623_s19 + $0x30] sm:$0xf] }
  0x1e   : > { %v386_v1 = vor.u32 %v385_v57, %v382_v56  ;;  %v354_v3 = vsel %vm4634_vm2, %v349_v51, %v353_v46  ;;  %v437_v4 = vshll.u32 %v293_v58, 16  ;;  %v441_v5 = vshrl.u32 %v293_v58, 16  ;;  %v298_v24 = vld [vmem:[%s4623_s19 + $0x48] sm:$0xf]  ;;  %v304_v47 = vld [vmem:[%s4623_s19 + $0x60] sm:$0xf] }
  0x1f   : > { %v425_v7 = vrot.slane %v423_v55, 5  ;;  %v421_v9 = vrot.slane %v420_v59, 4  ;;  %v454_v10 = vrot.slane %v452_v61, 4  ;;  %v457_v11 = vrot.slane %v455_v62, 5  ;;  %v300_v49 = vld [vmem:[%s4623_s19 + $0x50] sm:$0x1] }
  0x20   : > { %v387_v8 = vrot.slane %v386_v1, 4  ;;  %v396_v12 = vor.u32 %v395_v60, %v391_v2  ;;  %v411_v13 = vrot.slane %v410_v0, 4  ;;  %v399_v17 = vshll.u32 %v288_v6, 16  ;;  %v302_v53 = vld [vmem:[%s4623_s19 + $0x58] sm:$0xf] }
  0x21   : > { %v4665_v18 = vrot.slane %v437_v4, 5  ;;  %v443_v19 = vrot.slane %v441_v5, 4  ;;  %v426_v26 = vsel %vm4634_vm2, %v421_v9, %v425_v7  ;;  %v458_v27 = vor.u32 %v457_v11, %v454_v10  ;;  %v297_v58 = vld [vmem:[%s4623_s19 + $0x44] sm:$0x1]  ;;  %v308_v11 = vld [vmem:[%s4623_s19 + $0x70] sm:$0xf] }
  0x22   : > { %721 = vrot.lane.b32.xlu1 %v378_v63, %s4571_s20  ;;  %v392_v14 = vsel %vm4634_vm2, %v387_v8, %v391_v2  ;;  %v397_v22 = vrot.slane %v396_v12, 4  ;;  %v401_v23 = vrot.slane %v399_v17, 5  ;;  %v461_v28 = vshll.u32 %v296_v15, 16  ;;  %v301_v2 = vld [vmem:[%s4623_s19 + $0x54] sm:$0xf] }
  0x23   : > { %717 = vrot.lane.b32.xlu0 %v354_v3, %s4571_s20  ;;  %723 = vrot.lane.b32.xlu2 %v392_v14, %s4571_s20  ;;  %v447_v29 = vshll.u32 %v294_v16, 16  ;;  %v416_v30 = vsel %vm4634_vm2, %v411_v13, %v4647_v43  ;;  %v485_v31 = vshll.u32 %v299_v20, 16  ;;  %v489_v32 = vshrl.u32 %v299_v20, 16  ;;  %v305_v6 = vld [vmem:[%s4623_s19 + $0x64] sm:$0xf] }
  0x24   : > { %v428_v33 = vshrl.u32 %v292_v21, 16  ;;  %v444_v34 = vor.u32 %v443_v19, %v4665_v18  ;;  %v476_v35 = vshrl.u32 %v298_v24, 16  ;;  %v479_v36 = vshll.u32 %v298_v24, 16  ;;  %v307_v20 = vld [vmem:[%s4623_s19 + $0x6c] sm:$0xf] }
  0x25   : > { %v431_v37 = vshll.u32 %v292_v21, 16  ;;  %v465_v38 = vshrl.u32 %v296_v15, 16  ;;  %v402_v39 = vsel %vm4634_vm2, %v397_v22, %v401_v23  ;;  %v463_v41 = vrot.slane %v461_v28, 5  ;;  %v303_v15 = vld [vmem:[%s4623_s19 + $0x5c] sm:$0x1] }
  0x26   : > { %v430_v40 = vrot.slane %v428_v33, 4  ;;  %v459_v43 = vrot.slane %v458_v27, 4  ;;  %v449_v44 = vrot.slane %v447_v29, 5  ;;  %v4680_v45 = vrot.slane %v485_v31, 5 }
  0x27   : > { %v433_v42 = vrot.slane %v431_v37, 5  ;;  %v491_v46 = vrot.slane %v489_v32, 4  ;;  %v445_v48 = vrot.slane %v444_v34, 4  ;;  %v478_v50 = vrot.slane %v476_v35, 4 }
  0x28   : > { %v481_v51 = vrot.slane %v479_v36, 5  ;;  %v467_v54 = vrot.slane %v465_v38, 4  ;;  %v524_v56 = vshrl.u32 %v304_v47, 16  ;;  %v527_v57 = vshll.u32 %v304_v47, 16  ;;  %v311_v47 = vld [vmem:[%s4623_s19 + $0x7c] sm:$0xf] }
  0x29   : > { %v434_v52 = vor.u32 %v433_v42, %v430_v40  ;;  %v464_v59 = vsel %vm4634_vm2, %v459_v43, %v463_v41  ;;  %v492_v60 = vor.u32 %v491_v46, %v4680_v45  ;;  %v495_v61 = vshll.u32 %v300_v49, 16  ;;  %v313_v42 = vld [vmem:[%s4623_s19 + $0x84] sm:$0xf]  ;;  %v306_v49 = vld [vmem:[%s4623_s19 + $0x68] sm:$0x1] }
  0x2a   : > { %729 = vrot.lane.b32.xlu1 %v426_v26, %s4571_s20  ;;  %v450_v62 = vsel %vm4634_vm2, %v445_v48, %v449_v44  ;;  %v482_v63 = vor.u32 %v481_v51, %v478_v50  ;;  %v509_v0 = vshll.u32 %v302_v53, 16  ;;  %v513_v1 = vshrl.u32 %v302_v53, 16 }
  0x2b   : > { %727 = vrot.lane.b32.xlu0 %v416_v30, %s4571_s20  ;;  %725 = vrot.lane.b32.xlu2 %v402_v39, %s4571_s20  ;;  %v435_v55 = vrot.slane %v434_v52, 4  ;;  %v468_v4 = vor.u32 %v467_v54, %v463_v41  ;;  %v471_v5 = vshll.u32 %v297_v58, 16  ;;  %v526_v7 = vrot.slane %v524_v56, 4  ;;  %v309_v41 = vld [vmem:[%s4623_s19 + $0x74] sm:$0x1] }
  0x2c   : > { %v529_v8 = vrot.slane %v527_v57, 5  ;;  %v493_v9 = vrot.slane %v492_v60, 4  ;;  %v497_v10 = vrot.slane %v495_v61, 5  ;;  %v500_v12 = vshrl.u32 %v301_v2, 16  ;;  %v310_v54 = vld [vmem:[%s4623_s19 + $0x78] sm:$0xf] }
  0x2d   : > { %v440_v3 = vsel %vm4634_vm2, %v435_v55, %v4665_v18  ;;  %v503_v13 = vshll.u32 %v301_v2, 16  ;;  %v483_v14 = vrot.slane %v482_v63, 4  ;;  %v4702_v16 = vrot.slane %v509_v0, 5 }
  0x2e   : > { %v515_v17 = vrot.slane %v513_v1, 4  ;;  %v469_v18 = vrot.slane %v468_v4, 4  ;;  %v473_v19 = vrot.slane %v471_v5, 5  ;;  %v502_v21 = vrot.slane %v500_v12, 4  ;;  %v314_v4 = vld [vmem:[%s4623_s19 + $0x88] sm:$0xf] }
  0x2f   : > { %v505_v22 = vrot.slane %v503_v13, 5  ;;  %v530_v23 = vor.u32 %v529_v8, %v526_v7  ;;  %v533_v24 = vshll.u32 %v305_v6, 16  ;;  %v557_v26 = vshll.u32 %v308_v11, 16 }
  0x30   : > { %v561_v27 = vshrl.u32 %v308_v11, 16  ;;  %v498_v28 = vsel %vm4634_vm2, %v493_v9, %v497_v10  ;;  %v519_v29 = vshll.u32 %v303_v15, 16  ;;  %v488_v30 = vsel %vm4634_vm2, %v483_v14, %v4680_v45  ;;  %v317_v9 = vld [vmem:[%s4623_s19 + $0x94] sm:$0xf]  ;;  %v312_v11 = vld [vmem:[%s4623_s19 + $0x80] sm:$0x1] }
  0x31   : > { %v516_v31 = vor.u32 %v515_v17, %v4702_v16  ;;  %v548_v32 = vshrl.u32 %v307_v20, 16  ;;  %v551_v33 = vshll.u32 %v307_v20, 16  ;;  %v537_v34 = vshrl.u32 %v305_v6, 16  ;;  %v316_v14 = vld [vmem:[%s4623_s19 + $0x90] sm:$0xf] }
  0x32   : > { %735 = vrot.lane.b32.xlu1 %v464_v59, %s4571_s20  ;;  %v474_v35 = vsel %vm4634_vm2, %v469_v18, %v473_v19  ;;  %v506_v36 = vor.u32 %v505_v22, %v502_v21  ;;  %v531_v37 = vrot.slane %v530_v23, 4  ;;  %v535_v38 = vrot.slane %v533_v24, 5 }
  0x33   : > { %733 = vrot.lane.b32.xlu0 %v450_v62, %s4571_s20  ;;  %731 = vrot.lane.b32.xlu2 %v440_v3, %s4571_s20  ;;  %v4714_v39 = vrot.slane %v557_v26, 5  ;;  %v563_v40 = vrot.slane %v561_v27, 4  ;;  %v517_v43 = vrot.slane %v516_v31, 4  ;;  %v521_v44 = vrot.slane %v519_v29, 5 }
  0x34   : > { %v550_v45 = vrot.slane %v548_v32, 4  ;;  %v553_v46 = vrot.slane %v551_v33, 5  ;;  %v507_v48 = vrot.slane %v506_v36, 4  ;;  %v539_v50 = vrot.slane %v537_v34, 4 }
  0x35   : > { %v536_v51 = vsel %vm4634_vm2, %v531_v37, %v535_v38  ;;  %v564_v52 = vor.u32 %v563_v40, %v4714_v39  ;;  %v567_v53 = vshll.u32 %v309_v41, 16  ;;  %v596_v55 = vshrl.u32 %v313_v42, 16  ;;  %v318_v37 = vld [vmem:[%s4623_s19 + $0x98] sm:$0x1]  ;;  %v322_v40 = vld [vmem:[%s4623_s19 + $0xa8] sm:$0xf] }
  0x36   : > { %v599_v56 = vshll.u32 %v313_v42, 16  ;;  %v581_v57 = vshll.u32 %v311_v47, 16  ;;  %v585_v58 = vshrl.u32 %v311_v47, 16  ;;  %v522_v59 = vsel %vm4634_vm2, %v517_v43, %v521_v44  ;;  %v320_v42 = vld [vmem:[%s4623_s19 + $0xa0] sm:$0xf] }
  0x37   : > { %v554_v60 = vor.u32 %v553_v46, %v550_v45  ;;  %v543_v61 = vshll.u32 %v306_v49, 16  ;;  %v512_v62 = vsel %vm4634_vm2, %v507_v48, %v4702_v16  ;;  %v540_v63 = vor.u32 %v539_v50, %v535_v38  ;;  %v315_v43 = vld [vmem:[%s4623_s19 + $0x8c] sm:$0x1]  ;;  %v319_v47 = vld [vmem:[%s4623_s19 + $0x9c] sm:$0xf] }
  0x38   : > { %v572_v0 = vshrl.u32 %v310_v54, 16  ;;  %v575_v1 = vshll.u32 %v310_v54, 16  ;;  %v565_v2 = vrot.slane %v564_v52, 4  ;;  %v569_v3 = vrot.slane %v567_v53, 5 }
  0x39   : > { %v598_v5 = vrot.slane %v596_v55, 4  ;;  %v601_v6 = vrot.slane %v599_v56, 5  ;;  %v4734_v7 = vrot.slane %v581_v57, 5  ;;  %v587_v8 = vrot.slane %v585_v58, 4 }
  0x3a   : > { %741 = vrot.lane.b32.xlu1 %v498_v28, %s4571_s20  ;;  %v555_v10 = vrot.slane %v554_v60, 4  ;;  %v541_v12 = vrot.slane %v540_v63, 4  ;;  %v545_v13 = vrot.slane %v543_v61, 5  ;;  %v574_v15 = vrot.slane %v572_v0, 4 }
  0x3b   : > { %739 = vrot.lane.b32.xlu0 %v488_v30, %s4571_s20  ;;  %737 = vrot.lane.b32.xlu2 %v474_v35, %s4571_s20  ;;  %v577_v16 = vrot.slane %v575_v1, 5  ;;  %v605_v17 = vshll.u32 %v314_v4, 16  ;;  %v629_v18 = vshll.u32 %v317_v9, 16  ;;  %v633_v19 = vshrl.u32 %v317_v9, 16  ;;  %v321_v1 = vld [vmem:[%s4623_s19 + $0xa4] sm:$0x1] }
  0x3c   : > { %v570_v20 = vsel %vm4634_vm2, %v565_v2, %v569_v3  ;;  %v602_v21 = vor.u32 %v601_v6, %v598_v5  ;;  %v588_v22 = vor.u32 %v587_v8, %v4734_v7  ;;  %v591_v23 = vshll.u32 %v312_v11, 16  ;;  %v326_v5 = vld [vmem:[%s4623_s19 + $0xb8] sm:$0xf]  ;;  %v325_v8 = vld [vmem:[%s4623_s19 + $0xb4] sm:$0xf] }
  0x3d   : > { %v560_v24 = vsel %vm4634_vm2, %v555_v10, %v4714_v39  ;;  %v620_v26 = vshrl.u32 %v316_v14, 16  ;;  %v623_v27 = vshll.u32 %v316_v14, 16  ;;  %v609_v28 = vshrl.u32 %v314_v4, 16 }
  0x3e   : > { %v546_v29 = vsel %vm4634_vm2, %v541_v12, %v545_v13  ;;  %v578_v30 = vor.u32 %v577_v16, %v574_v15  ;;  %v4749_v31 = vrot.slane %v629_v18, 5  ;;  %v635_v32 = vrot.slane %v633_v19, 4 }
  0x3f   : > { %v603_v33 = vrot.slane %v602_v21, 4  ;;  %v607_v34 = vrot.slane %v605_v17, 5  ;;  %v589_v35 = vrot.slane %v588_v22, 4  ;;  %v593_v36 = vrot.slane %v591_v23, 5 }
  0x40   : > { %v622_v38 = vrot.slane %v620_v26, 4  ;;  %v625_v39 = vrot.slane %v623_v27, 5  ;;  %v579_v41 = vrot.slane %v578_v30, 4  ;;  %v611_v44 = vrot.slane %v609_v28, 4 }
  0x41   : > { %v636_v45 = vor.u32 %v635_v32, %v4749_v31  ;;  %v639_v46 = vshll.u32 %v318_v37, 16  ;;  %v608_v48 = vsel %vm4634_vm2, %v603_v33, %v607_v34  ;;  %v594_v49 = vsel %vm4634_vm2, %v589_v35, %v593_v36  ;;  %v324_v36 = vld [vmem:[%s4623_s19 + $0xb0] sm:$0x1] }
  0x42   : > { %747 = vrot.lane.b32.xlu1 %v536_v51, %s4571_s20  ;;  %v668_v50 = vshrl.u32 %v322_v40, 16  ;;  %v671_v51 = vshll.u32 %v322_v40, 16  ;;  %v626_v52 = vor.u32 %v625_v39, %v622_v38  ;;  %v653_v53 = vshll.u32 %v320_v42, 16 }
  0x43   : > { %745 = vrot.lane.b32.xlu0 %v522_v59, %s4571_s20  ;;  %743 = vrot.lane.b32.xlu2 %v512_v62, %s4571_s20  ;;  %v657_v54 = vshrl.u32 %v320_v42, 16  ;;  %v615_v55 = vshll.u32 %v315_v43, 16  ;;  %v584_v56 = vsel %vm4634_vm2, %v579_v41, %v4734_v7  ;;  %v612_v57 = vor.u32 %v611_v44, %v607_v34  ;;  %v323_v62 = vld [vmem:[%s4623_s19 + $0xac] sm:$0xf] }
  0x44   : > { %v644_v58 = vshrl.u32 %v319_v47, 16  ;;  %v647_v59 = vshll.u32 %v319_v47, 16  ;;  %v637_v60 = vrot.slane %v636_v45, 4  ;;  %v641_v61 = vrot.slane %v639_v46, 5 }
  0x45   : > { %v670_v63 = vrot.slane %v668_v50, 4  ;;  %v673_v0 = vrot.slane %v671_v51, 5  ;;  %v627_v2 = vrot.slane %v626_v52, 4  ;;  %v655_v3 = vrot.slane %v653_v53, 5  ;;  %v847_v51 = vld [vmem:[%s4623_s19 + $0xc] sm:$0xe] }
  0x46   : > { %v659_v4 = vrot.slane %v657_v54, 4  ;;  %v613_v6 = vrot.slane %v612_v57, 4  ;;  %v617_v7 = vrot.slane %v615_v55, 5  ;;  %v646_v9 = vrot.slane %v644_v58, 4  ;;  %v848_v53 = vld [vmem:[%s4623_s19 + $0x10] sm:$0xf] }
  0x47   : > { %v649_v10 = vrot.slane %v647_v59, 5  ;;  %v642_v11 = vsel %vm4634_vm2, %v637_v60, %v641_v61  ;;  %v677_v12 = vshll.u32 %v323_v62, 16  ;;  %v674_v13 = vor.u32 %v673_v0, %v670_v63  ;;  %v846_v54 = vld [vmem:[%s4623_s19 + $0x8] sm:$0x1]  ;;  %v844_v61 = vld [vmem:[%s4623_s19] sm:$0xe] }
  0x48   : > { %v663_v14 = vshll.u32 %v321_v1, 16  ;;  %v701_v15 = vshll.u32 %v326_v5, 16  ;;  %v705_v16 = vshrl.u32 %v326_v5, 16  ;;  %v632_v17 = vsel %vm4634_vm2, %v627_v2, %v4749_v31  ;;  %v327_v31 = vld [vmem:[%s4623_s19 + $0xbc] sm:$0x1] }
  0x49   : > { %v660_v18 = vor.u32 %v659_v4, %v655_v3  ;;  %v692_v19 = vshrl.u32 %v325_v8, 16  ;;  %v681_v21 = vshrl.u32 %v323_v62, 16  ;;  %v618_v22 = vsel %vm4634_vm2, %v613_v6, %v617_v7  ;;  %v851_v63 = vld [vmem:[%s4623_s19 + $0x1c] sm:$0xf]  ;;  %v219_v0 = vld [vmem:[%s4623_s19 + $0x18] sm:$0xf] }
  0x4a   : > { %753 = vrot.lane.b32.xlu1 %v570_v20, %s4571_s20  ;;  %v695_v20 = vshll.u32 %v325_v8, 16  ;;  %v650_v23 = vor.u32 %v649_v10, %v646_v9  ;;  %v679_v26 = vrot.slane %v677_v12, 5  ;;  %v703_v27 = vrot.slane %v701_v15, 5  ;;  %252 = vst.msk [vmem:[#allocation2 + $0x10] sm:$0xf] %vm247_vm5, %v219_v0 }
  0x4b   : > { %751 = vrot.lane.b32.xlu0 %v560_v24, %s4571_s20  ;;  %749 = vrot.lane.b32.xlu2 %v546_v29, %s4571_s20  ;;  %v675_v24 = vrot.slane %v674_v13, 4  ;;  %v707_v28 = vrot.slane %v705_v16, 4  ;;  %v661_v29 = vrot.slane %v660_v18, 4  ;;  %v665_v30 = vrot.slane %v663_v14, 5  ;;  %v217_v2 = vld [vmem:[%s4623_s19 + $0xc] sm:$0xf] }
  0x4c   : > { %v694_v32 = vrot.slane %v692_v19, 4  ;;  %v697_v33 = vrot.slane %v695_v20, 5  ;;  %v651_v34 = vrot.slane %v650_v23, 4  ;;  %v683_v35 = vrot.slane %v681_v21, 4  ;;  %250 = vst.msk [vmem:[#allocation2 + $0x8] sm:$0xf] %vm247_vm5, %v217_v2 }
  0x4d   : > { %v680_v37 = vsel %vm4634_vm2, %v675_v24, %v679_v26  ;;  %v708_v38 = vor.u32 %v707_v28, %v703_v27  ;;  %v711_v39 = vshll.u32 %v327_v31, 16  ;;  %v666_v40 = vsel %vm4634_vm2, %v661_v29, %v665_v30  ;;  %v852_v6 = vld [vmem:[%s4623_s19 + $0x20] sm:$0x1]  ;;  %v850_v9 = vld [vmem:[%s4623_s19 + $0x18] sm:$0xe] }
  0x4e   : > { %v698_v41 = vor.u32 %v697_v33, %v694_v32  ;;  %v656_v42 = vsel %vm4634_vm2, %v651_v34, %v655_v3  ;;  %v684_v43 = vor.u32 %v683_v35, %v679_v26  ;;  %v687_v44 = vshll.u32 %v324_v36, 16  ;;  %v215_v3 = vld [vmem:[%s4623_s19] sm:$0xf]  ;;  %v849_v12 = vld [vmem:[%s4623_s19 + $0x14] sm:$0x1] }
  0x4f   : > { %v709_v45 = vrot.slane %v708_v38, 4  ;;  %v713_v46 = vrot.slane %v711_v39, 5  ;;  %v4056_v58 = vrot.slane %v847_v51, 9  ;;  %v952_v59 = vrot.slane %v848_v53, 5  ;;  %248 = vst.msk [vmem:[#allocation2] sm:$0xf] %vm247_vm5, %v215_v3 }
  0x50   : > { %v699_v47 = vrot.slane %v698_v41, 4  ;;  %v689_v50 = vrot.slane %v687_v44, 5  ;;  %v948_v60 = vrot.slane %v846_v54, 5  ;;  %v4055_v4 = vrot.slane %v844_v61, 9  ;;  %v854_v15 = vld [vmem:[%s4623_s19 + $0x28] sm:$0xf] }
  0x51   : > { %v714_v52 = vsel %vm4634_vm2, %v709_v45, %v713_v46  ;;  %v953_v5 = vsel %vm4809_vm6, %v4056_v58, %v952_v59  ;;  %v959_v7 = vrot.slane %v851_v63, 5  ;;  %v4057_v14 = vrot.slane %v850_v9, 9  ;;  %v220_v16 = vld [vmem:[%s4623_s19 + $0x1c] sm:$0xf]  ;;  %v216_v18 = vld [vmem:[%s4623_s19 + $0x4] sm:$0xf] }
  0x52   : > { %759 = vrot.lane.b32.xlu1 %v608_v48, %s4571_s20  ;;  %v845_v48 = vld [vmem:[%s4623_s19 + $0x4] sm:$0xf]  ;;  %253 = vst.msk [vmem:[#allocation2 + $0x14] sm:$0xf] %vm247_vm5, %v220_v16  ;;  %v954_v19 = vrot.slane %v952_v59, 4  ;;  %v955_v20 = vrot.slane %v849_v12, 5 }
  0x53   : > { %757 = vrot.lane.b32.xlu0 %v594_v49, %s4571_s20  ;;  %755 = vrot.lane.b32.xlu2 %v584_v56, %s4571_s20  ;;  %v685_v49 = vrot.slane %v684_v43, 4  ;;  %v945_v55 = vrot.slane %v845_v48, 5  ;;  %v704_v56 = vsel %vm4634_vm2, %v699_v47, %v703_v27  ;;  %v961_v13 = vrot.slane %v959_v7, 4  ;;  %249 = vst.msk [vmem:[#allocation2 + $0x4] sm:$0xf] %vm247_vm5, %v216_v18 }
  0x54   : > { %v857_v23 = vld [vmem:[%s4623_s19 + $0x34] sm:$0xf]  ;;  %v966_v24 = vrot.slane %v854_v15, 5  ;;  %v960_v26 = vsel %vm4809_vm6, %v4057_v14, %v959_v7  ;;  %v855_v27 = vld [vmem:[%s4623_s19 + $0x2c] sm:$0x1]  ;;  %v956_v28 = vsel %vm4809_vm6, %v954_v19, %v955_v20  ;;  %vm3648_vm1 = vcmask 64512  }
  0x55   : > { %v690_v57 = vsel %vm4634_vm2, %v685_v49, %v689_v50  ;;  %v947_v62 = vrot.slane %v945_v55, 4  ;;  %v946_v10 = vsel %vm4809_vm6, %v4055_v4, %v945_v55  ;;  %v973_v30 = vrot.slane %v857_v23, 5  ;;  %v853_v31 = vld [vmem:[%s4623_s19 + $0x24] sm:$0xe]  ;;  %v860_v34 = vld [vmem:[%s4623_s19 + $0x40] sm:$0xf] }
  0x56   : > { %v968_v32 = vrot.slane %v966_v24, 4  ;;  %v969_v33 = vrot.slane %v855_v27, 5  ;;  %v223_v35 = vld [vmem:[%s4623_s19 + $0x30] sm:$0xf]  ;;  %v222_v36 = vld [vmem:[%s4623_s19 + $0x28] sm:$0xf] }
  0x57   : > { %v949_v8 = vsel %vm4809_vm6, %v947_v62, %v948_v60  ;;  %256 = vst.msk [vmem:[#allocation2 + $0x20] sm:$0xf] %vm247_vm5, %v223_v35  ;;  %v4058_v38 = vrot.slane %v853_v31, 9  ;;  %v980_v41 = vrot.slane %v860_v34, 5  ;;  %v861_v43 = vld [vmem:[%s4623_s19 + $0x44] sm:$0x1] }
  0x58   : > { %255 = vst.msk [vmem:[#allocation2 + $0x1c] sm:$0xf] %vm247_vm5, %v222_v36  ;;  %v859_v44 = vld [vmem:[%s4623_s19 + $0x3c] sm:$0xe]  ;;  %v858_v46 = vld [vmem:[%s4623_s19 + $0x38] sm:$0x1] }
  0x59   : > { %v967_v45 = vsel %vm4809_vm6, %v4058_v38, %v966_v24  ;;  %v982_v47 = vrot.slane %v980_v41, 4  ;;  %v983_v48 = vrot.slane %v861_v43, 5  ;;  %v4060_v49 = vrot.slane %v859_v44, 9  ;;  %v226_v50 = vld [vmem:[%s4623_s19 + $0x40] sm:$0xf] }
  0x5a   : > { %765 = vrot.lane.b32.xlu1 %v642_v11, %s4571_s20  ;;  %v962_v11 = vrot.slane %v852_v6, 5  ;;  %259 = vst.msk [vmem:[#allocation2 + $0x2c] sm:$0xf] %vm247_vm5, %v226_v50  ;;  %v225_v51 = vld [vmem:[%s4623_s19 + $0x3c] sm:$0xf]  ;;  %v975_v54 = vrot.slane %v973_v30, 4 }
  0x5b   : > { %763 = vrot.lane.b32.xlu0 %v632_v17, %s4571_s20  ;;  %761 = vrot.lane.b32.xlu2 %v618_v22, %s4571_s20  ;;  %v218_v17 = vld [vmem:[%s4623_s19 + $0x10] sm:$0xf]  ;;  %v863_v53 = vld [vmem:[%s4623_s19 + $0x4c] sm:$0xf]  ;;  %v976_v55 = vrot.slane %v858_v46, 5  ;;  %v981_v58 = vsel %vm4809_vm6, %v4060_v49, %v980_v41 }
  0x5c   : > { %251 = vst.msk [vmem:[#allocation2 + $0xc] sm:$0xf] %vm247_vm5, %v218_v17  ;;  %v963_v21 = vsel %vm4809_vm6, %v961_v13, %v962_v11  ;;  %v856_v22 = vld [vmem:[%s4623_s19 + $0x30] sm:$0xe]  ;;  %v865_v59 = vld [vmem:[%s4623_s19 + $0x54] sm:$0xe] }
  0x5d   : > { %v4059_v29 = vrot.slane %v856_v22, 9  ;;  %258 = vst.msk [vmem:[#allocation2 + $0x28] sm:$0xf] %vm247_vm5, %v225_v51  ;;  %v866_v60 = vld [vmem:[%s4623_s19 + $0x58] sm:$0xf]  ;;  %v987_v61 = vrot.slane %v863_v53, 5  ;;  %v977_v63 = vsel %vm4809_vm6, %v975_v54, %v976_v55 }
  0x5e   : > { %v864_v62 = vld [vmem:[%s4623_s19 + $0x50] sm:$0x1]  ;;  %v862_v0 = vld [vmem:[%s4623_s19 + $0x48] sm:$0xe]  ;;  %v4062_v2 = vrot.slane %v865_v59, 9  ;;  %v994_v3 = vrot.slane %v866_v60, 5 }
  0x5f   : > { %v229_v4 = vld [vmem:[%s4623_s19 + $0x54] sm:$0xf]  ;;  %v989_v6 = vrot.slane %v987_v61, 4  ;;  %v990_v7 = vrot.slane %v864_v62, 5  ;;  %v228_v11 = vld [vmem:[%s4623_s19 + $0x4c] sm:$0xf] }
  0x60   : > { %262 = vst.msk [vmem:[#allocation2 + $0x38] sm:$0xf] %vm247_vm5, %v229_v4  ;;  %v227_v13 = vld [vmem:[%s4623_s19 + $0x48] sm:$0xf]  ;;  %v995_v14 = vsel %vm4809_vm6, %v4062_v2, %v994_v3  ;;  %v868_v18 = vld [vmem:[%s4623_s19 + $0x60] sm:$0xe] }
  0x61   : > { %v991_v16 = vsel %vm4809_vm6, %v989_v6, %v990_v7  ;;  %v870_v17 = vld [vmem:[%s4623_s19 + $0x68] sm:$0x1]  ;;  %261 = vst.msk [vmem:[#allocation2 + $0x34] sm:$0xf] %vm247_vm5, %v228_v11  ;;  %v867_v20 = vld [vmem:[%s4623_s19 + $0x5c] sm:$0x1] }
  0x62   : > { %771 = vrot.lane.b32.xlu1 %v680_v37, %s4571_s20  ;;  %v221_v37 = vld [vmem:[%s4623_s19 + $0x24] sm:$0xf]  ;;  %260 = vst.msk [vmem:[#allocation2 + $0x30] sm:$0xf] %vm247_vm5, %v227_v13  ;;  %v1004_v22 = vrot.slane %v870_v17, 5 }
  0x63   : > { %769 = vrot.lane.b32.xlu0 %v666_v40, %s4571_s20  ;;  %767 = vrot.lane.b32.xlu2 %v656_v42, %s4571_s20  ;;  %254 = vst.msk [vmem:[#allocation2 + $0x18] sm:$0xf] %vm247_vm5, %v221_v37  ;;  %v974_v40 = vsel %vm4809_vm6, %v4059_v29, %v973_v30  ;;  %v970_v42 = vsel %vm4809_vm6, %v968_v32, %v969_v33  ;;  %v232_v23 = vld [vmem:[%s4623_s19 + $0x64] sm:$0xf]  ;;  %v872_v27 = vld [vmem:[%s4623_s19 + $0x70] sm:$0xf] }
  0x64   : > { %265 = vst.msk [vmem:[#allocation2 + $0x44] sm:$0xf] %vm247_vm5, %v232_v23  ;;  %v996_v29 = vrot.slane %v994_v3, 4  ;;  %v997_v30 = vrot.slane %v867_v20, 5  ;;  %v231_v31 = vld [vmem:[%s4623_s19 + $0x60] sm:$0xf] }
  0x65   : > { %v230_v33 = vld [vmem:[%s4623_s19 + $0x58] sm:$0xf]  ;;  %v875_v37 = vld [vmem:[%s4623_s19 + $0x7c] sm:$0xf]  ;;  %v1008_v38 = vrot.slane %v872_v27, 5 }
  0x66   : > { %v874_v35 = vld [vmem:[%s4623_s19 + $0x78] sm:$0xe]  ;;  %264 = vst.msk [vmem:[#allocation2 + $0x40] sm:$0xf] %vm247_vm5, %v231_v31  ;;  %v871_v41 = vld [vmem:[%s4623_s19 + $0x6c] sm:$0xe] }
  0x67   : > { %263 = vst.msk [vmem:[#allocation2 + $0x3c] sm:$0xf] %vm247_vm5, %v230_v33  ;;  %v1015_v43 = vrot.slane %v875_v37, 5  ;;  %v235_v44 = vld [vmem:[%s4623_s19 + $0x78] sm:$0xf]  ;;  %v1010_v46 = vrot.slane %v1008_v38, 4 }
  0x68   : > { %268 = vst.msk [vmem:[#allocation2 + $0x50] sm:$0xf] %vm247_vm5, %v235_v44  ;;  %v4064_v50 = vrot.slane %v871_v41, 9  ;;  %v234_v51 = vld [vmem:[%s4623_s19 + $0x70] sm:$0xf] }
  0x69   : > { %v233_v53 = vld [vmem:[%s4623_s19 + $0x6c] sm:$0xf]  ;;  %267 = vst.msk [vmem:[#allocation2 + $0x4c] sm:$0xf] %vm247_vm5, %v234_v51  ;;  %v876_v60 = vld [vmem:[%s4623_s19 + $0x80] sm:$0x1] }
  0x6a   : > { %777 = vrot.lane.b32.xlu1 %v714_v52, %s4571_s20  ;;  %v224_v52 = vld [vmem:[%s4623_s19 + $0x34] sm:$0xf]  ;;  %v1009_v59 = vsel %vm4809_vm6, %v4064_v50, %v1008_v38  ;;  %266 = vst.msk [vmem:[#allocation2 + $0x48] sm:$0xf] %vm247_vm5, %v233_v53  ;;  %v1018_v6 = vrot.slane %v876_v60, 5 }
  0x6b   : > { %775 = vrot.lane.b32.xlu0 %v704_v56, %s4571_s20  ;;  %773 = vrot.lane.b32.xlu2 %v690_v57, %s4571_s20  ;;  %257 = vst.msk [vmem:[#allocation2 + $0x24] sm:$0xf] %vm247_vm5, %v224_v52  ;;  %v984_v57 = vsel %vm4809_vm6, %v982_v47, %v983_v48  ;;  %v878_v48 = vld [vmem:[%s4623_s19 + $0x88] sm:$0xf]  ;;  %v881_v3 = vld [vmem:[%s4623_s19 + $0x94] sm:$0xf] }
  0x6c   : > { %v1022_v55 = vrot.slane %v878_v48, 5  ;;  %v237_v7 = vld [vmem:[%s4623_s19 + $0x84] sm:$0xf]  ;;  %v883_v11 = vld [vmem:[%s4623_s19 + $0x9c] sm:$0xe] }
  0x6d   : > { %v884_v13 = vld [vmem:[%s4623_s19 + $0xa0] sm:$0xf]  ;;  %270 = vst.msk [vmem:[#allocation2 + $0x58] sm:$0xf] %vm247_vm5, %v237_v7  ;;  %v880_v17 = vld [vmem:[%s4623_s19 + $0x90] sm:$0xe] }
  0x6e   : > { %v241_v20 = vld [vmem:[%s4623_s19 + $0x9c] sm:$0xf]  ;;  %v4067_v27 = vrot.slane %v880_v17, 9  ;;  %v885_v37 = vld [vmem:[%s4623_s19 + $0xa4] sm:$0x1] }
  0x6f   : > { %274 = vst.msk [vmem:[#allocation2 + $0x68] sm:$0xf] %vm247_vm5, %v241_v20  ;;  %v891_v53 = vld [vmem:[%s4623_s19 + $0xbc] sm:$0x1] }
  0x70   : > { %v4074_v7 = vld [vmem:[%s4623_s19 + $0x1c] sm:$0xf] }
  0x71   : > { %v4079_v20 = vld [vmem:[%s4623_s19 + $0x3c] sm:$0xf] }
  0x72   : > { %1059 = vrot.lane.b32.xlu1 %v953_v5, %s4572_s21 }
  0x73   : > { %1057 = vrot.lane.b32.xlu0 %v949_v8, %s4572_s21  ;;  %1055 = vrot.lane.b32.xlu2 %v946_v10, %s4572_s21  ;;  %v869_v8 = vld [vmem:[%s4623_s19 + $0x64] sm:$0xf]  ;;  %v4061_v10 = vrot.slane %v862_v0, 9 }
  0x74   : > { %v1001_v15 = vrot.slane %v869_v8, 5 }
  0x75   : > { %v988_v19 = vsel %vm4809_vm6, %v4061_v10, %v987_v61  ;;  %v1024_v61 = vrot.slane %v1022_v55, 4 }
  0x7a   : > { %1065 = vrot.lane.b32.xlu1 %v963_v21, %s4572_s21  ;;  %v1003_v21 = vrot.slane %v1001_v15, 4 }
  0x7b   : > { %1063 = vrot.lane.b32.xlu0 %v960_v26, %s4572_s21  ;;  %1061 = vrot.lane.b32.xlu2 %v956_v28, %s4572_s21  ;;  %v4063_v26 = vrot.slane %v868_v18, 9  ;;  %v4068_v18 = vrot.slane %v883_v11, 9 }
  0x7c   : > { %v1005_v34 = vsel %vm4809_vm6, %v1003_v21, %v1004_v22 }
  0x7d   : > { %v724_v39 = vpop.permute.xlu2 %723  ;;  %v1002_v36 = vsel %vm4809_vm6, %v4063_v26, %v1001_v15  ;;  %v882_v15 = vld [vmem:[%s4623_s19 + $0x98] sm:$0x1] }
  0x7e   : > { %816 = vst.msk [vmem:[#allocation2 + $0x10] sm:$0xf] %vm811_vm7, %v724_v39  ;;  %v873_v39 = vld [vmem:[%s4623_s19 + $0x74] sm:$0x1]  ;;  %v1032_v23 = vrot.slane %v882_v15, 5 }
  0x7f   : > { %v1011_v47 = vrot.slane %v873_v39, 5  ;;  %v4075_v15 = vld [vmem:[%s4623_s19 + $0x24] sm:$0xf] }
  0x82   : > { %1071 = vrot.lane.b32.xlu1 %v974_v40, %s4572_s21  ;;  %v998_v40 = vsel %vm4809_vm6, %v996_v29, %v997_v30  ;;  %v239_v30 = vld [vmem:[%s4623_s19 + $0x90] sm:$0xf] }
  0x83   : > { %1069 = vrot.lane.b32.xlu0 %v970_v42, %s4572_s21  ;;  %1067 = vrot.lane.b32.xlu2 %v967_v45, %s4572_s21  ;;  %v4065_v42 = vrot.slane %v874_v35, 9  ;;  %v886_v35 = vld [vmem:[%s4623_s19 + $0xa8] sm:$0xe]  ;;  %272 = vst.msk [vmem:[#allocation2 + $0x60] sm:$0xf] %vm247_vm5, %v239_v30 }
  0x85   : > { %v726_v56 = vpop.permute.xlu2 %725  ;;  %v1016_v54 = vsel %vm4809_vm6, %v4065_v42, %v1015_v43  ;;  %v4069_v42 = vrot.slane %v886_v35, 9 }
  0x86   : > { %817 = vst.msk [vmem:[#allocation2 + $0x14] sm:$0xf] %vm811_vm7, %v726_v56  ;;  %v1012_v56 = vsel %vm4809_vm6, %v1010_v46, %v1011_v47  ;;  %v1039_v46 = vrot.slane %v885_v37, 5  ;;  %v243_v47 = vld [vmem:[%s4623_s19 + $0xa8] sm:$0xf] }
  0x87   : > { %276 = vst.msk [vmem:[#allocation2 + $0x70] sm:$0xf] %vm247_vm5, %v243_v47 }
  0x8a   : > { %1077 = vrot.lane.b32.xlu1 %v984_v57, %s4572_s21  ;;  %v879_v57 = vld [vmem:[%s4623_s19 + $0x8c] sm:$0x1] }
  0x8b   : > { %1075 = vrot.lane.b32.xlu0 %v981_v58, %s4572_s21  ;;  %1073 = vrot.lane.b32.xlu2 %v977_v63, %s4572_s21  ;;  %v877_v58 = vld [vmem:[%s4623_s19 + $0x84] sm:$0xe]  ;;  %v1025_v62 = vrot.slane %v879_v57, 5  ;;  %v238_v63 = vld [vmem:[%s4623_s19 + $0x88] sm:$0xf] }
  0x8c   : > { %v720_v5 = vpop.permute.xlu1 %719  ;;  %v4066_v2 = vrot.slane %v877_v58, 9  ;;  %271 = vst.msk [vmem:[#allocation2 + $0x5c] sm:$0xf] %vm247_vm5, %v238_v63  ;;  %v1053_v58 = vrot.slane %v891_v53, 5  ;;  %v245_v63 = vld [vmem:[%s4623_s19 + $0xb4] sm:$0xf] }
  0x8d   : > { %814 = vst.msk [vmem:[#allocation2 + $0x8] sm:$0xf] %vm811_vm7, %v720_v5  ;;  %v716_v9 = vpop.permute.xlu0 %715  ;;  %v732_v12 = vpop.permute.xlu2 %731  ;;  %v1017_v5 = vrot.slane %v1015_v43, 4  ;;  %v1026_v10 = vsel %vm4809_vm6, %v1024_v61, %v1025_v62  ;;  %v890_v43 = vld [vmem:[%s4623_s19 + $0xb8] sm:$0xf] }
  0x8e   : > { %812 = vst.msk [vmem:[#allocation2] sm:$0xf] %vm811_vm7, %v716_v9  ;;  %v236_v9 = vld [vmem:[%s4623_s19 + $0x7c] sm:$0xf]  ;;  %v246_v61 = vld [vmem:[%s4623_s19 + $0xb8] sm:$0xf] }
  0x8f   : > { %820 = vst.msk [vmem:[#allocation2 + $0x20] sm:$0xf] %vm811_vm7, %v732_v12  ;;  %v1023_v12 = vsel %vm4809_vm6, %v4066_v2, %v1022_v55  ;;  %v889_v55 = vld [vmem:[%s4623_s19 + $0xb4] sm:$0xe] }
  0x90   : > { %269 = vst.msk [vmem:[#allocation2 + $0x54] sm:$0xf] %vm247_vm5, %v236_v9  ;;  %v4070_v60 = vrot.slane %v889_v55, 9  ;;  %v4072_v9 = vld [vmem:[%s4623_s19 + $0x10] sm:$0xf] }
  0x91   : > { %279 = vst.msk [vmem:[#allocation2 + $0x7c] sm:$0xf] %vm247_vm5, %v246_v61  ;;  %v4097_v61 = vld [vmem:[%s4623_s19 + $0xa8] sm:$0xf] }
  0x92   : > { %1083 = vrot.lane.b32.xlu1 %v995_v14, %s4572_s21  ;;  %v1029_v14 = vrot.slane %v881_v3, 5  ;;  %278 = vst.msk [vmem:[#allocation2 + $0x78] sm:$0xf] %vm247_vm5, %v245_v63 }
  0x93   : > { %1081 = vrot.lane.b32.xlu0 %v991_v16, %s4572_s21  ;;  %1079 = vrot.lane.b32.xlu2 %v988_v19, %s4572_s21  ;;  %v1019_v16 = vsel %vm4809_vm6, %v1017_v5, %v1018_v6  ;;  %v1036_v19 = vrot.slane %v884_v13, 5  ;;  %v4077_v13 = vld [vmem:[%s4623_s19 + $0x30] sm:$0xf] }
  0x94   : > { %v722_v24 = vpop.permute.xlu1 %721  ;;  %v1031_v22 = vrot.slane %v1029_v14, 4 }
  0x95   : > { %815 = vst.msk [vmem:[#allocation2 + $0xc] sm:$0xf] %vm811_vm7, %v722_v24  ;;  %v718_v28 = vpop.permute.xlu0 %717  ;;  %v738_v32 = vpop.permute.xlu2 %737  ;;  %v887_v24 = vld [vmem:[%s4623_s19 + $0xac] sm:$0xf]  ;;  %v1037_v31 = vsel %vm4809_vm6, %v4068_v18, %v1036_v19 }
  0x96   : > { %813 = vst.msk [vmem:[#allocation2 + $0x4] sm:$0xf] %vm811_vm7, %v718_v28  ;;  %v240_v28 = vld [vmem:[%s4623_s19 + $0x94] sm:$0xf]  ;;  %v1033_v33 = vsel %vm4809_vm6, %v1031_v22, %v1032_v23 }
  0x97   : > { %823 = vst.msk [vmem:[#allocation2 + $0x2c] sm:$0xf] %vm811_vm7, %v738_v32  ;;  %v1043_v32 = vrot.slane %v887_v24, 5 }
  0x98   : > { %273 = vst.msk [vmem:[#allocation2 + $0x64] sm:$0xf] %vm247_vm5, %v240_v28  ;;  %v4081_v28 = vld [vmem:[%s4623_s19 + $0x48] sm:$0xf] }
  0x99   : > { %v1045_v38 = vrot.slane %v1043_v32, 4  ;;  %v1044_v51 = vsel %vm4809_vm6, %v4069_v42, %v1043_v32  ;;  %v4086_v32 = vld [vmem:[%s4623_s19 + $0x64] sm:$0xf] }
  0x9a   : > { %1089 = vrot.lane.b32.xlu1 %v1005_v34, %s4572_s21  ;;  %v888_v34 = vld [vmem:[%s4623_s19 + $0xb0] sm:$0x1] }
  0x9b   : > { %1087 = vrot.lane.b32.xlu0 %v1002_v36, %s4572_s21  ;;  %1085 = vrot.lane.b32.xlu2 %v998_v40, %s4572_s21  ;;  %v1030_v36 = vsel %vm4809_vm6, %v4067_v27, %v1029_v14  ;;  %v1046_v39 = vrot.slane %v888_v34, 5  ;;  %v244_v40 = vld [vmem:[%s4623_s19 + $0xac] sm:$0xf]  ;;  %v4076_v14 = vld [vmem:[%s4623_s19 + $0x28] sm:$0xf] }
  0x9c   : > { %v730_v45 = vpop.permute.xlu1 %729  ;;  %277 = vst.msk [vmem:[#allocation2 + $0x74] sm:$0xf] %vm247_vm5, %v244_v40  ;;  %v4082_v27 = vld [vmem:[%s4623_s19 + $0x4c] sm:$0xf]  ;;  %v4084_v34 = vld [vmem:[%s4623_s19 + $0x58] sm:$0xf] }
  0x9d   : > { %819 = vst.msk [vmem:[#allocation2 + $0x1c] sm:$0xf] %vm811_vm7, %v730_v45  ;;  %v728_v49 = vpop.permute.xlu0 %727  ;;  %v744_v52 = vpop.permute.xlu2 %743  ;;  %v1038_v45 = vrot.slane %v1036_v19, 4  ;;  %v1047_v50 = vsel %vm4809_vm6, %v1045_v38, %v1046_v39  ;;  %v4080_v19 = vld [vmem:[%s4623_s19 + $0x40] sm:$0xf] }
  0x9e   : > { %818 = vst.msk [vmem:[#allocation2 + $0x18] sm:$0xf] %vm811_vm7, %v728_v49  ;;  %v242_v49 = vld [vmem:[%s4623_s19 + $0xa0] sm:$0xf]  ;;  %v4089_v38 = vld [vmem:[%s4623_s19 + $0x78] sm:$0xf] }
  0x9f   : > { %826 = vst.msk [vmem:[#allocation2 + $0x38] sm:$0xf] %vm811_vm7, %v744_v52  ;;  %v1050_v52 = vrot.slane %v890_v43, 5  ;;  %v4088_v39 = vld [vmem:[%s4623_s19 + $0x70] sm:$0xf] }
  0xa0   : > { %275 = vst.msk [vmem:[#allocation2 + $0x6c] sm:$0xf] %vm247_vm5, %v242_v49  ;;  %v4087_v40 = vld [vmem:[%s4623_s19 + $0x6c] sm:$0xf] }
  0xa1   : > { %v1052_v57 = vrot.slane %v1050_v52, 4  ;;  %v1051_v3 = vsel %vm4809_vm6, %v4070_v60, %v1050_v52  ;;  %v4093_v52 = vld [vmem:[%s4623_s19 + $0x90] sm:$0xf] }
  0xa2   : > { %1095 = vrot.lane.b32.xlu1 %v1016_v54, %s4572_s21  ;;  %v1040_v54 = vsel %vm4809_vm6, %v1038_v45, %v1039_v46  ;;  %v4091_v45 = vld [vmem:[%s4623_s19 + $0x84] sm:$0xf]  ;;  %v4090_v46 = vld [vmem:[%s4623_s19 + $0x7c] sm:$0xf] }
  0xa3   : > { %1093 = vrot.lane.b32.xlu0 %v1012_v56, %s4572_s21  ;;  %1091 = vrot.lane.b32.xlu2 %v1009_v59, %s4572_s21  ;;  %v1054_v2 = vsel %vm4809_vm6, %v1052_v57, %v1053_v58  ;;  %v4098_v58 = vld [vmem:[%s4623_s19 + $0xac] sm:$0xf] }
  0xa4   : > { %v736_v0 = vpop.permute.xlu1 %735 }
  0xa5   : > { %822 = vst.msk [vmem:[#allocation2 + $0x28] sm:$0xf] %vm811_vm7, %v736_v0  ;;  %v734_v4 = vpop.permute.xlu0 %733  ;;  %v750_v8 = vpop.permute.xlu2 %749  ;;  %v4071_v0 = vld [vmem:[%s4623_s19 + $0xc] sm:$0xf] }
  0xa6   : > { %821 = vst.msk [vmem:[#allocation2 + $0x24] sm:$0xf] %vm811_vm7, %v734_v4 }
  0xa7   : > { %829 = vst.msk [vmem:[#allocation2 + $0x44] sm:$0xf] %vm811_vm7, %v750_v8  ;;  %v4073_v8 = vld [vmem:[%s4623_s19 + $0x18] sm:$0xf] }
  0xaa   : > { %1101 = vrot.lane.b32.xlu1 %v1026_v10, %s4572_s21 }
  0xab   : > { %1099 = vrot.lane.b32.xlu0 %v1023_v12, %s4572_s21  ;;  %1097 = vrot.lane.b32.xlu2 %v1019_v16, %s4572_s21 }
  0xac   : > { %v742_v21 = vpop.permute.xlu1 %741 }
  0xad   : > { %825 = vst.msk [vmem:[#allocation2 + $0x34] sm:$0xf] %vm811_vm7, %v742_v21  ;;  %v740_v26 = vpop.permute.xlu0 %739  ;;  %v756_v29 = vpop.permute.xlu2 %755  ;;  %v4078_v21 = vld [vmem:[%s4623_s19 + $0x34] sm:$0xf] }
  0xae   : > { %824 = vst.msk [vmem:[#allocation2 + $0x30] sm:$0xf] %vm811_vm7, %v740_v26  ;;  %v4083_v26 = vld [vmem:[%s4623_s19 + $0x54] sm:$0xf] }
  0xaf   : > { %832 = vst.msk [vmem:[#allocation2 + $0x50] sm:$0xf] %vm811_vm7, %v756_v29 }
  0xb2   : > { %1107 = vrot.lane.b32.xlu1 %v1037_v31, %s4572_s21 }
  0xb3   : > { %1105 = vrot.lane.b32.xlu0 %v1033_v33, %s4572_s21  ;;  %1103 = vrot.lane.b32.xlu2 %v1030_v36, %s4572_s21  ;;  %v4085_v33 = vld [vmem:[%s4623_s19 + $0x60] sm:$0xf] }
  0xb4   : > { %v748_v41 = vpop.permute.xlu1 %747 }
  0xb5   : > { %828 = vst.msk [vmem:[#allocation2 + $0x40] sm:$0xf] %vm811_vm7, %v748_v41  ;;  %v746_v44 = vpop.permute.xlu0 %745  ;;  %v762_v48 = vpop.permute.xlu2 %761 }
  0xb6   : > { %827 = vst.msk [vmem:[#allocation2 + $0x3c] sm:$0xf] %vm811_vm7, %v746_v44  ;;  %v4092_v44 = vld [vmem:[%s4623_s19 + $0x88] sm:$0xf] }
  0xb7   : > { %835 = vst.msk [vmem:[#allocation2 + $0x5c] sm:$0xf] %vm811_vm7, %v762_v48 }
  0xba   : > { %1113 = vrot.lane.b32.xlu1 %v1047_v50, %s4572_s21  ;;  %v4095_v50 = vld [vmem:[%s4623_s19 + $0x9c] sm:$0xf] }
  0xbb   : > { %1111 = vrot.lane.b32.xlu0 %v1044_v51, %s4572_s21  ;;  %1109 = vrot.lane.b32.xlu2 %v1040_v54, %s4572_s21  ;;  %v4094_v51 = vld [vmem:[%s4623_s19 + $0x94] sm:$0xf]  ;;  %v4104_v54 = vld [vmem:[%s4623_s19 + $0x10] sm:$0xf] }
  0xbc   : > { %v754_v56 = vpop.permute.xlu1 %753  ;;  %v1443_v60 = vshrl.u32 %v4104_v54, 16 }
  0xbd   : > { %831 = vst.msk [vmem:[#allocation2 + $0x4c] sm:$0xf] %vm811_vm7, %v754_v56  ;;  %v752_v59 = vpop.permute.xlu0 %751  ;;  %v768_v62 = vpop.permute.xlu2 %767  ;;  %v4103_v56 = vld [vmem:[%s4623_s19 + $0xc] sm:$0xf] }
  0xbe   : > { %830 = vst.msk [vmem:[#allocation2 + $0x48] sm:$0xf] %vm811_vm7, %v752_v59  ;;  %v1439_v59 = vshll.u32 %v4104_v54, 16  ;;  %v1433_v63 = vshll.u32 %v4103_v56, 16 }
  0xbf   : > { %838 = vst.msk [vmem:[#allocation2 + $0x68] sm:$0xf] %vm811_vm7, %v768_v62  ;;  %v1430_v62 = vshrl.u32 %v4103_v56, 16 }
  0xc2   : > { %1252 = vrot.lane.b32.xlu1 %v4071_v0, %s4573_s22  ;;  %v4096_v0 = vld [vmem:[%s4623_s19 + $0xa0] sm:$0xf] }
  0xc3   : > { %1117 = vrot.lane.b32.xlu0 %v1054_v2, %s4572_s21  ;;  %1115 = vrot.lane.b32.xlu2 %v1051_v3, %s4572_s21  ;;  %v4109_v2 = vld [vmem:[%s4623_s19 + $0x24] sm:$0xf]  ;;  %v5123_v3 = vrot.slane %v1439_v59, 5 }
  0xc4   : > { %v760_v4 = vpop.permute.xlu1 %759 }
  0xc5   : > { %834 = vst.msk [vmem:[#allocation2 + $0x58] sm:$0xf] %vm811_vm7, %v760_v4  ;;  %v758_v5 = vpop.permute.xlu0 %757  ;;  %v774_v6 = vpop.permute.xlu2 %773  ;;  %v1445_v4 = vrot.slane %v1443_v60, 4 }
  0xc6   : > { %833 = vst.msk [vmem:[#allocation2 + $0x54] sm:$0xf] %vm811_vm7, %v758_v5 }
  0xc7   : > { %841 = vst.msk [vmem:[#allocation2 + $0x74] sm:$0xf] %vm811_vm7, %v774_v6  ;;  %v4105_v6 = vld [vmem:[%s4623_s19 + $0x14] sm:$0x1] }
  0xca   : > { %1258 = vrot.lane.b32.xlu1 %v4074_v7, %s4573_s22  ;;  %v1432_v7 = vrot.slane %v1430_v62, 4 }
  0xcb   : > { %1256 = vrot.lane.b32.xlu0 %v4073_v8, %s4573_s22  ;;  %1254 = vrot.lane.b32.xlu2 %v4072_v9, %s4573_s22  ;;  %v1435_v8 = vrot.slane %v1433_v63, 5 }
  0xcc   : > { %v766_v10 = vpop.permute.xlu1 %765 }
  0xcd   : > { %837 = vst.msk [vmem:[#allocation2 + $0x64] sm:$0xf] %vm811_vm7, %v766_v10  ;;  %v764_v11 = vpop.permute.xlu0 %763  ;;  %v1056_v12 = vpop.permute.xlu2 %1055  ;;  %v1478_v10 = vshrl.u32 %v4109_v2, 16 }
  0xce   : > { %836 = vst.msk [vmem:[#allocation2 + $0x60] sm:$0xf] %vm811_vm7, %v764_v11  ;;  %v1481_v11 = vshll.u32 %v4109_v2, 16  ;;  %v4118_v2 = vld [vmem:[%s4623_s19 + $0x48] sm:$0xf] }
  0xcf   : > { %1152 = vst.msk [vmem:[#allocation2] sm:$0xf] %vm1151_vm8, %v1056_v12  ;;  %v4107_v12 = vld [vmem:[%s4623_s19 + $0x1c] sm:$0xf] }
  0xd2   : > { %1264 = vrot.lane.b32.xlu1 %v4077_v13, %s4573_s22 }
  0xd3   : > { %1262 = vrot.lane.b32.xlu0 %v4076_v14, %s4573_s22  ;;  %1260 = vrot.lane.b32.xlu2 %v4075_v15, %s4573_s22  ;;  %v4106_v14 = vld [vmem:[%s4623_s19 + $0x18] sm:$0xf]  ;;  %v4101_v15 = vld [vmem:[%s4623_s19 + $0xc0] sm:$0xf] }
  0xd4   : > { %v772_v16 = vpop.permute.xlu1 %771 }
  0xd5   : > { %840 = vst.msk [vmem:[#allocation2 + $0x70] sm:$0xf] %vm811_vm7, %v772_v16  ;;  %v770_v17 = vpop.permute.xlu0 %769  ;;  %v1062_v18 = vpop.permute.xlu2 %1061  ;;  %v1446_v16 = vor.u32 %v1445_v4, %v5123_v3 }
  0xd6   : > { %839 = vst.msk [vmem:[#allocation2 + $0x6c] sm:$0xf] %vm811_vm7, %v770_v17  ;;  %v1449_v17 = vshll.u32 %v4105_v6, 16 }
  0xd7   : > { %1155 = vst.msk [vmem:[#allocation2 + $0xc] sm:$0xf] %vm1151_vm8, %v1062_v18  ;;  %v4100_v18 = vld [vmem:[%s4623_s19 + $0xb8] sm:$0xf] }
  0xda   : > { %1270 = vrot.lane.b32.xlu1 %v4080_v19, %s4573_s22  ;;  %v1436_v19 = vor.u32 %v1435_v8, %v1432_v7  ;;  %v4115_v7 = vld [vmem:[%s4623_s19 + $0x3c] sm:$0xf] }
  0xdb   : > { %1268 = vrot.lane.b32.xlu0 %v4079_v20, %s4573_s22  ;;  %1266 = vrot.lane.b32.xlu2 %v4078_v21, %s4573_s22  ;;  %v1463_v20 = vshll.u32 %v4107_v12, 16  ;;  %v1467_v21 = vshrl.u32 %v4107_v12, 16 }
  0xdc   : > { %v778_v22 = vpop.permute.xlu1 %777 }
  0xdd   : > { %843 = vst.msk [vmem:[#allocation2 + $0x7c] sm:$0xf] %vm811_vm7, %v778_v22  ;;  %v776_v23 = vpop.permute.xlu0 %775  ;;  %v1068_v24 = vpop.permute.xlu2 %1067  ;;  %v4099_v22 = vld [vmem:[%s4623_s19 + $0xb4] sm:$0xf] }
  0xde   : > { %842 = vst.msk [vmem:[#allocation2 + $0x78] sm:$0xf] %vm811_vm7, %v776_v23  ;;  %v1480_v23 = vrot.slane %v1478_v10, 4 }
  0xdf   : > { %1158 = vst.msk [vmem:[#allocation2 + $0x18] sm:$0xf] %vm1151_vm8, %v1068_v24  ;;  %v1483_v24 = vrot.slane %v1481_v11, 5 }
  0xe2   : > { %1276 = vrot.lane.b32.xlu1 %v4083_v26, %s4573_s22  ;;  %v1454_v26 = vshrl.u32 %v4106_v14, 16 }
  0xe3   : > { %1274 = vrot.lane.b32.xlu0 %v4082_v27, %s4573_s22  ;;  %1272 = vrot.lane.b32.xlu2 %v4081_v28, %s4573_s22  ;;  %v1457_v27 = vshll.u32 %v4106_v14, 16  ;;  %v4110_v28 = vld [vmem:[%s4623_s19 + $0x28] sm:$0xf]  ;;  %v1550_v14 = vshrl.u32 %v4118_v2, 16 }
  0xe4   : > { %v1060_v29 = vpop.permute.xlu1 %1059  ;;  %v1491_v54 = vshrl.u32 %v4110_v28, 16 }
  0xe5   : > { %1154 = vst.msk [vmem:[#allocation2 + $0x8] sm:$0xf] %vm1151_vm8, %v1060_v29  ;;  %v1058_v30 = vpop.permute.xlu0 %1057  ;;  %v1074_v31 = vpop.permute.xlu2 %1073  ;;  %v1447_v29 = vrot.slane %v1446_v16, 4 }
  0xe6   : > { %1153 = vst.msk [vmem:[#allocation2 + $0x4] sm:$0xf] %vm1151_vm8, %v1058_v30  ;;  %v1451_v30 = vrot.slane %v1449_v17, 5  ;;  %v1493_v6 = vrot.slane %v1491_v54, 4 }
  0xe7   : > { %1161 = vst.msk [vmem:[#allocation2 + $0x24] sm:$0xf] %vm1151_vm8, %v1074_v31  ;;  %v4113_v31 = vld [vmem:[%s4623_s19 + $0x34] sm:$0xf] }
  0xea   : > { %1282 = vrot.lane.b32.xlu1 %v4086_v32, %s4573_s22  ;;  %v4112_v32 = vld [vmem:[%s4623_s19 + $0x30] sm:$0xf] }
  0xeb   : > { %1280 = vrot.lane.b32.xlu0 %v4085_v33, %s4573_s22  ;;  %1278 = vrot.lane.b32.xlu2 %v4084_v34, %s4573_s22  ;;  %v1437_v34 = vrot.slane %v1436_v19, 4  ;;  %v1526_v19 = vshrl.u32 %v4115_v7, 16 }
  0xec   : > { %v1066_v35 = vpop.permute.xlu1 %1065 }
  0xed   : > { %1157 = vst.msk [vmem:[#allocation2 + $0x14] sm:$0xf] %vm1151_vm8, %v1066_v35  ;;  %v1064_v36 = vpop.permute.xlu0 %1063  ;;  %v1080_v37 = vpop.permute.xlu2 %1079  ;;  %v4108_v35 = vld [vmem:[%s4623_s19 + $0x20] sm:$0x1] }
  0xee   : > { %1156 = vst.msk [vmem:[#allocation2 + $0x10] sm:$0xf] %vm1151_vm8, %v1064_v36  ;;  %v5143_v36 = vrot.slane %v1463_v20, 5  ;;  %v1529_v20 = vshll.u32 %v4115_v7, 16  ;;  %v4125_v7 = vld [vmem:[%s4623_s19 + $0x64] sm:$0xf] }
  0xef   : > { %1164 = vst.msk [vmem:[#allocation2 + $0x30] sm:$0xf] %vm1151_vm8, %v1080_v37  ;;  %v1469_v37 = vrot.slane %v1467_v21, 4 }
  0xf2   : > { %1288 = vrot.lane.b32.xlu1 %v4089_v38, %s4573_s22 }
  0xf3   : > { %1286 = vrot.lane.b32.xlu0 %v4088_v39, %s4573_s22  ;;  %1284 = vrot.lane.b32.xlu2 %v4087_v40, %s4573_s22  ;;  %v1484_v39 = vor.u32 %v1483_v24, %v1480_v23  ;;  %v1487_v40 = vshll.u32 %v4110_v28, 16  ;;  %v4122_v24 = vld [vmem:[%s4623_s19 + $0x58] sm:$0xf] }
  0xf4   : > { %v1072_v41 = vpop.permute.xlu1 %1071 }
  0xf5   : > { %1160 = vst.msk [vmem:[#allocation2 + $0x20] sm:$0xf] %vm1151_vm8, %v1072_v41  ;;  %v1070_v42 = vpop.permute.xlu0 %1069  ;;  %v1086_v43 = vpop.permute.xlu2 %1085  ;;  %v1456_v41 = vrot.slane %v1454_v26, 4 }
  0xf6   : > { %1159 = vst.msk [vmem:[#allocation2 + $0x1c] sm:$0xf] %vm1151_vm8, %v1070_v42  ;;  %v1459_v42 = vrot.slane %v1457_v27, 5 }
  0xf7   : > { %1167 = vst.msk [vmem:[#allocation2 + $0x3c] sm:$0xf] %vm1151_vm8, %v1086_v43 }
  0xf8   : > { %v1460_v56 = vor.u32 %v1459_v42, %v1456_v41 }
  0xfa   : > { %1294 = vrot.lane.b32.xlu1 %v4092_v44, %s4573_s22  ;;  %v1511_v44 = vshll.u32 %v4113_v31, 16 }
  0xfb   : > { %1292 = vrot.lane.b32.xlu0 %v4091_v45, %s4573_s22  ;;  %1290 = vrot.lane.b32.xlu2 %v4090_v46, %s4573_s22  ;;  %v1515_v45 = vshrl.u32 %v4113_v31, 16  ;;  %v1502_v46 = vshrl.u32 %v4112_v32, 16 }
  0xfc   : > { %v1078_v47 = vpop.permute.xlu1 %1077 }
  0xfd   : > { %1163 = vst.msk [vmem:[#allocation2 + $0x2c] sm:$0xf] %vm1151_vm8, %v1078_v47  ;;  %v1076_v48 = vpop.permute.xlu0 %1075  ;;  %v1092_v49 = vpop.permute.xlu2 %1091  ;;  %v1505_v47 = vshll.u32 %v4112_v32, 16  ;;  %v1504_v59 = vrot.slane %v1502_v46, 4  ;;  %v4117_v32 = vld [vmem:[%s4623_s19 + $0x44] sm:$0x1] }
  0xfe   : > { %1162 = vst.msk [vmem:[#allocation2 + $0x28] sm:$0xf] %vm1151_vm8, %v1076_v48  ;;  %v1452_v48 = vsel %vm4634_vm2, %v1447_v29, %v1451_v30  ;;  %v4119_v29 = vld [vmem:[%s4623_s19 + $0x4c] sm:$0xf]  ;;  %v1552_v30 = vrot.slane %v1550_v14, 4 }
  0xff   : > { %1170 = vst.msk [vmem:[#allocation2 + $0x48] sm:$0xf] %vm1151_vm8, %v1092_v49  ;;  %v1442_v49 = vsel %vm4634_vm2, %v1437_v34, %v5123_v3  ;;  %v1507_v60 = vrot.slane %v1505_v47, 5  ;;  %v4116_v3 = vld [vmem:[%s4623_s19 + $0x40] sm:$0xf]  ;;  %v1559_v46 = vshll.u32 %v4119_v29, 16 }
 0x100   : > { %v1535_v16 = vshll.u32 %v4116_v3, 16  ;;  %v1539_v17 = vshrl.u32 %v4116_v3, 16  ;;  %v4124_v14 = vld [vmem:[%s4623_s19 + $0x60] sm:$0xf] }
 0x101   : > { %v1508_v11 = vor.u32 %v1507_v60, %v1504_v59  ;;  %v1561_v59 = vrot.slane %v1559_v46, 5  ;;  %v4127_v60 = vld [vmem:[%s4623_s19 + $0x6c] sm:$0xf] }
 0x102   : > { %1300 = vrot.lane.b32.xlu1 %v4095_v50, %s4573_s22  ;;  %v1470_v50 = vor.u32 %v1469_v37, %v5143_v36  ;;  %v1541_v34 = vrot.slane %v1539_v17, 4  ;;  %v1587_v37 = vshrl.u32 %v4122_v24, 16  ;;  %v1607_v17 = vshll.u32 %v4125_v7, 16 }
 0x103   : > { %1298 = vrot.lane.b32.xlu0 %v4094_v51, %s4573_s22  ;;  %1296 = vrot.lane.b32.xlu2 %v4093_v52, %s4573_s22  ;;  %v1473_v51 = vshll.u32 %v4108_v35, 16  ;;  %v1485_v52 = vrot.slane %v1484_v39, 4  ;;  %v1509_v28 = vrot.slane %v1508_v11, 4  ;;  %v1528_v39 = vrot.slane %v1526_v19, 4 }
 0x104   : > { %v1084_v53 = vpop.permute.xlu1 %1083  ;;  %v1471_v63 = vrot.slane %v1470_v50, 4  ;;  %v1545_v50 = vshll.u32 %v4117_v32, 16  ;;  %v4131_v32 = vld [vmem:[%s4623_s19 + $0x7c] sm:$0xf] }
 0x105   : > { %1166 = vst.msk [vmem:[#allocation2 + $0x38] sm:$0xf] %vm1151_vm8, %v1084_v53  ;;  %v1082_v55 = vpop.permute.xlu0 %1081  ;;  %v1098_v57 = vpop.permute.xlu2 %1097  ;;  %v1489_v53 = vrot.slane %v1487_v40, 5  ;;  %v1531_v40 = vrot.slane %v1529_v20, 5  ;;  %v1659_v46 = vshrl.u32 %v4131_v32, 16 }
 0x106   : > { %1165 = vst.msk [vmem:[#allocation2 + $0x34] sm:$0xf] %vm1151_vm8, %v1082_v55  ;;  %v4102_v55 = vld [vmem:[%s4623_s19 + $0xc4] sm:$0xf] }
 0x107   : > { %1173 = vst.msk [vmem:[#allocation2 + $0x54] sm:$0xf] %vm1151_vm8, %v1098_v57  ;;  %v5156_v57 = vrot.slane %v1511_v44, 5  ;;  %v1490_v8 = vsel %vm4634_vm2, %v1485_v52, %v1489_v53 }
 0x10a   : > { %1306 = vrot.lane.b32.xlu1 %v4098_v58, %s4573_s22  ;;  %v1517_v58 = vrot.slane %v1515_v45, 4  ;;  %v1514_v45 = vsel %vm4634_vm2, %v1509_v28, %v5156_v57 }
 0x10b   : > { %1304 = vrot.lane.b32.xlu0 %v4097_v61, %s4573_s22  ;;  %1302 = vrot.lane.b32.xlu2 %v4096_v0, %s4573_s22  ;;  %v4114_v61 = vld [vmem:[%s4623_s19 + $0x38] sm:$0x1]  ;;  %v1475_v0 = vrot.slane %v1473_v51, 5 }
 0x10c   : > { %v1090_v5 = vpop.permute.xlu1 %1089  ;;  %v1521_v10 = vshll.u32 %v4114_v61, 16 }
 0x10d   : > { %1169 = vst.msk [vmem:[#allocation2 + $0x44] sm:$0xf] %vm1151_vm8, %v1090_v5  ;;  %v1088_v9 = vpop.permute.xlu0 %1087  ;;  %v1104_v13 = vpop.permute.xlu2 %1103  ;;  %v1461_v5 = vrot.slane %v1460_v56, 4  ;;  %v1563_v56 = vshrl.u32 %v4119_v29, 16 }
 0x10e   : > { %1168 = vst.msk [vmem:[#allocation2 + $0x40] sm:$0xf] %vm1151_vm8, %v1088_v9  ;;  %v1518_v9 = vor.u32 %v1517_v58, %v5156_v57  ;;  %v1523_v27 = vrot.slane %v1521_v10, 5  ;;  %v4123_v58 = vld [vmem:[%s4623_s19 + $0x5c] sm:$0x1]  ;;  %v1625_v10 = vshll.u32 %v4127_v60, 16 }
 0x10f   : > { %1176 = vst.msk [vmem:[#allocation2 + $0x60] sm:$0xf] %vm1151_vm8, %v1104_v13  ;;  %v4111_v13 = vld [vmem:[%s4623_s19 + $0x2c] sm:$0x1]  ;;  %v1466_v21 = vsel %vm4634_vm2, %v1461_v5, %v5143_v36  ;;  %v1583_v36 = vshll.u32 %v4122_v24, 16  ;;  %v1565_v11 = vrot.slane %v1563_v56, 4 }
 0x110   : > { %v1497_v23 = vshll.u32 %v4111_v13, 16  ;;  %v1519_v26 = vrot.slane %v1518_v9, 4  ;;  %v1622_v9 = vshrl.u32 %v4127_v60, 16  ;;  %v4120_v13 = vld [vmem:[%s4623_s19 + $0x50] sm:$0x1]  ;;  %v1627_v29 = vrot.slane %v1625_v10, 5 }
 0x111   : > { %v5194_v52 = vrot.slane %v1583_v36, 5  ;;  %v1569_v24 = vshll.u32 %v4120_v13, 16 }
 0x112   : > { %1312 = vrot.lane.b32.xlu1 %v4101_v15, %s4573_s22  ;;  %v1553_v15 = vshll.u32 %v4118_v2, 16  ;;  %v1524_v44 = vsel %vm4634_vm2, %v1519_v26, %v1523_v27  ;;  %v1598_v26 = vshrl.u32 %v4124_v14, 16  ;;  %v1601_v27 = vshll.u32 %v4124_v14, 16  ;;  %v4129_v14 = vld [vmem:[%s4623_s19 + $0x74] sm:$0x1] }
 0x113   : > { %1310 = vrot.lane.b32.xlu0 %v4100_v18, %s4573_s22  ;;  %1308 = vrot.lane.b32.xlu2 %v4099_v22, %s4573_s22  ;;  %v1476_v18 = vsel %vm4634_vm2, %v1471_v63, %v1475_v0  ;;  %v1494_v22 = vor.u32 %v1493_v6, %v1489_v53  ;;  %v1589_v53 = vrot.slane %v1587_v37, 4  ;;  %v1547_v63 = vrot.slane %v1545_v50, 5  ;;  %v4128_v37 = vld [vmem:[%s4623_s19 + $0x70] sm:$0xf] }
 0x114   : > { %v1096_v33 = vpop.permute.xlu1 %1095  ;;  %v1555_v31 = vrot.slane %v1553_v15, 5  ;;  %v1624_v28 = vrot.slane %v1622_v9, 4  ;;  %v1631_v50 = vshll.u32 %v4128_v37, 16  ;;  %v4133_v9 = vld [vmem:[%s4623_s19 + $0x84] sm:$0xf] }
 0x115   : > { %1172 = vst.msk [vmem:[#allocation2 + $0x50] sm:$0xf] %vm1151_vm8, %v1096_v33  ;;  %v1094_v38 = vpop.permute.xlu0 %1093  ;;  %v1110_v43 = vpop.permute.xlu2 %1109  ;;  %v5181_v33 = vrot.slane %v1535_v16, 5  ;;  %v1495_v42 = vrot.slane %v1494_v22, 4  ;;  %v1590_v3 = vor.u32 %v1589_v53, %v5194_v52 }
 0x116   : > { %1171 = vst.msk [vmem:[#allocation2 + $0x4c] sm:$0xf] %vm1151_vm8, %v1094_v38  ;;  %v4121_v38 = vld [vmem:[%s4623_s19 + $0x54] sm:$0xf] }
 0x117   : > { %1179 = vst.msk [vmem:[#allocation2 + $0x6c] sm:$0xf] %vm1151_vm8, %v1110_v43  ;;  %v1499_v43 = vrot.slane %v1497_v23, 5  ;;  %v1574_v51 = vshrl.u32 %v4121_v38, 16  ;;  %v1577_v54 = vshll.u32 %v4121_v38, 16  ;;  %v1591_v19 = vrot.slane %v1590_v3, 4 }
 0x118   : > { %v1566_v23 = vor.u32 %v1565_v11, %v1561_v59  ;;  %v4126_v38 = vld [vmem:[%s4623_s19 + $0x68] sm:$0x1] }
 0x119   : > { %v1500_v57 = vsel %vm4634_vm2, %v1495_v42, %v1499_v43  ;;  %v1576_v0 = vrot.slane %v1574_v51, 4  ;;  %v1579_v5 = vrot.slane %v1577_v54, 5  ;;  %v1600_v42 = vrot.slane %v1598_v26, 4 }
 0x11a   : > { %1815 = vrot.lane.b32.xlu1 %v1452_v48, %s4574_s23  ;;  %v1556_v48 = vor.u32 %v1555_v31, %v1552_v30  ;;  %v5219_v30 = vrot.slane %v1607_v17, 5  ;;  %v1603_v43 = vrot.slane %v1601_v27, 5  ;;  %v1617_v53 = vshll.u32 %v4126_v38, 16 }
 0x11b   : > { %1813 = vrot.lane.b32.xlu0 %v1442_v49, %s4574_s23  ;;  %1314 = vrot.lane.b32.xlu2 %v4102_v55, %s4573_s22  ;;  %v1542_v49 = vor.u32 %v1541_v34, %v5181_v33  ;;  %v1532_v55 = vor.u32 %v1531_v40, %v1528_v39  ;;  %v4130_v34 = vld [vmem:[%s4623_s19 + $0x78] sm:$0xf]  ;;  %v1567_v40 = vrot.slane %v1566_v23, 4  ;;  %v1641_v26 = vshll.u32 %v4129_v14, 16 }
 0x11c   : > { %v1102_v62 = vpop.permute.xlu1 %1101  ;;  %v1557_v61 = vrot.slane %v1556_v48, 4  ;;  %v1649_v48 = vshll.u32 %v4130_v34, 16  ;;  %v4138_v14 = vld [vmem:[%s4623_s19 + $0x98] sm:$0x1] }
 0x11d   : > { %1175 = vst.msk [vmem:[#allocation2 + $0x5c] sm:$0xf] %vm1151_vm8, %v1102_v62  ;;  %v1100_v4 = vpop.permute.xlu0 %1099  ;;  %v1116_v12 = vpop.permute.xlu2 %1115  ;;  %v1543_v62 = vrot.slane %v1542_v49, 4  ;;  %v1533_v6 = vrot.slane %v1532_v55, 4  ;;  %v1628_v49 = vor.u32 %v1627_v29, %v1624_v28  ;;  %v1635_v55 = vshrl.u32 %v4128_v37, 16 }
 0x11e   : > { %1174 = vst.msk [vmem:[#allocation2 + $0x58] sm:$0xf] %vm1151_vm8, %v1100_v4  ;;  %v1593_v4 = vshll.u32 %v4123_v58, 16  ;;  %v1562_v15 = vsel %vm4634_vm2, %v1557_v61, %v1561_v59  ;;  %v1661_v59 = vrot.slane %v1659_v46, 4  ;;  %v1651_v61 = vrot.slane %v1649_v48, 5 }
 0x11f   : > { %1182 = vst.msk [vmem:[#allocation2 + $0x78] sm:$0xf] %vm1151_vm8, %v1116_v12  ;;  %v1548_v16 = vsel %vm4634_vm2, %v1543_v62, %v1547_v63  ;;  %v1538_v22 = vsel %vm4634_vm2, %v1533_v6, %v5181_v33  ;;  %v1629_v62 = vrot.slane %v1628_v49, 4  ;;  %v1633_v63 = vrot.slane %v1631_v50, 5 }
 0x120   : > { %v1595_v20 = vrot.slane %v1593_v4, 5  ;;  %v4136_v4 = vld [vmem:[%s4623_s19 + $0x90] sm:$0xf] }
 0x121   : > { %v1694_v17 = vshrl.u32 %v4136_v4, 16 }
 0x122   : > { %1821 = vrot.lane.b32.xlu1 %v1490_v8, %s4574_s23  ;;  %v1596_v33 = vsel %vm4634_vm2, %v1591_v19, %v1595_v20 }
 0x123   : > { %1819 = vrot.lane.b32.xlu0 %v1476_v18, %s4574_s23  ;;  %1817 = vrot.lane.b32.xlu2 %v1466_v21, %s4574_s23  ;;  %v1611_v18 = vshrl.u32 %v4125_v7, 16  ;;  %v1580_v21 = vor.u32 %v1579_v5, %v1576_v0  ;;  %v1619_v0 = vrot.slane %v1617_v53, 5  ;;  %v4134_v5 = vld [vmem:[%s4623_s19 + $0x88] sm:$0xf] }
 0x124   : > { %v1108_v35 = vpop.permute.xlu1 %1107  ;;  %v1679_v19 = vshll.u32 %v4134_v5, 16  ;;  %v1683_v20 = vshrl.u32 %v4134_v5, 16 }
 0x125   : > { %1178 = vst.msk [vmem:[#allocation2 + $0x68] sm:$0xf] %vm1151_vm8, %v1108_v35  ;;  %v1106_v41 = vpop.permute.xlu0 %1105  ;;  %v1255_v47 = vpop.permute.xlu2 %1254  ;;  %v1613_v31 = vrot.slane %v1611_v18, 4  ;;  %v1581_v36 = vrot.slane %v1580_v21, 4  ;;  %v1697_v18 = vshll.u32 %v4136_v4, 16  ;;  %v1670_v21 = vshrl.u32 %v4133_v9, 16 }
 0x126   : > { %1177 = vst.msk [vmem:[#allocation2 + $0x64] sm:$0xf] %vm1151_vm8, %v1106_v41  ;;  %v1571_v41 = vrot.slane %v1569_v24, 5  ;;  %v5264_v37 = vrot.slane %v1679_v19, 5 }
 0x127   : > { %1350 = vst.msk [vmem:[#allocation2 + $0x4] sm:$0xf] %vm1348_vm9, %v1255_v47  ;;  %v1646_v47 = vshrl.u32 %v4130_v34, 16  ;;  %v1614_v51 = vor.u32 %v1613_v31, %v5219_v30  ;;  %v1586_v54 = vsel %vm4634_vm2, %v1581_v36, %v5194_v52  ;;  %v1696_v31 = vrot.slane %v1694_v17, 4  ;;  %v4140_v34 = vld [vmem:[%s4623_s19 + $0xa0] sm:$0xf] }
 0x128   : > { %v1572_v56 = vsel %vm4634_vm2, %v1567_v40, %v1571_v41  ;;  %v4137_v36 = vld [vmem:[%s4623_s19 + $0x94] sm:$0xf]  ;;  %v1672_v38 = vrot.slane %v1670_v21, 4  ;;  %v4135_v41 = vld [vmem:[%s4623_s19 + $0x8c] sm:$0x1]  ;;  %v1731_v46 = vshrl.u32 %v4140_v34, 16 }
 0x129   : > { %v1648_v60 = vrot.slane %v1646_v47, 4  ;;  %v1615_v52 = vrot.slane %v1614_v51, 4  ;;  %v1703_v51 = vshll.u32 %v4137_v36, 16 }
 0x12a   : > { %1827 = vrot.lane.b32.xlu1 %v1524_v44, %s4574_s23 }
 0x12b   : > { %1825 = vrot.lane.b32.xlu0 %v1514_v45, %s4574_s23  ;;  %1823 = vrot.lane.b32.xlu2 %v1500_v57, %s4574_s23  ;;  %v1655_v45 = vshll.u32 %v4131_v32, 16  ;;  %v1604_v57 = vor.u32 %v1603_v43, %v1600_v42  ;;  %v1699_v32 = vrot.slane %v1697_v18, 5  ;;  %v1643_v43 = vrot.slane %v1641_v26, 5 }
 0x12c   : > { %v1114_v2 = vpop.permute.xlu1 %1113 }
 0x12d   : > { %1181 = vst.msk [vmem:[#allocation2 + $0x74] sm:$0xf] %vm1151_vm8, %v1114_v2  ;;  %v1112_v8 = vpop.permute.xlu0 %1111  ;;  %v1261_v12 = vpop.permute.xlu2 %1260  ;;  %v5238_v58 = vrot.slane %v1655_v45, 5  ;;  %v4132_v2 = vld [vmem:[%s4623_s19 + $0x80] sm:$0x1]  ;;  %v1605_v7 = vrot.slane %v1604_v57, 4  ;;  %v1700_v50 = vor.u32 %v1699_v32, %v1696_v31 }
 0x12e   : > { %1180 = vst.msk [vmem:[#allocation2 + $0x70] sm:$0xf] %vm1151_vm8, %v1112_v8  ;;  %v1637_v8 = vrot.slane %v1635_v55, 4  ;;  %v1665_v11 = vshll.u32 %v4132_v2, 16  ;;  %v1727_v45 = vshll.u32 %v4140_v34, 16  ;;  %v1689_v55 = vshll.u32 %v4135_v41, 16 }
 0x12f   : > { %1353 = vst.msk [vmem:[#allocation2 + $0x10] sm:$0xf] %vm1348_vm9, %v1261_v12  ;;  %v1662_v10 = vor.u32 %v1661_v59, %v5238_v58  ;;  %v1652_v12 = vor.u32 %v1651_v61, %v1648_v60  ;;  %v1610_v23 = vsel %vm4634_vm2, %v1605_v7, %v5219_v30  ;;  %v1685_v30 = vrot.slane %v1683_v20, 4  ;;  %v4141_v60 = vld [vmem:[%s4623_s19 + $0xa4] sm:$0x1] }
 0x130   : > { %v1638_v24 = vor.u32 %v1637_v8, %v1633_v63  ;;  %v1667_v28 = vrot.slane %v1665_v11, 5  ;;  %v1707_v57 = vshrl.u32 %v4137_v36, 16  ;;  %v5280_v61 = vrot.slane %v1727_v45, 5  ;;  %v4146_v32 = vld [vmem:[%s4623_s19 + $0xb8] sm:$0xf] }
 0x131   : > { %v1663_v27 = vrot.slane %v1662_v10, 4  ;;  %v1653_v29 = vrot.slane %v1652_v12, 4  ;;  %v1691_v4 = vrot.slane %v1689_v55, 5  ;;  %v1737_v8 = vshll.u32 %v4141_v60, 16 }
 0x132   : > { %1833 = vrot.lane.b32.xlu1 %v1562_v15, %s4574_s23  ;;  %v1634_v15 = vsel %vm4634_vm2, %v1629_v62, %v1633_v63  ;;  %v1639_v42 = vrot.slane %v1638_v24, 4  ;;  %v1733_v62 = vrot.slane %v1731_v46, 4  ;;  %v1709_v10 = vrot.slane %v1707_v57, 4 }
 0x133   : > { %1831 = vrot.lane.b32.xlu0 %v1548_v16, %s4574_s23  ;;  %1829 = vrot.lane.b32.xlu2 %v1538_v22, %s4574_s23  ;;  %v1620_v16 = vsel %vm4634_vm2, %v1615_v52, %v1619_v0  ;;  %v1673_v22 = vshll.u32 %v4133_v9, 16  ;;  %v1668_v49 = vsel %vm4634_vm2, %v1663_v27, %v1667_v28  ;;  %v1658_v53 = vsel %vm4634_vm2, %v1653_v29, %v5238_v58  ;;  %v4143_v9 = vld [vmem:[%s4623_s19 + $0xac] sm:$0xf] }
 0x134   : > { %v1253_v35 = vpop.permute.xlu1 %1252  ;;  %v1644_v59 = vsel %vm4634_vm2, %v1639_v42, %v1643_v43  ;;  %v1701_v58 = vrot.slane %v1700_v50, 4  ;;  %v1705_v0 = vrot.slane %v1703_v51, 5  ;;  %v1734_v11 = vor.u32 %v1733_v62, %v5280_v61 }
 0x135   : > { %1349 = vst.msk [vmem:[#allocation2] sm:$0xf] %vm1348_vm9, %v1253_v35  ;;  %v1118_v39 = vpop.permute.xlu0 %1117  ;;  %v1267_v44 = vpop.permute.xlu2 %1266  ;;  %v4139_v35 = vld [vmem:[%s4623_s19 + $0x9c] sm:$0xf]  ;;  %v1751_v21 = vshll.u32 %v4143_v9, 16  ;;  %v1713_v24 = vshll.u32 %v4138_v14, 16 }
 0x136   : > { %1183 = vst.msk [vmem:[#allocation2 + $0x7c] sm:$0xf] %vm1151_vm8, %v1118_v39  ;;  %v1675_v39 = vrot.slane %v1673_v22, 5  ;;  %v1718_v47 = vshrl.u32 %v4139_v35, 16  ;;  %v1721_v48 = vshll.u32 %v4139_v35, 16  ;;  %v1755_v22 = vshrl.u32 %v4143_v9, 16 }
 0x137   : > { %1356 = vst.msk [vmem:[#allocation2 + $0x1c] sm:$0xf] %vm1348_vm9, %v1267_v44  ;;  %v1735_v28 = vrot.slane %v1734_v11, 4  ;;  %v1739_v29 = vrot.slane %v1737_v8, 5  ;;  %v1715_v42 = vrot.slane %v1713_v24, 5  ;;  %v1779_v57 = vshrl.u32 %v4146_v32, 16 }
 0x138   : > { %v1720_v63 = vrot.slane %v1718_v47, 4  ;;  %v1723_v52 = vrot.slane %v1721_v48, 5  ;;  %v4152_v24 = vld [vmem:[%s4623_s19 + $0x10] sm:$0xf] }
 0x139   : > { %v1740_v45 = vsel %vm4634_vm2, %v1735_v28, %v1739_v29  ;;  %v1781_v8 = vrot.slane %v1779_v57, 4 }
 0x13a   : > { %1839 = vrot.lane.b32.xlu1 %v1596_v33, %s4574_s23  ;;  %v1724_v12 = vor.u32 %v1723_v52, %v1720_v63 }
 0x13b   : > { %1837 = vrot.lane.b32.xlu0 %v1586_v54, %s4574_s23  ;;  %1835 = vrot.lane.b32.xlu2 %v1572_v56, %s4574_s23  ;;  %v1686_v54 = vor.u32 %v1685_v30, %v5264_v37  ;;  %v1676_v56 = vor.u32 %v1675_v39, %v1672_v38  ;;  %v1757_v30 = vrot.slane %v1755_v22, 4  ;;  %v4149_v38 = vld [vmem:[%s4623_s19 + $0xc4] sm:$0xf]  ;;  %v4148_v39 = vld [vmem:[%s4623_s19 + $0xc0] sm:$0xf] }
 0x13c   : > { %v1259_v3 = vpop.permute.xlu1 %1258  ;;  %v1725_v31 = vrot.slane %v1724_v12, 4  ;;  %v1799_v50 = vshll.u32 %v4149_v38, 16  ;;  %v1803_v51 = vshrl.u32 %v4149_v38, 16  ;;  %v1790_v55 = vshrl.u32 %v4148_v39, 16 }
 0x13d   : > { %1352 = vst.msk [vmem:[#allocation2 + $0xc] sm:$0xf] %vm1348_vm9, %v1259_v3  ;;  %v1257_v6 = vpop.permute.xlu0 %1256  ;;  %v1273_v13 = vpop.permute.xlu2 %1272  ;;  %v1687_v3 = vrot.slane %v1686_v54, 4  ;;  %v1677_v5 = vrot.slane %v1676_v56, 4  ;;  %v1793_v56 = vshll.u32 %v4148_v39, 16 }
 0x13e   : > { %1351 = vst.msk [vmem:[#allocation2 + $0x8] sm:$0xf] %vm1348_vm9, %v1257_v6  ;;  %v4145_v6 = vld [vmem:[%s4623_s19 + $0xb4] sm:$0xf]  ;;  %v1730_v46 = vsel %vm4634_vm2, %v1725_v31, %v5280_v61  ;;  %v1801_v63 = vrot.slane %v1799_v50, 5  ;;  %v1805_v52 = vrot.slane %v1803_v51, 4 }
 0x13f   : > { %1359 = vst.msk [vmem:[#allocation2 + $0x28] sm:$0xf] %vm1348_vm9, %v1273_v13  ;;  %v1766_v17 = vshrl.u32 %v4145_v6, 16  ;;  %v1769_v18 = vshll.u32 %v4145_v6, 16  ;;  %v1692_v19 = vsel %vm4634_vm2, %v1687_v3, %v1691_v4  ;;  %v1682_v20 = vsel %vm4634_vm2, %v1677_v5, %v5264_v37  ;;  %v4150_v3 = vld [vmem:[%s4623_s19 + $0xc8] sm:$0x1] }
 0x140   : > { %v1753_v37 = vrot.slane %v1751_v21, 5  ;;  %v1792_v4 = vrot.slane %v1790_v55, 4  ;;  %v1795_v5 = vrot.slane %v1793_v56, 5  ;;  %v1806_v12 = vor.u32 %v1805_v52, %v1801_v63  ;;  %v4157_v50 = vld [vmem:[%s4623_s19 + $0x24] sm:$0xe] }
 0x141   : > { %v1768_v34 = vrot.slane %v1766_v17, 4  ;;  %v1771_v35 = vrot.slane %v1769_v18, 5  ;;  %v4201_v57 = vrot.slane %v4157_v50, 9 }
 0x142   : > { %1845 = vrot.lane.b32.xlu1 %v1634_v15, %s4574_s23  ;;  %v4142_v15 = vld [vmem:[%s4623_s19 + $0xa8] sm:$0xf] }
 0x143   : > { %1843 = vrot.lane.b32.xlu0 %v1620_v16, %s4574_s23  ;;  %1841 = vrot.lane.b32.xlu2 %v1610_v23, %s4574_s23  ;;  %v1706_v16 = vsel %vm4634_vm2, %v1701_v58, %v1705_v0  ;;  %v1710_v23 = vor.u32 %v1709_v10, %v1705_v0  ;;  %v1742_v26 = vshrl.u32 %v4142_v15, 16  ;;  %v1745_v27 = vshll.u32 %v4142_v15, 16  ;;  %v4147_v10 = vld [vmem:[%s4623_s19 + $0xbc] sm:$0x1] }
 0x144   : > { %v1265_v33 = vpop.permute.xlu1 %1264  ;;  %v1772_v48 = vor.u32 %v1771_v35, %v1768_v34  ;;  %v1796_v15 = vor.u32 %v1795_v5, %v1792_v4  ;;  %v1785_v18 = vshll.u32 %v4147_v10, 16  ;;  %v4155_v34 = vld [vmem:[%s4623_s19 + $0x1c] sm:$0xf]  ;;  %v2040_v35 = vrot.slane %v4152_v24, 5  ;;  %v4162_v4 = vld [vmem:[%s4623_s19 + $0x38] sm:$0x1] }
 0x145   : > { %1355 = vst.msk [vmem:[#allocation2 + $0x18] sm:$0xf] %vm1348_vm9, %v1265_v33  ;;  %v1263_v40 = vpop.permute.xlu0 %1262  ;;  %v1279_v44 = vpop.permute.xlu2 %1278  ;;  %v4144_v33 = vld [vmem:[%s4623_s19 + $0xb0] sm:$0x1]  ;;  %v1711_v41 = vrot.slane %v1710_v23, 4  ;;  %v1744_v43 = vrot.slane %v1742_v26, 4 }
 0x146   : > { %1354 = vst.msk [vmem:[#allocation2 + $0x14] sm:$0xf] %vm1348_vm9, %v1263_v40  ;;  %v1761_v54 = vshll.u32 %v4144_v33, 16  ;;  %v1773_v61 = vrot.slane %v1772_v48, 4  ;;  %v1797_v22 = vrot.slane %v1796_v15, 4  ;;  %v2047_v38 = vrot.slane %v4155_v34, 5 }
 0x147   : > { %1362 = vst.msk [vmem:[#allocation2 + $0x34] sm:$0xf] %vm1348_vm9, %v1279_v44  ;;  %v1747_v44 = vrot.slane %v1745_v27, 5  ;;  %v1787_v27 = vrot.slane %v1785_v18, 5  ;;  %v4153_v33 = vld [vmem:[%s4623_s19 + $0x14] sm:$0x1] }
 0x148   : > { %v1802_v31 = vsel %vm4634_vm2, %v1797_v22, %v1801_v63  ;;  %v4165_v22 = vld [vmem:[%s4623_s19 + $0x44] sm:$0x1] }
 0x149   : > { %v1748_v60 = vor.u32 %v1747_v44, %v1744_v43 }
 0x14a   : > { %1851 = vrot.lane.b32.xlu1 %v1668_v49, %s4574_s23  ;;  %v1775_v49 = vshll.u32 %v4146_v32, 16  ;;  %v4154_v32 = vld [vmem:[%s4623_s19 + $0x18] sm:$0xe] }
 0x14b   : > { %1849 = vrot.lane.b32.xlu0 %v1658_v53, %s4574_s23  ;;  %1847 = vrot.lane.b32.xlu2 %v1644_v59, %s4574_s23  ;;  %v1758_v53 = vor.u32 %v1757_v30, %v1753_v37  ;;  %v1716_v59 = vsel %vm4634_vm2, %v1711_v41, %v1715_v42  ;;  %v4200_v30 = vrot.slane %v4154_v32, 9  ;;  %v2043_v41 = vrot.slane %v4153_v33, 5  ;;  %v4158_v42 = vld [vmem:[%s4623_s19 + $0x28] sm:$0xf] }
 0x14c   : > { %v1271_v2 = vpop.permute.xlu1 %1270  ;;  %v1777_v62 = vrot.slane %v1775_v49, 5  ;;  %v4159_v49 = vld [vmem:[%s4623_s19 + $0x2c] sm:$0x1]  ;;  %v2071_v32 = vrot.slane %v4165_v22, 5 }
 0x14d   : > { %1358 = vst.msk [vmem:[#allocation2 + $0x24] sm:$0xf] %vm1348_vm9, %v1271_v2  ;;  %v1269_v7 = vpop.permute.xlu0 %1268  ;;  %v1285_v13 = vpop.permute.xlu2 %1284  ;;  %v1759_v0 = vrot.slane %v1758_v53, 4  ;;  %v1763_v2 = vrot.slane %v1761_v54, 5  ;;  %v4156_v53 = vld [vmem:[%s4623_s19 + $0x20] sm:$0x1] }
 0x14e   : > { %1357 = vst.msk [vmem:[#allocation2 + $0x20] sm:$0xf] %vm1348_vm9, %v1269_v7  ;;  %v1749_v7 = vrot.slane %v1748_v60, 4  ;;  %v1778_v11 = vsel %vm4634_vm2, %v1773_v61, %v1777_v62  ;;  %v1782_v17 = vor.u32 %v1781_v8, %v1777_v62  ;;  %v2057_v55 = vrot.slane %v4159_v49, 5  ;;  %v4161_v60 = vld [vmem:[%s4623_s19 + $0x34] sm:$0xf] }
 0x14f   : > { %1365 = vst.msk [vmem:[#allocation2 + $0x40] sm:$0xf] %vm1348_vm9, %v1285_v13  ;;  %v1809_v13 = vshll.u32 %v4150_v3, 16  ;;  %v1764_v14 = vsel %vm4634_vm2, %v1759_v0, %v1763_v2  ;;  %v2049_v61 = vrot.slane %v2047_v38, 4  ;;  %v2050_v62 = vrot.slane %v4156_v53, 5 }
 0x150   : > { %v1783_v26 = vrot.slane %v1782_v17, 4  ;;  %v4163_v0 = vld [vmem:[%s4623_s19 + $0x3c] sm:$0xe]  ;;  %v4164_v2 = vld [vmem:[%s4623_s19 + $0x40] sm:$0xf]  ;;  %v2061_v3 = vrot.slane %v4161_v60, 5 }
 0x151   : > { %v2051_v5 = vsel %vm4809_vm6, %v2049_v61, %v2050_v62  ;;  %v2068_v8 = vrot.slane %v4164_v2, 5 }
 0x152   : > { %1857 = vrot.lane.b32.xlu1 %v1706_v16, %s4574_s23  ;;  %v1754_v16 = vsel %vm4634_vm2, %v1749_v7, %v1753_v37  ;;  %v4151_v37 = vld [vmem:[%s4623_s19 + $0xc] sm:$0xe]  ;;  %v4203_v7 = vrot.slane %v4163_v0, 9  ;;  %v2063_v10 = vrot.slane %v2061_v3, 4 }
 0x153   : > { %1855 = vrot.lane.b32.xlu0 %v1692_v19, %s4574_s23  ;;  %1853 = vrot.lane.b32.xlu2 %v1682_v20, %s4574_s23  ;;  %v1807_v19 = vrot.slane %v1806_v12, 4  ;;  %v1811_v20 = vrot.slane %v1809_v13, 5  ;;  %v4199_v44 = vrot.slane %v4151_v37, 9  ;;  %v4167_v12 = vld [vmem:[%s4623_s19 + $0x4c] sm:$0xf] }
 0x154   : > { %v1277_v36 = vpop.permute.xlu1 %1276  ;;  %v2075_v17 = vrot.slane %v4167_v12, 5  ;;  %v4173_v37 = vld [vmem:[%s4623_s19 + $0x64] sm:$0xf] }
 0x155   : > { %1361 = vst.msk [vmem:[#allocation2 + $0x30] sm:$0xf] %vm1348_vm9, %v1277_v36  ;;  %v1275_v40 = vpop.permute.xlu0 %1274  ;;  %v1291_v47 = vpop.permute.xlu2 %1290  ;;  %v1812_v29 = vsel %vm4634_vm2, %v1807_v19, %v1811_v20  ;;  %v1788_v36 = vsel %vm4634_vm2, %v1783_v26, %v1787_v27  ;;  %v2041_v51 = vsel %vm4809_vm6, %v4199_v44, %v2040_v35  ;;  %v4168_v19 = vld [vmem:[%s4623_s19 + $0x50] sm:$0x1]  ;;  %v4166_v20 = vld [vmem:[%s4623_s19 + $0x48] sm:$0xe] }
 0x156   : > { %1360 = vst.msk [vmem:[#allocation2 + $0x2c] sm:$0xf] %vm1348_vm9, %v1275_v40  ;;  %v2042_v40 = vrot.slane %v2040_v35, 4  ;;  %v2078_v24 = vrot.slane %v4168_v19, 5  ;;  %v4204_v27 = vrot.slane %v4166_v20, 9 }
 0x157   : > { %1368 = vst.msk [vmem:[#allocation2 + $0x4c] sm:$0xf] %vm1348_vm9, %v1291_v47  ;;  %v2054_v47 = vrot.slane %v4158_v42, 5  ;;  %v2089_v42 = vrot.slane %v4173_v37, 5 }
 0x158   : > { %v2044_v48 = vsel %vm4809_vm6, %v2042_v40, %v2043_v41  ;;  %v2076_v33 = vsel %vm4809_vm6, %v4204_v27, %v2075_v17  ;;  %v4169_v40 = vld [vmem:[%s4623_s19 + $0x54] sm:$0xe]  ;;  %v4183_v27 = vld [vmem:[%s4623_s19 + $0x8c] sm:$0x1] }
 0x159   : > { %v2056_v54 = vrot.slane %v2054_v47, 4 }
 0x15a   : > { %1863 = vrot.lane.b32.xlu1 %v1740_v45, %s4574_s23 }
 0x15b   : > { %1861 = vrot.lane.b32.xlu0 %v1730_v46, %s4574_s23  ;;  %1859 = vrot.lane.b32.xlu2 %v1716_v59, %s4574_s23  ;;  %v2048_v46 = vsel %vm4809_vm6, %v4200_v30, %v2047_v38  ;;  %v2058_v52 = vsel %vm4809_vm6, %v2056_v54, %v2057_v55  ;;  %v4171_v38 = vld [vmem:[%s4623_s19 + $0x5c] sm:$0x1]  ;;  %v4177_v54 = vld [vmem:[%s4623_s19 + $0x74] sm:$0x1] }
 0x15c   : > { %v1283_v58 = vpop.permute.xlu1 %1282  ;;  %v4175_v55 = vld [vmem:[%s4623_s19 + $0x6c] sm:$0xe]  ;;  %v2099_v60 = vrot.slane %v4177_v54, 5 }
 0x15d   : > { %1364 = vst.msk [vmem:[#allocation2 + $0x3c] sm:$0xf] %vm1348_vm9, %v1283_v58  ;;  %v1281_v6 = vpop.permute.xlu0 %1280  ;;  %v1297_v9 = vpop.permute.xlu2 %1296  ;;  %v2055_v58 = vsel %vm4809_vm6, %v4201_v57, %v2054_v47  ;;  %v4174_v57 = vld [vmem:[%s4623_s19 + $0x68] sm:$0x1]  ;;  %v4207_v62 = vrot.slane %v4175_v55, 9 }
 0x15e   : > { %1363 = vst.msk [vmem:[#allocation2 + $0x38] sm:$0xf] %vm1348_vm9, %v1281_v6  ;;  %v4160_v6 = vld [vmem:[%s4623_s19 + $0x30] sm:$0xe]  ;;  %v2092_v0 = vrot.slane %v4174_v57, 5 }
 0x15f   : > { %1371 = vst.msk [vmem:[#allocation2 + $0x58] sm:$0xf] %vm1348_vm9, %v1297_v9 }
 0x162   : > { %1869 = vrot.lane.b32.xlu1 %v1778_v11, %s4574_s23  ;;  %v2064_v11 = vrot.slane %v4162_v4, 5 }
 0x163   : > { %1867 = vrot.lane.b32.xlu0 %v1764_v14, %s4574_s23  ;;  %1865 = vrot.lane.b32.xlu2 %v1754_v16, %s4574_s23  ;;  %v4202_v14 = vrot.slane %v4160_v6, 9  ;;  %v2069_v16 = vsel %vm4809_vm6, %v4203_v7, %v2068_v8  ;;  %v4182_v6 = vld [vmem:[%s4623_s19 + $0x88] sm:$0xf] }
 0x164   : > { %v1289_v21 = vpop.permute.xlu1 %1288  ;;  %v2065_v18 = vsel %vm4809_vm6, %v2063_v10, %v2064_v11  ;;  %v4178_v10 = vld [vmem:[%s4623_s19 + $0x78] sm:$0xe]  ;;  %v2110_v12 = vrot.slane %v4182_v6, 5 }
 0x165   : > { %1367 = vst.msk [vmem:[#allocation2 + $0x48] sm:$0xf] %vm1348_vm9, %v1289_v21  ;;  %v1287_v23 = vpop.permute.xlu0 %1286  ;;  %v1303_v28 = vpop.permute.xlu2 %1302  ;;  %v2062_v21 = vsel %vm4809_vm6, %v4202_v14, %v2061_v3 }
 0x166   : > { %1366 = vst.msk [vmem:[#allocation2 + $0x44] sm:$0xf] %vm1348_vm9, %v1287_v23  ;;  %v2077_v23 = vrot.slane %v2075_v17, 4 }
 0x167   : > { %1374 = vst.msk [vmem:[#allocation2 + $0x64] sm:$0xf] %vm1348_vm9, %v1303_v28 }
 0x168   : > { %v2079_v35 = vsel %vm4809_vm6, %v2077_v23, %v2078_v24  ;;  %v4186_v23 = vld [vmem:[%s4623_s19 + $0x98] sm:$0x1]  ;;  %v4184_v24 = vld [vmem:[%s4623_s19 + $0x90] sm:$0xe] }
 0x16a   : > { %1875 = vrot.lane.b32.xlu1 %v1812_v29, %s4574_s23  ;;  %v4170_v29 = vld [vmem:[%s4623_s19 + $0x58] sm:$0xf] }
 0x16b   : > { %1873 = vrot.lane.b32.xlu0 %v1802_v31, %s4574_s23  ;;  %1871 = vrot.lane.b32.xlu2 %v1788_v36, %s4574_s23  ;;  %v2070_v31 = vrot.slane %v2068_v8, 4  ;;  %v4172_v36 = vld [vmem:[%s4623_s19 + $0x60] sm:$0xe]  ;;  %v2082_v30 = vrot.slane %v4170_v29, 5  ;;  %v4180_v8 = vld [vmem:[%s4623_s19 + $0x80] sm:$0x1] }
 0x16c   : > { %v1295_v39 = vpop.permute.xlu1 %1294  ;;  %v4206_v41 = vrot.slane %v4172_v36, 9  ;;  %v2120_v29 = vrot.slane %v4186_v23, 5  ;;  %v2113_v36 = vrot.slane %v4183_v27, 5 }
 0x16d   : > { %1370 = vst.msk [vmem:[#allocation2 + $0x54] sm:$0xf] %vm1348_vm9, %v1295_v39  ;;  %v1293_v43 = vpop.permute.xlu0 %1292  ;;  %v1309_v45 = vpop.permute.xlu2 %1308  ;;  %v2072_v39 = vsel %vm4809_vm6, %v2070_v31, %v2071_v32  ;;  %v2084_v44 = vrot.slane %v2082_v30, 4  ;;  %v4210_v32 = vrot.slane %v4184_v24, 9 }
 0x16e   : > { %1369 = vst.msk [vmem:[#allocation2 + $0x50] sm:$0xf] %vm1348_vm9, %v1293_v43  ;;  %v2090_v50 = vsel %vm4809_vm6, %v4206_v41, %v2089_v42 }
 0x16f   : > { %1377 = vst.msk [vmem:[#allocation2 + $0x70] sm:$0xf] %vm1348_vm9, %v1309_v45  ;;  %v2085_v45 = vrot.slane %v4171_v38, 5 }
 0x171   : > { %v2086_v53 = vsel %vm4809_vm6, %v2084_v44, %v2085_v45  ;;  %v4187_v44 = vld [vmem:[%s4623_s19 + $0x9c] sm:$0xe] }
 0x172   : > { %2154 = vrot.lane.b32.xlu1 %v2048_v46, %s4575_s24  ;;  %v4176_v46 = vld [vmem:[%s4623_s19 + $0x70] sm:$0xf] }
 0x173   : > { %2152 = vrot.lane.b32.xlu0 %v2044_v48, %s4575_s24  ;;  %2150 = vrot.lane.b32.xlu2 %v2041_v51, %s4575_s24  ;;  %v4205_v48 = vrot.slane %v4169_v40, 9  ;;  %v2096_v51 = vrot.slane %v4176_v46, 5  ;;  %v4191_v40 = vld [vmem:[%s4623_s19 + $0xac] sm:$0xf] }
 0x174   : > { %v1301_v56 = vpop.permute.xlu1 %1300  ;;  %v2131_v46 = vrot.slane %v4191_v40, 5 }
 0x175   : > { %1373 = vst.msk [vmem:[#allocation2 + $0x60] sm:$0xf] %vm1348_vm9, %v1301_v56  ;;  %v1299_v59 = vpop.permute.xlu0 %1298  ;;  %v1315_v63 = vpop.permute.xlu2 %1314  ;;  %v2083_v56 = vsel %vm4809_vm6, %v4205_v48, %v2082_v30  ;;  %v2097_v4 = vsel %vm4809_vm6, %v4207_v62, %v2096_v51  ;;  %v4192_v62 = vld [vmem:[%s4623_s19 + $0xb0] sm:$0x1] }
 0x176   : > { %1372 = vst.msk [vmem:[#allocation2 + $0x5c] sm:$0xf] %vm1348_vm9, %v1299_v59  ;;  %v2098_v59 = vrot.slane %v2096_v51, 4 }
 0x177   : > { %1380 = vst.msk [vmem:[#allocation2 + $0x7c] sm:$0xf] %vm1348_vm9, %v1315_v63 }
 0x178   : > { %v2100_v3 = vsel %vm4809_vm6, %v2098_v59, %v2099_v60  ;;  %v4195_v59 = vld [vmem:[%s4623_s19 + $0xbc] sm:$0x1]  ;;  %v4193_v60 = vld [vmem:[%s4623_s19 + $0xb4] sm:$0xe] }
 0x17a   : > { %2160 = vrot.lane.b32.xlu1 %v2058_v52, %s4575_s24  ;;  %v4179_v52 = vld [vmem:[%s4623_s19 + $0x7c] sm:$0xf] }
 0x17b   : > { %2158 = vrot.lane.b32.xlu0 %v2055_v58, %s4575_s24  ;;  %2156 = vrot.lane.b32.xlu2 %v2051_v5, %s4575_s24  ;;  %v2091_v58 = vrot.slane %v2089_v42, 4  ;;  %v4181_v5 = vld [vmem:[%s4623_s19 + $0x84] sm:$0xe]  ;;  %v2103_v7 = vrot.slane %v4179_v52, 5  ;;  %v4189_v42 = vld [vmem:[%s4623_s19 + $0xa4] sm:$0x1] }
 0x17c   : > { %v1307_v9 = vpop.permute.xlu1 %1306  ;;  %v4209_v11 = vrot.slane %v4181_v5, 9  ;;  %v2141_v52 = vrot.slane %v4195_v59, 5  ;;  %v2134_v5 = vrot.slane %v4192_v62, 5 }
 0x17d   : > { %1376 = vst.msk [vmem:[#allocation2 + $0x6c] sm:$0xf] %vm1348_vm9, %v1307_v9  ;;  %v1305_v13 = vpop.permute.xlu0 %1304  ;;  %v1818_v15 = vpop.permute.xlu2 %1817  ;;  %v2093_v9 = vsel %vm4809_vm6, %v2091_v58, %v2092_v0  ;;  %v2105_v14 = vrot.slane %v2103_v7, 4  ;;  %v4213_v0 = vrot.slane %v4193_v60, 9  ;;  %v4259_v60 = vld [vmem:[%s4623_s19 + $0x48] sm:$0xf] }
 0x17e   : > { %1375 = vst.msk [vmem:[#allocation2 + $0x68] sm:$0xf] %vm1348_vm9, %v1305_v13  ;;  %v2111_v20 = vsel %vm4809_vm6, %v4209_v11, %v2110_v12 }
 0x17f   : > { %1912 = vst.msk [vmem:[#allocation2 + $0x8] sm:$0xf] %vm1909_vm10, %v1818_v15  ;;  %v2106_v15 = vrot.slane %v4180_v8, 5 }
 0x181   : > { %v2107_v22 = vsel %vm4809_vm6, %v2105_v14, %v2106_v15 }
 0x182   : > { %2166 = vrot.lane.b32.xlu1 %v2069_v16, %s4575_s24  ;;  %v4185_v16 = vld [vmem:[%s4623_s19 + $0x94] sm:$0xf] }
 0x183   : > { %2164 = vrot.lane.b32.xlu0 %v2065_v18, %s4575_s24  ;;  %2162 = vrot.lane.b32.xlu2 %v2062_v21, %s4575_s24  ;;  %v4208_v18 = vrot.slane %v4178_v10, 9  ;;  %v2117_v21 = vrot.slane %v4185_v16, 5  ;;  %v4198_v10 = vld [vmem:[%s4623_s19 + $0xc8] sm:$0x1]  ;;  %v4247_v16 = vld [vmem:[%s4623_s19 + $0x18] sm:$0xf] }
 0x184   : > { %v1313_v26 = vpop.permute.xlu1 %1312  ;;  %v2148_v15 = vrot.slane %v4198_v10, 5 }
 0x185   : > { %1379 = vst.msk [vmem:[#allocation2 + $0x78] sm:$0xf] %vm1348_vm9, %v1313_v26  ;;  %v1311_v28 = vpop.permute.xlu0 %1310  ;;  %v1824_v34 = vpop.permute.xlu2 %1823  ;;  %v2104_v26 = vsel %vm4809_vm6, %v4208_v18, %v2103_v7  ;;  %v2118_v38 = vsel %vm4809_vm6, %v4210_v32, %v2117_v21 }
 0x186   : > { %1378 = vst.msk [vmem:[#allocation2 + $0x74] sm:$0xf] %vm1348_vm9, %v1311_v28  ;;  %v2119_v28 = vrot.slane %v2117_v21, 4  ;;  %v2525_v21 = vshrl.u32 %v4247_v16, 16 }
 0x187   : > { %1915 = vst.msk [vmem:[#allocation2 + $0x14] sm:$0xf] %vm1909_vm10, %v1824_v34 }
 0x188   : > { %v2121_v30 = vsel %vm4809_vm6, %v2119_v28, %v2120_v29  ;;  %v4248_v29 = vld [vmem:[%s4623_s19 + $0x1c] sm:$0xf] }
 0x18a   : > { %2172 = vrot.lane.b32.xlu1 %v2079_v35, %s4575_s24  ;;  %v4188_v35 = vld [vmem:[%s4623_s19 + $0xa0] sm:$0xf] }
 0x18b   : > { %2170 = vrot.lane.b32.xlu0 %v2076_v33, %s4575_s24  ;;  %2168 = vrot.lane.b32.xlu2 %v2072_v39, %s4575_s24  ;;  %v2112_v33 = vrot.slane %v2110_v12, 4  ;;  %v4190_v39 = vld [vmem:[%s4623_s19 + $0xa8] sm:$0xe]  ;;  %v2124_v41 = vrot.slane %v4188_v35, 5  ;;  %v4196_v12 = vld [vmem:[%s4623_s19 + $0xc0] sm:$0xe] }
 0x18c   : > { %v1816_v43 = vpop.permute.xlu1 %1815  ;;  %v4212_v45 = vrot.slane %v4190_v39, 9  ;;  %v4214_v18 = vrot.slane %v4196_v12, 9 }
 0x18d   : > { %1911 = vst.msk [vmem:[#allocation2 + $0x4] sm:$0xf] %vm1909_vm10, %v1816_v43  ;;  %v1814_v47 = vpop.permute.xlu0 %1813  ;;  %v1830_v49 = vpop.permute.xlu2 %1829  ;;  %v2114_v43 = vsel %vm4809_vm6, %v2112_v33, %v2113_v36  ;;  %v2126_v48 = vrot.slane %v2124_v41, 4  ;;  %v2534_v33 = vshll.u32 %v4248_v29, 16  ;;  %v4217_v36 = vld [vmem:[%s4623_s19 + $0x24] sm:$0xf] }
 0x18e   : > { %1910 = vst.msk [vmem:[#allocation2] sm:$0xf] %vm1909_vm10, %v1814_v47  ;;  %v2132_v55 = vsel %vm4809_vm6, %v4212_v45, %v2131_v46  ;;  %v4249_v45 = vld [vmem:[%s4623_s19 + $0x20] sm:$0x1] }
 0x18f   : > { %1918 = vst.msk [vmem:[#allocation2 + $0x20] sm:$0xf] %vm1909_vm10, %v1830_v49  ;;  %v2127_v49 = vrot.slane %v4189_v42, 5  ;;  %v2536_v39 = vrot.slane %v2534_v33, 5 }
 0x191   : > { %v2128_v57 = vsel %vm4809_vm6, %v2126_v48, %v2127_v49  ;;  %v4220_v48 = vld [vmem:[%s4623_s19 + $0x34] sm:$0xf]  ;;  %v4297_v49 = vld [vmem:[%s4623_s19 + $0x20] sm:$0x1] }
 0x192   : > { %2178 = vrot.lane.b32.xlu1 %v2090_v50, %s4575_s24  ;;  %v4194_v50 = vld [vmem:[%s4623_s19 + $0xb8] sm:$0xf] }
 0x193   : > { %2176 = vrot.lane.b32.xlu0 %v2086_v53, %s4575_s24  ;;  %2174 = vrot.lane.b32.xlu2 %v2083_v56, %s4575_s24  ;;  %v4211_v53 = vrot.slane %v4187_v44, 9  ;;  %v2138_v56 = vrot.slane %v4194_v50, 5  ;;  %v4295_v50 = vld [vmem:[%s4623_s19 + $0x18] sm:$0xe] }
 0x194   : > { %v1822_v61 = vpop.permute.xlu1 %1821  ;;  %v4343_v59 = vrot.slane %v4295_v50, 9 }
 0x195   : > { %1914 = vst.msk [vmem:[#allocation2 + $0x10] sm:$0xf] %vm1909_vm10, %v1822_v61  ;;  %v1820_v63 = vpop.permute.xlu0 %1819  ;;  %v1836_v2 = vpop.permute.xlu2 %1835  ;;  %v2125_v61 = vsel %vm4809_vm6, %v4211_v53, %v2124_v41  ;;  %v2139_v8 = vsel %vm4809_vm6, %v4213_v0, %v2138_v56  ;;  %v4296_v41 = vld [vmem:[%s4623_s19 + $0x1c] sm:$0xf]  ;;  %v4250_v0 = vld [vmem:[%s4623_s19 + $0x24] sm:$0xf] }
 0x196   : > { %1913 = vst.msk [vmem:[#allocation2 + $0xc] sm:$0xf] %vm1909_vm10, %v1820_v63  ;;  %v2140_v63 = vrot.slane %v2138_v56, 4  ;;  %v3138_v56 = vrot.slane %v4297_v49, 5  ;;  %v2552_v10 = vshll.u32 %v4250_v0, 16 }
 0x197   : > { %1921 = vst.msk [vmem:[#allocation2 + $0x2c] sm:$0xf] %vm1909_vm10, %v1836_v2 }
 0x198   : > { %v2142_v7 = vsel %vm4809_vm6, %v2140_v63, %v2141_v52  ;;  %v4251_v52 = vld [vmem:[%s4623_s19 + $0x28] sm:$0xf] }
 0x19a   : > { %2184 = vrot.lane.b32.xlu1 %v2100_v3, %s4575_s24  ;;  %v4197_v3 = vld [vmem:[%s4623_s19 + $0xc4] sm:$0xf] }
 0x19b   : > { %2182 = vrot.lane.b32.xlu0 %v2097_v4, %s4575_s24  ;;  %2180 = vrot.lane.b32.xlu2 %v2093_v9, %s4575_s24  ;;  %v2133_v4 = vrot.slane %v2131_v46, 4  ;;  %v2145_v9 = vrot.slane %v4197_v3, 5  ;;  %v2621_v3 = vshrl.u32 %v4259_v60, 16 }
 0x19c   : > { %v1828_v13 = vpop.permute.xlu1 %1827 }
 0x19d   : > { %1917 = vst.msk [vmem:[#allocation2 + $0x1c] sm:$0xf] %vm1909_vm10, %v1828_v13  ;;  %v1826_v17 = vpop.permute.xlu0 %1825  ;;  %v1842_v19 = vpop.permute.xlu2 %1841  ;;  %v2135_v11 = vsel %vm4809_vm6, %v2133_v4, %v2134_v5  ;;  %v2147_v14 = vrot.slane %v2145_v9, 4  ;;  %v2146_v24 = vsel %vm4809_vm6, %v4214_v18, %v2145_v9  ;;  %v2624_v4 = vshll.u32 %v4259_v60, 16  ;;  %v4252_v18 = vld [vmem:[%s4623_s19 + $0x2c] sm:$0x1] }
 0x19e   : > { %1916 = vst.msk [vmem:[#allocation2 + $0x18] sm:$0xf] %vm1909_vm10, %v1826_v17  ;;  %v2549_v9 = vshrl.u32 %v4250_v0, 16 }
 0x19f   : > { %1924 = vst.msk [vmem:[#allocation2 + $0x38] sm:$0xf] %vm1909_vm10, %v1842_v19  ;;  %v2149_v23 = vsel %vm4809_vm6, %v2147_v14, %v2148_v15  ;;  %v2626_v12 = vrot.slane %v2624_v4, 5  ;;  %v4260_v14 = vld [vmem:[%s4623_s19 + $0x4c] sm:$0xf] }
 0x1a2   : > { %2190 = vrot.lane.b32.xlu1 %v2111_v20, %s4575_s24  ;;  %v4215_v20 = vld [vmem:[%s4623_s19 + $0x18] sm:$0xf] }
 0x1a3   : > { %2188 = vrot.lane.b32.xlu0 %v2107_v22, %s4575_s24  ;;  %2186 = vrot.lane.b32.xlu2 %v2104_v26, %s4575_s24  ;;  %v2528_v22 = vshll.u32 %v4247_v16, 16  ;;  %v2527_v26 = vrot.slane %v2525_v21, 4 }
 0x1a4   : > { %v1834_v31 = vpop.permute.xlu1 %1833 }
 0x1a5   : > { %1920 = vst.msk [vmem:[#allocation2 + $0x28] sm:$0xf] %vm1909_vm10, %v1834_v31  ;;  %v1832_v34 = vpop.permute.xlu0 %1831  ;;  %v1848_v37 = vpop.permute.xlu2 %1847  ;;  %v2530_v27 = vrot.slane %v2528_v22, 5  ;;  %v4224_v22 = vld [vmem:[%s4623_s19 + $0x4c] sm:$0xf] }
 0x1a6   : > { %1919 = vst.msk [vmem:[#allocation2 + $0x24] sm:$0xf] %vm1909_vm10, %v1832_v34  ;;  %v4218_v34 = vld [vmem:[%s4623_s19 + $0x28] sm:$0xf] }
 0x1a7   : > { %1927 = vst.msk [vmem:[#allocation2 + $0x44] sm:$0xf] %vm1909_vm10, %v1848_v37  ;;  %v2531_v35 = vor.u32 %v2530_v27, %v2527_v26  ;;  %v2538_v37 = vshrl.u32 %v4248_v29, 16  ;;  %v4223_v26 = vld [vmem:[%s4623_s19 + $0x48] sm:$0xf]  ;;  %v2634_v29 = vshrl.u32 %v4260_v14, 16 }
 0x1aa   : > { %2196 = vrot.lane.b32.xlu1 %v2121_v30, %s4575_s24  ;;  %v4216_v30 = vld [vmem:[%s4623_s19 + $0x1c] sm:$0xf] }
 0x1ab   : > { %2194 = vrot.lane.b32.xlu0 %v2118_v38, %s4575_s24  ;;  %2192 = vrot.lane.b32.xlu2 %v2114_v43, %s4575_s24  ;;  %v2532_v38 = vrot.slane %v2531_v35, 4  ;;  %v2540_v43 = vrot.slane %v2538_v37, 4 }
 0x1ac   : > { %v1840_v47 = vpop.permute.xlu1 %1839 }
 0x1ad   : > { %1923 = vst.msk [vmem:[#allocation2 + $0x34] sm:$0xf] %vm1909_vm10, %v1840_v47  ;;  %v1838_v51 = vpop.permute.xlu0 %1837  ;;  %v1854_v54 = vpop.permute.xlu2 %1853  ;;  %v2537_v46 = vsel %vm4634_vm2, %v2532_v38, %v2536_v39  ;;  %v3135_v47 = vrot.slane %v4296_v41, 5  ;;  %v2541_v53 = vor.u32 %v2540_v43, %v2536_v39 }
 0x1ae   : > { %1922 = vst.msk [vmem:[#allocation2 + $0x30] sm:$0xf] %vm1909_vm10, %v1838_v51  ;;  %v4219_v51 = vld [vmem:[%s4623_s19 + $0x30] sm:$0xf] }
 0x1af   : > { %1930 = vst.msk [vmem:[#allocation2 + $0x50] sm:$0xf] %vm1909_vm10, %v1854_v54  ;;  %v2544_v54 = vshll.u32 %v4249_v45, 16  ;;  %v2542_v62 = vrot.slane %v2541_v53, 4  ;;  %v3136_v5 = vsel %vm4809_vm6, %v4343_v59, %v3135_v47 }
 0x1b1   : > { %v2546_v63 = vrot.slane %v2544_v54, 5 }
 0x1b2   : > { %2202 = vrot.lane.b32.xlu1 %v2132_v55, %s4575_s24  ;;  %v3137_v55 = vrot.slane %v3135_v47, 4  ;;  %v4298_v47 = vld [vmem:[%s4623_s19 + $0x24] sm:$0xe] }
 0x1b3   : > { %2200 = vrot.lane.b32.xlu0 %v2128_v57, %s4575_s24  ;;  %2198 = vrot.lane.b32.xlu2 %v2125_v61, %s4575_s24 }
 0x1b4   : > { %v1846_v58 = vpop.permute.xlu1 %1845 }
 0x1b5   : > { %1926 = vst.msk [vmem:[#allocation2 + $0x40] sm:$0xf] %vm1909_vm10, %v1846_v58  ;;  %v1844_v2 = vpop.permute.xlu0 %1843  ;;  %v1860_v6 = vpop.permute.xlu2 %1859 }
 0x1b6   : > { %1925 = vst.msk [vmem:[#allocation2 + $0x3c] sm:$0xf] %vm1909_vm10, %v1844_v2  ;;  %v3139_v2 = vsel %vm4809_vm6, %v3137_v55, %v3138_v56  ;;  %v4344_v55 = vrot.slane %v4298_v47, 9  ;;  %v4308_v56 = vld [vmem:[%s4623_s19 + $0x4c] sm:$0xf] }
 0x1b7   : > { %1933 = vst.msk [vmem:[#allocation2 + $0x5c] sm:$0xf] %vm1909_vm10, %v1860_v6  ;;  %v2558_v6 = vshll.u32 %v4251_v52, 16 }
 0x1b9   : > { %v2560_v15 = vrot.slane %v2558_v6, 5  ;;  %v4309_v6 = vld [vmem:[%s4623_s19 + $0x50] sm:$0x1] }
 0x1ba   : > { %2208 = vrot.lane.b32.xlu1 %v2142_v7, %s4575_s24  ;;  %v2562_v7 = vshrl.u32 %v4251_v52, 16 }
 0x1bb   : > { %2206 = vrot.lane.b32.xlu0 %v2139_v8, %s4575_s24  ;;  %2204 = vrot.lane.b32.xlu2 %v2135_v11, %s4575_s24  ;;  %v2547_v8 = vsel %vm4634_vm2, %v2542_v62, %v2546_v63  ;;  %v2623_v11 = vrot.slane %v2621_v3, 4  ;;  %v4271_v62 = vld [vmem:[%s4623_s19 + $0x78] sm:$0xf]  ;;  %v3163_v3 = vrot.slane %v4308_v56, 5 }
 0x1bc   : > { %v1852_v13 = vpop.permute.xlu1 %1851  ;;  %v2564_v16 = vrot.slane %v2562_v7, 4  ;;  %v2717_v4 = vshrl.u32 %v4271_v62, 16 }
 0x1bd   : > { %1929 = vst.msk [vmem:[#allocation2 + $0x4c] sm:$0xf] %vm1909_vm10, %v1852_v13  ;;  %v1850_v17 = vpop.permute.xlu0 %1849  ;;  %v1866_v19 = vpop.permute.xlu2 %1865 }
 0x1be   : > { %1928 = vst.msk [vmem:[#allocation2 + $0x48] sm:$0xf] %vm1909_vm10, %v1850_v17  ;;  %v2565_v27 = vor.u32 %v2564_v16, %v2560_v15 }
 0x1bf   : > { %1936 = vst.msk [vmem:[#allocation2 + $0x68] sm:$0xf] %vm1909_vm10, %v1866_v19  ;;  %v2551_v19 = vrot.slane %v2549_v9, 4 }
 0x1c2   : > { %2347 = vrot.lane.b32.xlu1 %v4215_v20, %s4576_s25  ;;  %v2554_v20 = vrot.slane %v2552_v10, 5 }
 0x1c3   : > { %2212 = vrot.lane.b32.xlu0 %v2149_v23, %s4575_s24  ;;  %2210 = vrot.lane.b32.xlu2 %v2146_v24, %s4575_s24  ;;  %v2627_v23 = vor.u32 %v2626_v12, %v2623_v11  ;;  %v2630_v24 = vshll.u32 %v4260_v14, 16  ;;  %v3165_v12 = vrot.slane %v3163_v3, 4  ;;  %v4273_v14 = vld [vmem:[%s4623_s19 + $0x80] sm:$0x1] }
 0x1c4   : > { %v1858_v28 = vpop.permute.xlu1 %1857 }
 0x1c5   : > { %1932 = vst.msk [vmem:[#allocation2 + $0x58] sm:$0xf] %vm1909_vm10, %v1858_v28  ;;  %v1856_v31 = vpop.permute.xlu0 %1855  ;;  %v1872_v32 = vpop.permute.xlu2 %1871  ;;  %v2568_v28 = vshll.u32 %v4252_v18, 16  ;;  %v2632_v35 = vrot.slane %v2630_v24, 5 }
 0x1c6   : > { %1931 = vst.msk [vmem:[#allocation2 + $0x54] sm:$0xf] %vm1909_vm10, %v1856_v31  ;;  %v4221_v31 = vld [vmem:[%s4623_s19 + $0x3c] sm:$0xf] }
 0x1c7   : > { %1939 = vst.msk [vmem:[#allocation2 + $0x74] sm:$0xf] %vm1909_vm10, %v1872_v32  ;;  %v2555_v32 = vor.u32 %v2554_v20, %v2551_v19  ;;  %v2570_v37 = vrot.slane %v2568_v28, 5  ;;  %v4231_v20 = vld [vmem:[%s4623_s19 + $0x78] sm:$0xf] }
 0x1c9   : > { %v2556_v39 = vrot.slane %v2555_v32, 4  ;;  %v4254_v32 = vld [vmem:[%s4623_s19 + $0x34] sm:$0xf] }
 0x1ca   : > { %2353 = vrot.lane.b32.xlu1 %v4218_v34, %s4576_s25  ;;  %v2628_v34 = vrot.slane %v2627_v23, 4 }
 0x1cb   : > { %2351 = vrot.lane.b32.xlu0 %v4217_v36, %s4576_s25  ;;  %2349 = vrot.lane.b32.xlu2 %v4216_v30, %s4576_s25  ;;  %v2566_v36 = vrot.slane %v2565_v27, 4  ;;  %v4299_v30 = vld [vmem:[%s4623_s19 + $0x28] sm:$0xf] }
 0x1cc   : > { %v1864_v40 = vpop.permute.xlu1 %1863  ;;  %v2633_v43 = vsel %vm4634_vm2, %v2628_v34, %v2632_v35 }
 0x1cd   : > { %1935 = vst.msk [vmem:[#allocation2 + $0x64] sm:$0xf] %vm1909_vm10, %v1864_v40  ;;  %v1862_v42 = vpop.permute.xlu0 %1861  ;;  %v2151_v44 = vpop.permute.xlu2 %2150  ;;  %v2636_v40 = vrot.slane %v2634_v29, 4  ;;  %v2571_v45 = vsel %vm4634_vm2, %v2566_v36, %v2570_v37 }
 0x1ce   : > { %1934 = vst.msk [vmem:[#allocation2 + $0x60] sm:$0xf] %vm1909_vm10, %v1862_v42  ;;  %v4261_v42 = vld [vmem:[%s4623_s19 + $0x50] sm:$0x1] }
 0x1cf   : > { %2247 = vst.msk [vmem:[#allocation2] sm:$0xf] %vm2246_vm11, %v2151_v44  ;;  %v3142_v44 = vrot.slane %v4299_v30, 5  ;;  %v2637_v49 = vor.u32 %v2636_v40, %v2632_v35  ;;  %v2640_v50 = vshll.u32 %v4261_v42, 16  ;;  %v4320_v35 = vld [vmem:[%s4623_s19 + $0x7c] sm:$0xf] }
 0x1d0   : > { %v2582_v30 = vshll.u32 %v4254_v32, 16  ;;  %v3191_v40 = vrot.slane %v4320_v35, 5 }
 0x1d1   : > { %v2638_v60 = vrot.slane %v2637_v49, 4 }
 0x1d2   : > { %2908 = vrot.lane.b32.xlu1 %v2537_v46, %s4577_s26  ;;  %v4300_v46 = vld [vmem:[%s4623_s19 + $0x2c] sm:$0x1]  ;;  %v3193_v49 = vrot.slane %v3191_v40, 4 }
 0x1d3   : > { %2357 = vrot.lane.b32.xlu0 %v4220_v48, %s4576_s25  ;;  %2355 = vrot.lane.b32.xlu2 %v4219_v51, %s4576_s25  ;;  %v2561_v48 = vsel %vm4634_vm2, %v2556_v39, %v2560_v15  ;;  %v3144_v51 = vrot.slane %v3142_v44, 4  ;;  %v3145_v53 = vrot.slane %v4300_v46, 5  ;;  %v2719_v15 = vrot.slane %v2717_v4, 4 }
 0x1d4   : > { %v1870_v57 = vpop.permute.xlu1 %1869  ;;  %v2584_v46 = vrot.slane %v2582_v30, 5 }
 0x1d5   : > { %1938 = vst.msk [vmem:[#allocation2 + $0x70] sm:$0xf] %vm1909_vm10, %v1870_v57  ;;  %v1868_v61 = vpop.permute.xlu0 %1867  ;;  %v2157_v58 = vpop.permute.xlu2 %2156  ;;  %v4272_v57 = vld [vmem:[%s4623_s19 + $0x7c] sm:$0xf]  ;;  %v3146_v52 = vsel %vm4809_vm6, %v3144_v51, %v3145_v53  ;;  %v4255_v51 = vld [vmem:[%s4623_s19 + $0x38] sm:$0x1] }
 0x1d6   : > { %1937 = vst.msk [vmem:[#allocation2 + $0x6c] sm:$0xf] %vm1909_vm10, %v1868_v61  ;;  %v2642_v61 = vrot.slane %v2640_v50, 5  ;;  %v2730_v0 = vshrl.u32 %v4272_v57, 16 }
 0x1d7   : > { %2250 = vst.msk [vmem:[#allocation2 + $0xc] sm:$0xf] %vm2246_vm11, %v2157_v58  ;;  %v2726_v58 = vshll.u32 %v4272_v57, 16  ;;  %v4263_v57 = vld [vmem:[%s4623_s19 + $0x58] sm:$0xf] }
 0x1d8   : > { %v2643_v7 = vsel %vm4634_vm2, %v2638_v60, %v2642_v61  ;;  %v2732_v10 = vrot.slane %v2730_v0, 4  ;;  %v4262_v60 = vld [vmem:[%s4623_s19 + $0x54] sm:$0xf]  ;;  %v2654_v0 = vshll.u32 %v4263_v57, 16 }
 0x1d9   : > { %v2728_v9 = vrot.slane %v2726_v58, 5  ;;  %v4225_v61 = vld [vmem:[%s4623_s19 + $0x54] sm:$0xf]  ;;  %v2645_v4 = vshrl.u32 %v4262_v60, 16 }
 0x1da   : > { %3247 = vrot.lane.b32.xlu1 %v3139_v2, %s4578_s27  ;;  %v3143_v2 = vsel %vm4809_vm6, %v4344_v55, %v3142_v44  ;;  %v4232_v44 = vld [vmem:[%s4623_s19 + $0x7c] sm:$0xf] }
 0x1db   : > { %3245 = vrot.lane.b32.xlu0 %v3136_v5, %s4578_s27  ;;  %2910 = vrot.lane.b32.xlu2 %v2547_v8, %s4577_s26  ;;  %v2720_v5 = vshll.u32 %v4271_v62, 16  ;;  %v4307_v8 = vld [vmem:[%s4623_s19 + $0x48] sm:$0xe] }
 0x1dc   : > { %v1876_v13 = vpop.permute.xlu1 %1875  ;;  %v4347_v18 = vrot.slane %v4307_v8, 9 }
 0x1dd   : > { %1941 = vst.msk [vmem:[#allocation2 + $0x7c] sm:$0xf] %vm1909_vm10, %v1876_v13  ;;  %v1874_v17 = vpop.permute.xlu0 %1873  ;;  %v2163_v21 = vpop.permute.xlu2 %2162  ;;  %v3166_v13 = vrot.slane %v4309_v6, 5  ;;  %v2722_v16 = vrot.slane %v2720_v5, 5  ;;  %v2648_v5 = vshll.u32 %v4262_v60, 16 }
 0x1de   : > { %1940 = vst.msk [vmem:[#allocation2 + $0x78] sm:$0xf] %vm1909_vm10, %v1874_v17 }
 0x1df   : > { %2253 = vst.msk [vmem:[#allocation2 + $0x18] sm:$0xf] %vm2246_vm11, %v2163_v21  ;;  %v2733_v21 = vor.u32 %v2732_v10, %v2728_v9  ;;  %v3167_v23 = vsel %vm4809_vm6, %v3165_v12, %v3166_v13  ;;  %v2723_v24 = vor.u32 %v2722_v16, %v2719_v15  ;;  %v2656_v10 = vrot.slane %v2654_v0, 5  ;;  %v4264_v13 = vld [vmem:[%s4623_s19 + $0x5c] sm:$0x1] }
 0x1e0   : > { %v2650_v15 = vrot.slane %v2648_v5, 5  ;;  %v4283_v5 = vld [vmem:[%s4623_s19 + $0xa8] sm:$0xf] }
 0x1e1   : > { %v2734_v27 = vrot.slane %v2733_v21, 4 }
 0x1e2   : > { %2365 = vrot.lane.b32.xlu1 %v4224_v22, %s4576_s25  ;;  %v2736_v22 = vshll.u32 %v4273_v14, 16  ;;  %v2647_v14 = vrot.slane %v2645_v4, 4 }
 0x1e3   : > { %2363 = vrot.lane.b32.xlu0 %v4223_v26, %s4576_s25  ;;  %2359 = vrot.lane.b32.xlu2 %v4221_v31, %s4576_s25  ;;  %v3164_v26 = vsel %vm4809_vm6, %v4347_v18, %v3163_v3  ;;  %v2724_v31 = vrot.slane %v2723_v24, 4 }
 0x1e4   : > { %v2155_v33 = vpop.permute.xlu1 %2154  ;;  %v2738_v28 = vrot.slane %v2736_v22, 5  ;;  %v2664_v22 = vshll.u32 %v4264_v13, 16  ;;  %v2651_v24 = vor.u32 %v2650_v15, %v2647_v14  ;;  %v4233_v15 = vld [vmem:[%s4623_s19 + $0x84] sm:$0xf] }
 0x1e5   : > { %2249 = vst.msk [vmem:[#allocation2 + $0x8] sm:$0xf] %vm2246_vm11, %v2155_v33  ;;  %v2153_v38 = vpop.permute.xlu0 %2152  ;;  %v2169_v41 = vpop.permute.xlu2 %2168  ;;  %v4253_v33 = vld [vmem:[%s4623_s19 + $0x30] sm:$0xf]  ;;  %v2729_v39 = vsel %vm4634_vm2, %v2724_v31, %v2728_v9 }
 0x1e6   : > { %2248 = vst.msk [vmem:[#allocation2 + $0x4] sm:$0xf] %vm2246_vm11, %v2153_v38  ;;  %v2739_v37 = vsel %vm4634_vm2, %v2734_v27, %v2738_v28  ;;  %v2586_v38 = vshrl.u32 %v4254_v32, 16  ;;  %v2576_v42 = vshll.u32 %v4253_v33, 16  ;;  %v2666_v31 = vrot.slane %v2664_v22, 5 }
 0x1e7   : > { %2256 = vst.msk [vmem:[#allocation2 + $0x24] sm:$0xf] %vm2246_vm11, %v2169_v41  ;;  %v2573_v41 = vshrl.u32 %v4253_v33, 16  ;;  %v4311_v32 = vld [vmem:[%s4623_s19 + $0x58] sm:$0xf]  ;;  %v2652_v35 = vrot.slane %v2651_v24, 4 }
 0x1e8   : > { %v2588_v47 = vrot.slane %v2586_v38, 4  ;;  %v4312_v38 = vld [vmem:[%s4623_s19 + $0x5c] sm:$0x1] }
 0x1e9   : > { %v2575_v53 = vrot.slane %v2573_v41, 4  ;;  %v4303_v41 = vld [vmem:[%s4623_s19 + $0x38] sm:$0x1] }
 0x1ea   : > { %2924 = vrot.lane.b32.xlu1 %v2633_v43, %s4577_s26  ;;  %v4321_v43 = vld [vmem:[%s4623_s19 + $0x80] sm:$0x1]  ;;  %v2589_v62 = vor.u32 %v2588_v47, %v2584_v46 }
 0x1eb   : > { %2914 = vrot.lane.b32.xlu0 %v2571_v45, %s4577_s26  ;;  %2912 = vrot.lane.b32.xlu2 %v2561_v48, %s4577_s26  ;;  %v4319_v45 = vld [vmem:[%s4623_s19 + $0x78] sm:$0xe]  ;;  %v3194_v50 = vrot.slane %v4321_v43, 5  ;;  %v3173_v43 = vrot.slane %v4312_v38, 5 }
 0x1ec   : > { %v2161_v54 = vpop.permute.xlu1 %2160  ;;  %v4351_v56 = vrot.slane %v4319_v45, 9  ;;  %v2590_v6 = vrot.slane %v2589_v62, 4 }
 0x1ed   : > { %2252 = vst.msk [vmem:[#allocation2 + $0x14] sm:$0xf] %vm2246_vm11, %v2161_v54  ;;  %v2159_v59 = vpop.permute.xlu0 %2158  ;;  %v2175_v63 = vpop.permute.xlu2 %2174  ;;  %v2578_v54 = vrot.slane %v2576_v42, 5 }
 0x1ee   : > { %2251 = vst.msk [vmem:[#allocation2 + $0x10] sm:$0xf] %vm2246_vm11, %v2159_v59  ;;  %v3192_v3 = vsel %vm4809_vm6, %v4351_v56, %v3191_v40  ;;  %v2657_v40 = vsel %vm4634_vm2, %v2652_v35, %v2656_v10 }
 0x1ef   : > { %2259 = vst.msk [vmem:[#allocation2 + $0x30] sm:$0xf] %vm2246_vm11, %v2175_v63  ;;  %v2592_v63 = vshll.u32 %v4255_v51, 16  ;;  %v2579_v58 = vor.u32 %v2578_v54, %v2575_v53 }
 0x1f1   : > { %v2580_v9 = vrot.slane %v2579_v58, 4 }
 0x1f2   : > { %3251 = vrot.lane.b32.xlu1 %v3146_v52, %s4578_s27  ;;  %v3195_v52 = vsel %vm4809_vm6, %v3193_v49, %v3194_v50  ;;  %v3152_v49 = vrot.slane %v4303_v41, 5  ;;  %v4274_v50 = vld [vmem:[%s4623_s19 + $0x84] sm:$0xf] }
 0x1f3   : > { %3249 = vrot.lane.b32.xlu0 %v3143_v2, %s4578_s27  ;;  %2926 = vrot.lane.b32.xlu2 %v2643_v7, %s4577_s26  ;;  %v2658_v2 = vshrl.u32 %v4263_v57, 16  ;;  %v2594_v7 = vrot.slane %v2592_v63, 5  ;;  %v2585_v18 = vsel %vm4634_vm2, %v2580_v9, %v2584_v46  ;;  %v4275_v46 = vld [vmem:[%s4623_s19 + $0x88] sm:$0xf]  ;;  %v2741_v57 = vshrl.u32 %v4274_v50, 16  ;;  %v4466_v41 = vld [vmem:[%s6322_s1] sm:$0xff] }
 0x1f4   : > { %v2167_v11 = vpop.permute.xlu1 %2166  ;;  %v2750_v54 = vshll.u32 %v4275_v46, 16 }
 0x1f5   : > { %2255 = vst.msk [vmem:[#allocation2 + $0x20] sm:$0xf] %vm2246_vm11, %v2167_v11  ;;  %v2165_v17 = vpop.permute.xlu0 %2164  ;;  %v2181_v19 = vpop.permute.xlu2 %2180  ;;  %v2660_v11 = vrot.slane %v2658_v2, 4  ;;  %v2743_v58 = vrot.slane %v2741_v57, 4 }
 0x1f6   : > { %2254 = vst.msk [vmem:[#allocation2 + $0x1c] sm:$0xf] %vm2246_vm11, %v2165_v17  ;;  %v2595_v17 = vsel %vm4634_vm2, %v2590_v6, %v2594_v7  ;;  %v3410_v6 = vld [vmem:[%s6322_s1 + $0x10] sm:$0x3]  ;;  %v4239_v7 = vld [vmem:[%s4623_s19 + $0xa8] sm:$0xf] }
 0x1f7   : > { %2262 = vst.msk [vmem:[#allocation2 + $0x3c] sm:$0xf] %vm2246_vm11, %v2181_v19  ;;  %v4301_v19 = vld [vmem:[%s4623_s19 + $0x30] sm:$0xe]  ;;  %v2661_v21 = vor.u32 %v2660_v11, %v2656_v10  ;;  %v3500_v10 = vunpack.c.l.b16 %v3410_v6  ;;  %v4234_v11 = vld [vmem:[%s4623_s19 + $0x88] sm:$0xf] }
 0x1fa   : > { %2379 = vrot.lane.b32.xlu1 %v4231_v20, %s4576_s25  ;;  %v4302_v20 = vld [vmem:[%s4623_s19 + $0x34] sm:$0xf] }
 0x1fb   : > { %3263 = vrot.lane.b32.xlu0 %v3167_v23, %s4578_s27  ;;  %3261 = vrot.lane.b32.xlu2 %v3164_v26, %s4578_s27  ;;  %v4226_v23 = vld [vmem:[%s4623_s19 + $0x58] sm:$0xf]  ;;  %v4345_v26 = vrot.slane %v4301_v19, 9  ;;  %v3149_v27 = vrot.slane %v4302_v20, 5 }
 0x1fc   : > { %v2173_v29 = vpop.permute.xlu1 %2172 }
 0x1fd   : > { %2258 = vst.msk [vmem:[#allocation2 + $0x2c] sm:$0xf] %vm2246_vm11, %v2173_v29  ;;  %v2171_v34 = vpop.permute.xlu0 %2170  ;;  %v2187_v36 = vpop.permute.xlu2 %2186  ;;  %v2662_v29 = vrot.slane %v2661_v21, 4 }
 0x1fe   : > { %2257 = vst.msk [vmem:[#allocation2 + $0x28] sm:$0xf] %vm2246_vm11, %v2171_v34 }
 0x1ff   : > { %2265 = vst.msk [vmem:[#allocation2 + $0x48] sm:$0xf] %vm2246_vm11, %v2187_v36  ;;  %v3150_v36 = vsel %vm4809_vm6, %v4345_v26, %v3149_v27  ;;  %v2667_v30 = vsel %vm4634_vm2, %v2662_v29, %v2666_v31 }
 0x202   : > { %2942 = vrot.lane.b32.xlu1 %v2739_v37, %s4577_s26  ;;  %v3170_v37 = vrot.slane %v4311_v32, 5 }
 0x203   : > { %2940 = vrot.lane.b32.xlu0 %v2729_v39, %s4577_s26  ;;  %2381 = vrot.lane.b32.xlu2 %v4232_v44, %s4576_s25  ;;  %v4310_v39 = vld [vmem:[%s4623_s19 + $0x54] sm:$0xe] }
 0x204   : > { %v2179_v48 = vpop.permute.xlu1 %2178  ;;  %v3172_v42 = vrot.slane %v3170_v37, 4  ;;  %v4348_v45 = vrot.slane %v4310_v39, 9  ;;  %v4240_v39 = vld [vmem:[%s4623_s19 + $0xac] sm:$0xf] }
 0x205   : > { %2261 = vst.msk [vmem:[#allocation2 + $0x38] sm:$0xf] %vm2246_vm11, %v2179_v48  ;;  %v2177_v55 = vpop.permute.xlu0 %2176  ;;  %v2193_v59 = vpop.permute.xlu2 %2192  ;;  %v3151_v48 = vrot.slane %v3149_v27, 4 }
 0x206   : > { %2260 = vst.msk [vmem:[#allocation2 + $0x34] sm:$0xf] %vm2246_vm11, %v2177_v55  ;;  %v3174_v53 = vsel %vm4809_vm6, %v3172_v42, %v3173_v43  ;;  %v2754_v55 = vshrl.u32 %v4275_v46, 16  ;;  %v3171_v56 = vsel %vm4809_vm6, %v4348_v45, %v3170_v37  ;;  %v4323_v37 = vld [vmem:[%s4623_s19 + $0x88] sm:$0xf] }
 0x207   : > { %2268 = vst.msk [vmem:[#allocation2 + $0x54] sm:$0xf] %vm2246_vm11, %v2193_v59  ;;  %v2744_v59 = vshll.u32 %v4274_v50, 16  ;;  %v3153_v60 = vsel %vm4809_vm6, %v3151_v48, %v3152_v49  ;;  %v3198_v43 = vrot.slane %v4323_v37, 5 }
 0x208   : > { %v2756_v62 = vrot.slane %v2754_v55, 4  ;;  %v4333_v55 = vld [vmem:[%s4623_s19 + $0xb0] sm:$0x1] }
 0x209   : > { %v2746_v0 = vrot.slane %v2744_v59, 5  ;;  %v4324_v59 = vld [vmem:[%s4623_s19 + $0x8c] sm:$0x1] }
 0x20a   : > { %2367 = vrot.lane.b32.xlu1 %v4225_v61, %s4576_s25  ;;  %v5693_v61 = vrot.slane %v2750_v54, 5 }
 0x20b   : > { %3279 = vrot.lane.b32.xlu0 %v3195_v52, %s4578_s27  ;;  %3277 = vrot.lane.b32.xlu2 %v3192_v3, %s4578_s27  ;;  %v4276_v52 = vld [vmem:[%s4623_s19 + $0x8c] sm:$0x1] }
 0x20c   : > { %v2185_v8 = vpop.permute.xlu1 %2184  ;;  %v4284_v3 = vld [vmem:[%s4623_s19 + $0xac] sm:$0xf]  ;;  %v2760_v9 = vshll.u32 %v4276_v52, 16  ;;  %v4265_v52 = vld [vmem:[%s4623_s19 + $0x60] sm:$0xf] }
 0x20d   : > { %2264 = vst.msk [vmem:[#allocation2 + $0x44] sm:$0xf] %vm2246_vm11, %v2185_v8  ;;  %v2183_v12 = vpop.permute.xlu0 %2182  ;;  %v2199_v16 = vpop.permute.xlu2 %2198  ;;  %v2757_v8 = vor.u32 %v2756_v62, %v5693_v61  ;;  %v2822_v13 = vshll.u32 %v4284_v3, 16  ;;  %v2826_v14 = vshrl.u32 %v4284_v3, 16  ;;  %v4257_v3 = vld [vmem:[%s4623_s19 + $0x40] sm:$0xf] }
 0x20e   : > { %2263 = vst.msk [vmem:[#allocation2 + $0x40] sm:$0xf] %vm2246_vm11, %v2183_v12  ;;  %v2747_v12 = vor.u32 %v2746_v0, %v2743_v58  ;;  %v2762_v20 = vrot.slane %v2760_v9, 5  ;;  %v3200_v0 = vrot.slane %v3198_v43, 4  ;;  %v2669_v6 = vshrl.u32 %v4265_v52, 16 }
 0x20f   : > { %2271 = vst.msk [vmem:[#allocation2 + $0x60] sm:$0xf] %vm2246_vm11, %v2199_v16  ;;  %v2813_v16 = vshrl.u32 %v4283_v5, 16  ;;  %v2758_v19 = vrot.slane %v2757_v8, 4  ;;  %v2824_v24 = vrot.slane %v2822_v13, 5  ;;  %v2828_v26 = vrot.slane %v2826_v14, 4 }
 0x210   : > { %v2606_v9 = vshll.u32 %v4257_v3, 16 }
 0x211   : > { %v2815_v29 = vrot.slane %v2813_v16, 4  ;;  %v2763_v35 = vsel %vm4634_vm2, %v2758_v19, %v2762_v20 }
 0x212   : > { %2918 = vrot.lane.b32.xlu1 %v2595_v17, %s4577_s26  ;;  %v2816_v17 = vshll.u32 %v4283_v5, 16  ;;  %v2608_v19 = vrot.slane %v2606_v9, 5 }
 0x213   : > { %2916 = vrot.lane.b32.xlu0 %v2585_v18, %s4577_s26  ;;  %2369 = vrot.lane.b32.xlu2 %v4226_v23, %s4576_s25  ;;  %v3503_v18 = vpack.c.b16 %v3500_v10, %v3500_v10  ;;  %v2748_v23 = vrot.slane %v2747_v12, 4  ;;  %v2610_v10 = vshrl.u32 %v4257_v3, 16  ;;  %v4256_v12 = vld [vmem:[%s4623_s19 + $0x3c] sm:$0xf] }
 0x214   : > { %v2191_v28 = vpop.permute.xlu1 %2190  ;;  %v2818_v31 = vrot.slane %v2816_v17, 5  ;;  %v2597_v13 = vshrl.u32 %v4256_v12, 16  ;;  %v2600_v14 = vshll.u32 %v4256_v12, 16 }
 0x215   : > { %2267 = vst.msk [vmem:[#allocation2 + $0x50] sm:$0xf] %vm2246_vm11, %v2191_v28  ;;  %v2189_v34 = vpop.permute.xlu0 %2188  ;;  %v2205_v33 = vpop.permute.xlu2 %2204  ;;  %v3557_v21 = vsel %vm3555_vm13, %v3503_v18, 0  ;;  %v4285_v28 = vld [vmem:[%s4623_s19 + $0xb0] sm:$0x1]  ;;  %v2612_v20 = vrot.slane %v2610_v10, 4 }
 0x216   : > { %2266 = vst.msk [vmem:[#allocation2 + $0x4c] sm:$0xf] %vm2246_vm11, %v2189_v34  ;;  %3564 = vmatpush.bf16.msra.mxu0 %v3557_v21  ;;  %4468 = vmatpush.bf16.msra.mxu1 %v3557_v21  ;;  %v4467_v34 = vld [vmem:[%s6322_s1 + $0x8] sm:$0xff]  ;;  %v2832_v38 = vshll.u32 %v4285_v28, 16  ;;  %v4266_v18 = vld [vmem:[%s4623_s19 + $0x64] sm:$0xf] }
 0x217   : > { %2274 = vst.msk [vmem:[#allocation2 + $0x6c] sm:$0xf] %vm2246_vm11, %v2205_v33  ;;  %4469 = vmatpush.bf16.msra.mxu2 %v3557_v21  ;;  %4470 = vmatpush.bf16.msra.mxu3 %v3557_v21  ;;  %v2753_v33 = vsel %vm4634_vm2, %v2748_v23, %v5693_v61  ;;  %v3222_v61 = vrot.slane %v4333_v55, 5  ;;  %v2599_v23 = vrot.slane %v2597_v13, 4  ;;  %v4278_v13 = vld [vmem:[%s4623_s19 + $0x94] sm:$0xf] }
 0x218   : > { %v2834_v46 = vrot.slane %v2832_v38, 5 }
 0x21a   : > { %3253 = vrot.lane.b32.xlu1 %v3150_v36, %s4578_s27  ;;  %v4322_v36 = vld [vmem:[%s4623_s19 + $0x84] sm:$0xe]  ;;  %3565 = vmatpush.bf16.msra.mxu0 %v4467_v34 }
 0x21b   : > { %2930 = vrot.lane.b32.xlu0 %v2667_v30, %s4577_s26  ;;  %2928 = vrot.lane.b32.xlu2 %v2657_v40, %s4577_s26  ;;  %v2829_v30 = vor.u32 %v2828_v26, %v2824_v24  ;;  %v2819_v40 = vor.u32 %v2818_v31, %v2815_v29  ;;  %v4352_v42 = vrot.slane %v4322_v36, 9  ;;  %v2678_v29 = vshll.u32 %v4266_v18, 16  ;;  %v4227_v31 = vld [vmem:[%s4623_s19 + $0x60] sm:$0xf] }
 0x21c   : > { %v2197_v44 = vpop.permute.xlu1 %2196  ;;  %4471 = vmatpush.bf16.msra.mxu1 %v4467_v34  ;;  %4472 = vmatpush.bf16.msra.mxu2 %v4467_v34 }
 0x21d   : > { %2270 = vst.msk [vmem:[#allocation2 + $0x5c] sm:$0xf] %vm2246_vm11, %v2197_v44  ;;  %v2195_v47 = vpop.permute.xlu0 %2194  ;;  %v2211_v51 = vpop.permute.xlu2 %2210  ;;  %4473 = vmatpush.bf16.msra.mxu3 %v4467_v34  ;;  %v2830_v45 = vrot.slane %v2829_v30, 4  ;;  %v2820_v49 = vrot.slane %v2819_v40, 4  ;;  %v2680_v30 = vrot.slane %v2678_v29, 5 }
 0x21e   : > { %2269 = vst.msk [vmem:[#allocation2 + $0x58] sm:$0xf] %vm2246_vm11, %v2195_v47  ;;  %v4332_v47 = vld [vmem:[%s4623_s19 + $0xac] sm:$0xf]  ;;  %3566 = vmatpush.bf16.msra.mxu0 %v4466_v41 }
 0x21f   : > { %2277 = vst.msk [vmem:[#allocation2 + $0x78] sm:$0xf] %vm2246_vm11, %v2211_v51  ;;  %v3199_v51 = vsel %vm4809_vm6, %v4352_v42, %v3198_v43  ;;  %v2835_v54 = vsel %vm4634_vm2, %v2830_v45, %v2834_v46  ;;  %v2825_v57 = vsel %vm4634_vm2, %v2820_v49, %v2824_v24  ;;  %v2602_v24 = vrot.slane %v2600_v14, 5  ;;  %v4267_v46 = vld [vmem:[%s4623_s19 + $0x68] sm:$0x1] }
 0x220   : > { %4474 = vmatpush.bf16.msra.mxu1 %v4466_v41  ;;  %4475 = vmatpush.bf16.msra.mxu2 %v4466_v41  ;;  %v2688_v55 = vshll.u32 %v4267_v46, 16 }
 0x221   : > { %4476 = vmatpush.bf16.msra.mxu3 %v4466_v41  ;;  %v2603_v36 = vor.u32 %v2602_v24, %v2599_v23  ;;  %v4305_v41 = vld [vmem:[%s4623_s19 + $0x40] sm:$0xf]  ;;  %v4277_v23 = vld [vmem:[%s4623_s19 + $0x90] sm:$0xf] }
 0x222   : > { %3267 = vrot.lane.b32.xlu1 %v3174_v53, %s4578_s27  ;;  %v3219_v53 = vrot.slane %v4332_v47, 5  ;;  %v2765_v24 = vshrl.u32 %v4277_v23, 16 }
 0x223   : > { %3265 = vrot.lane.b32.xlu0 %v3171_v56, %s4578_s27  ;;  %3255 = vrot.lane.b32.xlu2 %v3153_v60, %s4578_s27  ;;  %v4331_v56 = vld [vmem:[%s4623_s19 + $0xa8] sm:$0xe]  ;;  %v2604_v43 = vrot.slane %v2603_v36, 4 }
 0x224   : > { %v2203_v63 = vpop.permute.xlu1 %2202  ;;  %v3221_v60 = vrot.slane %v3219_v53, 4  ;;  %v2767_v36 = vrot.slane %v2765_v24, 4 }
 0x225   : > { %2273 = vst.msk [vmem:[#allocation2 + $0x68] sm:$0xf] %vm2246_vm11, %v2203_v63  ;;  %v2201_v2 = vpop.permute.xlu0 %2200  ;;  %v2350_v4 = vpop.permute.xlu2 %2349  ;;  %v4355_v63 = vrot.slane %v4331_v56, 9 }
 0x226   : > { %2272 = vst.msk [vmem:[#allocation2 + $0x64] sm:$0xf] %vm2246_vm11, %v2201_v2  ;;  %v3201_v2 = vrot.slane %v4324_v59, 5  ;;  %v3223_v5 = vsel %vm4809_vm6, %v3221_v60, %v3222_v61  ;;  %v4314_v61 = vld [vmem:[%s4623_s19 + $0x64] sm:$0xf] }
 0x227   : > { %2445 = vst.msk [vmem:[#allocation2 + $0x4] sm:$0xf] %vm2443_vm12, %v2350_v4  ;;  %v3220_v8 = vsel %vm4809_vm6, %v4355_v63, %v3219_v53  ;;  %v2609_v53 = vsel %vm4634_vm2, %v2604_v43, %v2608_v19 }
 0x22a   : > { %2395 = vrot.lane.b32.xlu1 %v4239_v7, %s4576_s25  ;;  %v2672_v7 = vshll.u32 %v4265_v52, 16 }
 0x22b   : > { %2385 = vrot.lane.b32.xlu0 %v4234_v11, %s4576_s25  ;;  %2383 = vrot.lane.b32.xlu2 %v4233_v15, %s4576_s25  ;;  %v3202_v11 = vsel %vm4809_vm6, %v3200_v0, %v3201_v2  ;;  %v2671_v15 = vrot.slane %v2669_v6, 4 }
 0x22c   : > { %v2209_v22 = vpop.permute.xlu1 %2208  ;;  %v2674_v16 = vrot.slane %v2672_v7, 5  ;;  %v4313_v7 = vld [vmem:[%s4623_s19 + $0x60] sm:$0xe] }
 0x22d   : > { %2276 = vst.msk [vmem:[#allocation2 + $0x74] sm:$0xf] %vm2246_vm11, %v2209_v22  ;;  %v2207_v27 = vpop.permute.xlu0 %2206  ;;  %v2356_v32 = vpop.permute.xlu2 %2355  ;;  %v4258_v22 = vld [vmem:[%s4623_s19 + $0x44] sm:$0x1]  ;;  %v4349_v14 = vrot.slane %v4313_v7, 9 }
 0x22e   : > { %2275 = vst.msk [vmem:[#allocation2 + $0x70] sm:$0xf] %vm2246_vm11, %v2207_v27  ;;  %v4228_v27 = vld [vmem:[%s4623_s19 + $0x64] sm:$0xf]  ;;  %v2675_v28 = vor.u32 %v2674_v16, %v2671_v15  ;;  %v2616_v34 = vshll.u32 %v4258_v22, 16 }
 0x22f   : > { %2448 = vst.msk [vmem:[#allocation2 + $0x10] sm:$0xf] %vm2443_vm12, %v2356_v32  ;;  %v2613_v32 = vor.u32 %v2612_v20, %v2608_v19  ;;  %v4235_v16 = vld [vmem:[%s4623_s19 + $0x90] sm:$0xf]  ;;  %v2774_v20 = vshll.u32 %v4278_v13, 16 }
 0x230   : > { %v2676_v37 = vrot.slane %v2675_v28, 4  ;;  %v2618_v40 = vrot.slane %v2616_v34, 5 }
 0x232   : > { %2946 = vrot.lane.b32.xlu1 %v2763_v35, %s4577_s26  ;;  %v2682_v35 = vshrl.u32 %v4266_v18, 16  ;;  %v2681_v47 = vsel %vm4634_vm2, %v2676_v37, %v2680_v30 }
 0x233   : > { %2944 = vrot.lane.b32.xlu0 %v2753_v33, %s4577_s26  ;;  %2397 = vrot.lane.b32.xlu2 %v4240_v39, %s4576_s25  ;;  %v4222_v33 = vld [vmem:[%s4623_s19 + $0x40] sm:$0xf]  ;;  %v2614_v39 = vrot.slane %v2613_v32, 4  ;;  %v2776_v32 = vrot.slane %v2774_v20, 5 }
 0x234   : > { %v2348_v44 = vpop.permute.xlu1 %2347 }
 0x235   : > { %2444 = vst.msk [vmem:[#allocation2] sm:$0xf] %vm2443_vm12, %v2348_v44  ;;  %v2213_v48 = vpop.permute.xlu0 %2212  ;;  %v2911_v50 = vpop.permute.xlu2 %2910  ;;  %v2684_v44 = vrot.slane %v2682_v35, 4  ;;  %v2619_v49 = vsel %vm4634_vm2, %v2614_v39, %v2618_v40 }
 0x236   : > { %2278 = vst.msk [vmem:[#allocation2 + $0x7c] sm:$0xf] %vm2246_vm11, %v2213_v48  ;;  %v3156_v48 = vrot.slane %v4305_v41, 5  ;;  %v4241_v41 = vld [vmem:[%s4623_s19 + $0xb4] sm:$0xf] }
 0x237   : > { %3006 = vst.msk [vmem:[#allocation2 + $0x4] sm:$0xf] %vm3004_vm14, %v2911_v50  ;;  %v4306_v50 = vld [vmem:[%s4623_s19 + $0x44] sm:$0x1] }
 0x238   : > { %v3158_v56 = vrot.slane %v3156_v48, 4 }
 0x23a   : > { %3281 = vrot.lane.b32.xlu1 %v3199_v51, %s4578_s27  ;;  %v4304_v51 = vld [vmem:[%s4623_s19 + $0x3c] sm:$0xe] }
 0x23b   : > { %2958 = vrot.lane.b32.xlu0 %v2835_v54, %s4577_s26  ;;  %2956 = vrot.lane.b32.xlu2 %v2825_v57, %s4577_s26  ;;  %v2685_v54 = vor.u32 %v2684_v44, %v2680_v30  ;;  %v3159_v57 = vrot.slane %v4306_v50, 5  ;;  %v4346_v60 = vrot.slane %v4304_v51, 9 }
 0x23c   : > { %v2354_v62 = vpop.permute.xlu1 %2353 }
 0x23d   : > { %2447 = vst.msk [vmem:[#allocation2 + $0xc] sm:$0xf] %vm2443_vm12, %v2354_v62  ;;  %v2352_v58 = vpop.permute.xlu0 %2351  ;;  %v2360_v4 = vpop.permute.xlu2 %2359  ;;  %v2686_v52 = vrot.slane %v2685_v54, 4  ;;  %v3160_v2 = vsel %vm4809_vm6, %v3158_v56, %v3159_v57  ;;  %v3157_v3 = vsel %vm4809_vm6, %v4346_v60, %v3156_v48  ;;  %v4288_v60 = vld [vmem:[%s4623_s19 + $0xbc] sm:$0x1] }
 0x23e   : > { %2446 = vst.msk [vmem:[#allocation2 + $0x8] sm:$0xf] %vm2443_vm12, %v2352_v58  ;;  %v2690_v58 = vrot.slane %v2688_v55, 5 }
 0x23f   : > { %2450 = vst.msk [vmem:[#allocation2 + $0x18] sm:$0xf] %vm2443_vm12, %v2360_v4  ;;  %v3177_v4 = vrot.slane %v4314_v61, 5 }
 0x240   : > { %v2691_v6 = vsel %vm4634_vm2, %v2686_v52, %v2690_v58  ;;  %v4327_v52 = vld [vmem:[%s4623_s19 + $0x98] sm:$0x1]  ;;  %v4325_v58 = vld [vmem:[%s4623_s19 + $0x90] sm:$0xe] }
 0x241   : > { %v3179_v9 = vrot.slane %v3177_v4, 4  ;;  %v3178_v22 = vsel %vm4809_vm6, %v4349_v14, %v3177_v4 }
 0x242   : > { %3295 = vrot.lane.b32.xlu1 %v3223_v5, %s4578_s27  ;;  %v4315_v5 = vld [vmem:[%s4623_s19 + $0x68] sm:$0x1] }
 0x243   : > { %3293 = vrot.lane.b32.xlu0 %v3220_v8, %s4578_s27  ;;  %3283 = vrot.lane.b32.xlu2 %v3202_v11, %s4578_s27  ;;  %v3180_v10 = vrot.slane %v4315_v5, 5  ;;  %v4286_v11 = vld [vmem:[%s4623_s19 + $0xb4] sm:$0xf]  ;;  %v3208_v5 = vrot.slane %v4327_v52, 5 }
 0x244   : > { %v2909_v17 = vpop.permute.xlu1 %2908  ;;  %v2840_v18 = vshll.u32 %v4286_v11, 16 }
 0x245   : > { %3005 = vst.msk [vmem:[#allocation2] sm:$0xf] %vm3004_vm14, %v2909_v17  ;;  %v2358_v21 = vpop.permute.xlu0 %2357  ;;  %v2913_v26 = vpop.permute.xlu2 %2912  ;;  %v2837_v17 = vshrl.u32 %v4286_v11, 16  ;;  %v3181_v19 = vsel %vm4809_vm6, %v3179_v9, %v3180_v10  ;;  %v4269_v9 = vld [vmem:[%s4623_s19 + $0x70] sm:$0xf] }
 0x246   : > { %2449 = vst.msk [vmem:[#allocation2 + $0x14] sm:$0xf] %vm2443_vm12, %v2358_v21  ;;  %v2778_v21 = vshrl.u32 %v4278_v13, 16  ;;  %v2842_v28 = vrot.slane %v2840_v18, 5  ;;  %v4268_v10 = vld [vmem:[%s4623_s19 + $0x6c] sm:$0xf] }
 0x247   : > { %3007 = vst.msk [vmem:[#allocation2 + $0x8] sm:$0xf] %vm3004_vm14, %v2913_v26  ;;  %v2768_v26 = vshll.u32 %v4277_v23, 16  ;;  %v2706_v18 = vshrl.u32 %v4269_v9, 16  ;;  %v4336_v23 = vld [vmem:[%s4623_s19 + $0xbc] sm:$0x1] }
 0x248   : > { %v2780_v34 = vrot.slane %v2778_v21, 4  ;;  %v2693_v21 = vshrl.u32 %v4268_v10, 16 }
 0x249   : > { %v2770_v37 = vrot.slane %v2768_v26, 5  ;;  %v4334_v26 = vld [vmem:[%s4623_s19 + $0xb4] sm:$0xe] }
 0x24a   : > { %2373 = vrot.lane.b32.xlu1 %v4228_v27, %s4576_s25  ;;  %v2839_v27 = vrot.slane %v2837_v17, 4  ;;  %v2702_v17 = vshll.u32 %v4269_v9, 16 }
 0x24b   : > { %2371 = vrot.lane.b32.xlu0 %v4227_v31, %s4576_s25  ;;  %2361 = vrot.lane.b32.xlu2 %v4222_v33, %s4576_s25  ;;  %v4287_v31 = vld [vmem:[%s4623_s19 + $0xb8] sm:$0xf]  ;;  %v2771_v46 = vor.u32 %v2770_v37, %v2767_v36  ;;  %v4356_v37 = vrot.slane %v4334_v26, 9  ;;  %v4244_v26 = vld [vmem:[%s4623_s19 + $0xc4] sm:$0xf] }
 0x24c   : > { %v3248_v38 = vpop.permute.xlu1 %3247  ;;  %v4279_v33 = vld [vmem:[%s4623_s19 + $0x98] sm:$0x1]  ;;  %v2843_v39 = vor.u32 %v2842_v28, %v2839_v27  ;;  %v2846_v40 = vshll.u32 %v4287_v31, 16  ;;  %v2850_v44 = vshrl.u32 %v4287_v31, 16  ;;  %v2704_v27 = vrot.slane %v2702_v17, 5 }
 0x24d   : > { %3343 = vst.msk [vmem:[#allocation2 + $0x4] sm:$0xf] %vm3341_vm15, %v3248_v38  ;;  %v3246_v42 = vpop.permute.xlu0 %3245  ;;  %v2927_v45 = vpop.permute.xlu2 %2926  ;;  %v4242_v38 = vld [vmem:[%s4623_s19 + $0xb8] sm:$0xf]  ;;  %v2784_v43 = vshll.u32 %v4279_v33, 16  ;;  %v2772_v56 = vrot.slane %v2771_v46, 4 }
 0x24e   : > { %3342 = vst.msk [vmem:[#allocation2] sm:$0xf] %vm3341_vm15, %v3246_v42  ;;  %v2781_v42 = vor.u32 %v2780_v34, %v2776_v32  ;;  %v2848_v48 = vrot.slane %v2846_v40, 5  ;;  %v2852_v57 = vrot.slane %v2850_v44, 4  ;;  %v2708_v28 = vrot.slane %v2706_v18, 4 }
 0x24f   : > { %v2786_v51 = vrot.slane %v2784_v43, 5  ;;  %v4270_v34 = vld [vmem:[%s4623_s19 + $0x74] sm:$0x1]  ;;  %v4290_v17 = vld [vmem:[%s4623_s19 + $0xc4] sm:$0xf] }
 0x250   : > { %v2782_v50 = vrot.slane %v2781_v42, 4  ;;  %v2712_v40 = vshll.u32 %v4270_v34, 16  ;;  %v2874_v34 = vshrl.u32 %v4290_v17, 16 }
 0x252   : > { %2932 = vrot.lane.b32.xlu1 %v2681_v47, %s4577_s26  ;;  %v2844_v47 = vrot.slane %v2843_v39, 4  ;;  %v2709_v39 = vor.u32 %v2708_v28, %v2704_v27  ;;  %v2870_v28 = vshll.u32 %v4290_v17, 16 }
 0x253   : > { %2922 = vrot.lane.b32.xlu0 %v2619_v49, %s4577_s26  ;;  %2920 = vrot.lane.b32.xlu2 %v2609_v53, %s4577_s26  ;;  %v4326_v53 = vld [vmem:[%s4623_s19 + $0x94] sm:$0xf] }
 0x254   : > { %v2366_v59 = vpop.permute.xlu1 %2365  ;;  %v2849_v61 = vsel %vm4634_vm2, %v2844_v47, %v2848_v48  ;;  %v2710_v44 = vrot.slane %v2709_v39, 4 }
 0x255   : > { %2453 = vst.msk [vmem:[#allocation2 + $0x24] sm:$0xf] %vm2443_vm12, %v2366_v59  ;;  %v2364_v62 = vpop.permute.xlu0 %2363  ;;  %v4450_v63 = vld [vmem:[#allocation2] sm:$0xff]  ;;  %v3262_v0 = vpop.permute.xlu2 %3261 }
 0x256   : > { %2452 = vst.msk [vmem:[#allocation2 + $0x20] sm:$0xf] %vm2443_vm12, %v2364_v62  ;;  %4431 = vmatmul.msk.bf16.vlgmr.msra.gmra.mxu0 %vm3506_vm0, %v4450_v63  ;;  %v3205_v62 = vrot.slane %v4326_v53, 5  ;;  %v2787_v63 = vsel %vm4634_vm2, %v2782_v50, %v2786_v51  ;;  %v4317_v50 = vld [vmem:[%s4623_s19 + $0x70] sm:$0xf] }
 0x257   : > { %3014 = vst.msk [vmem:[#allocation2 + $0x24] sm:$0xf] %vm3004_vm14, %v2927_v45  ;;  %v4236_v45 = vld [vmem:[%s4623_s19 + $0x94] sm:$0xf] }
 0x258   : > { %v3207_v4 = vrot.slane %v3205_v62, 4 }
 0x25a   : > { %3259 = vrot.lane.b32.xlu1 %v3160_v2, %s4578_s27  ;;  %v2853_v2 = vor.u32 %v2852_v57, %v2848_v48  ;;  %v4230_v57 = vld [vmem:[%s4623_s19 + $0x70] sm:$0xf] }
 0x25b   : > { %3257 = vrot.lane.b32.xlu0 %v3157_v3, %s4578_s27  ;;  %2934 = vrot.lane.b32.xlu2 %v2691_v6, %s4577_s26  ;;  %v2856_v3 = vshll.u32 %v4288_v60, 16  ;;  %v4353_v6 = vrot.slane %v4325_v58, 9  ;;  %v4281_v58 = vld [vmem:[%s4623_s19 + $0xa0] sm:$0xf] }
 0x25c   : > { %v2925_v8 = vpop.permute.xlu1 %2924  ;;  %v2854_v13 = vrot.slane %v2853_v2, 4 }
 0x25d   : > { %3013 = vst.msk [vmem:[#allocation2 + $0x20] sm:$0xf] %vm3004_vm14, %v2925_v8  ;;  %v2915_v12 = vpop.permute.xlu0 %2914  ;;  %v2382_v15 = vpop.permute.xlu2 %2381  ;;  %v4335_v8 = vld [vmem:[%s4623_s19 + $0xb8] sm:$0xf]  ;;  %v2858_v14 = vrot.slane %v2856_v3, 5 }
 0x25e   : > { %3008 = vst.msk [vmem:[#allocation2 + $0xc] sm:$0xf] %vm3004_vm14, %v2915_v12  ;;  %v3226_v20 = vrot.slane %v4335_v8, 5  ;;  %v4237_v3 = vld [vmem:[%s4623_s19 + $0x9c] sm:$0xf]  ;;  %v2802_v8 = vshrl.u32 %v4281_v58, 16 }
 0x25f   : > { %3350 = vst.msk [vmem:[#allocation2 + $0x20] sm:$0xf] %vm3341_vm15, %v3262_v0  ;;  %v2777_v0 = vsel %vm4634_vm2, %v2772_v56, %v2776_v32  ;;  %v2859_v24 = vsel %vm4634_vm2, %v2854_v13, %v2858_v14  ;;  %v3229_v32 = vrot.slane %v4336_v23, 5  ;;  %v4318_v56 = vld [vmem:[%s4623_s19 + $0x74] sm:$0x1] }
 0x260   : > { %2461 = vst.msk [vmem:[#allocation2 + $0x44] sm:$0xf] %vm2443_vm12, %v2382_v15  ;;  %v3228_v31 = vrot.slane %v3226_v20, 4  ;;  %v3227_v43 = vsel %vm4809_vm6, %v4356_v37, %v3226_v20  ;;  %v2872_v37 = vrot.slane %v2870_v28, 5 }
 0x262   : > { %2387 = vrot.lane.b32.xlu1 %v4235_v16, %s4576_s25  ;;  %v3209_v16 = vsel %vm4809_vm6, %v3207_v4, %v3208_v5 }
 0x263   : > { %3271 = vrot.lane.b32.xlu0 %v3181_v19, %s4578_s27  ;;  %3269 = vrot.lane.b32.xlu2 %v3178_v22, %s4578_s27  ;;  %v3206_v19 = vsel %vm4809_vm6, %v4353_v6, %v3205_v62  ;;  %v2696_v22 = vshll.u32 %v4268_v10, 16  ;;  %v3187_v62 = vrot.slane %v4318_v56, 5  ;;  %v4280_v10 = vld [vmem:[%s4623_s19 + $0x9c] sm:$0xf] }
 0x264   : > { %v3252_v29 = vpop.permute.xlu1 %3251 }
 0x265   : > { %3345 = vst.msk [vmem:[#allocation2 + $0xc] sm:$0xf] %vm3341_vm15, %v3252_v29  ;;  %v3250_v35 = vpop.permute.xlu0 %3249  ;;  %v3278_v30 = vpop.permute.xlu2 %3277  ;;  %v2698_v33 = vrot.slane %v2696_v22, 5 }
 0x266   : > { %3344 = vst.msk [vmem:[#allocation2 + $0x8] sm:$0xf] %vm3341_vm15, %v3250_v35  ;;  %v2695_v35 = vrot.slane %v2693_v21, 4  ;;  %v4282_v21 = vld [vmem:[%s4623_s19 + $0xa4] sm:$0x1] }
 0x268   : > { %v2699_v42 = vor.u32 %v2698_v33, %v2695_v35  ;;  %v4238_v35 = vld [vmem:[%s4623_s19 + $0xa0] sm:$0xf] }
 0x26a   : > { %2401 = vrot.lane.b32.xlu1 %v4242_v38, %s4576_s25  ;;  %v4229_v38 = vld [vmem:[%s4623_s19 + $0x6c] sm:$0xf]  ;;  %v2700_v47 = vrot.slane %v2699_v42, 4 }
 0x26b   : > { %2399 = vrot.lane.b32.xlu0 %v4241_v41, %s4576_s25  ;;  %2389 = vrot.lane.b32.xlu2 %v4236_v45, %s4576_s25  ;;  %v3230_v41 = vsel %vm4809_vm6, %v3228_v31, %v3229_v32  ;;  %v2714_v45 = vrot.slane %v2712_v40, 5  ;;  %v2808_v32 = vshll.u32 %v4282_v21, 16  ;;  %v4329_v40 = vld [vmem:[%s4623_s19 + $0xa0] sm:$0xf] }
 0x26c   : > { %v2380_v49 = vpop.permute.xlu1 %2379 }
 0x26d   : > { %2460 = vst.msk [vmem:[#allocation2 + $0x40] sm:$0xf] %vm2443_vm12, %v2380_v49  ;;  %v3264_v54 = vpop.permute.xlu0 %3263  ;;  %v4451_v55 = vld [vmem:[#allocation2 + $0x8] sm:$0xff]  ;;  %v2370_v59 = vpop.permute.xlu2 %2369  ;;  %v2715_v53 = vsel %vm4634_vm2, %v2710_v44, %v2714_v45  ;;  %v2810_v39 = vrot.slane %v2808_v32, 5  ;;  %v2876_v44 = vrot.slane %v2874_v34, 4 }
 0x26e   : > { %3351 = vst.msk [vmem:[#allocation2 + $0x24] sm:$0xf] %vm3341_vm15, %v3264_v54  ;;  %4432 = vmatmul.msk.bf16.gmra.mxu0 %vm3506_vm0, %v4451_v55  ;;  %v2705_v54 = vsel %vm4634_vm2, %v2700_v47, %v2704_v27  ;;  %v3184_v55 = vrot.slane %v4317_v50, 5  ;;  %v4330_v50 = vld [vmem:[%s4623_s19 + $0xa4] sm:$0x1] }
 0x26f   : > { %2455 = vst.msk [vmem:[#allocation2 + $0x2c] sm:$0xf] %vm2443_vm12, %v2370_v59  ;;  %v4316_v59 = vld [vmem:[%s4623_s19 + $0x6c] sm:$0xe] }
 0x272   : > { %2960 = vrot.lane.b32.xlu1 %v2849_v61, %s4577_s26  ;;  %v3186_v61 = vrot.slane %v3184_v55, 4 }
 0x273   : > { %2950 = vrot.lane.b32.xlu0 %v2787_v63, %s4577_s26  ;;  %2948 = vrot.lane.b32.xlu2 %v2777_v0, %s4577_s26  ;;  %v4289_v63 = vld [vmem:[%s4623_s19 + $0xc0] sm:$0xf]  ;;  %v4350_v0 = vrot.slane %v4316_v59, 9 }
 0x274   : > { %v2943_v7 = vpop.permute.xlu1 %2942  ;;  %v2861_v4 = vshrl.u32 %v4289_v63, 16  ;;  %v2864_v5 = vshll.u32 %v4289_v63, 16  ;;  %v3188_v6 = vsel %vm4809_vm6, %v3186_v61, %v3187_v62  ;;  %v4338_v61 = vld [vmem:[%s4623_s19 + $0xc4] sm:$0xf]  ;;  %v4292_v63 = vld [vmem:[%s4623_s19 + $0xcc] sm:$0xf] }
 0x275   : > { %3022 = vst.msk [vmem:[#allocation2 + $0x44] sm:$0xf] %vm3004_vm14, %v2943_v7  ;;  %v2941_v11 = vpop.permute.xlu0 %2940  ;;  %v4454_v12 = vld [vmem:[#allocation2 + $0x20] sm:$0xff]  ;;  %v2929_v15 = vpop.permute.xlu2 %2928  ;;  %v2798_v7 = vshll.u32 %v4281_v58, 16  ;;  %v3185_v9 = vsel %vm4809_vm6, %v4350_v0, %v3184_v55  ;;  %v4293_v0 = vld [vmem:[%s4623_s19 + $0xd0] sm:$0xf] }
 0x276   : > { %3021 = vst.msk [vmem:[#allocation2 + $0x40] sm:$0xf] %vm3004_vm14, %v2941_v11  ;;  %4435 = vmatmul.msk.bf16.vlgmr.msra.gmra.mxu1 %vm3506_vm0, %v4454_v12  ;;  %v2789_v11 = vshrl.u32 %v4280_v10, 16  ;;  %v2792_v12 = vshll.u32 %v4280_v10, 16  ;;  %v2863_v13 = vrot.slane %v2861_v4, 4  ;;  %v2866_v14 = vrot.slane %v2864_v5, 5 }
 0x277   : > { %3358 = vst.msk [vmem:[#allocation2 + $0x40] sm:$0xf] %vm3341_vm15, %v3278_v30  ;;  %v2800_v18 = vrot.slane %v2798_v7, 5  ;;  %v2898_v4 = vshrl.u32 %v4293_v0, 16  ;;  %v2885_v7 = vshrl.u32 %v4292_v63, 16  ;;  %v2894_v10 = vshll.u32 %v4293_v0, 16 }
 0x278   : > { %v2791_v22 = vrot.slane %v2789_v11, 4  ;;  %v2794_v23 = vrot.slane %v2792_v12, 5  ;;  %v2867_v27 = vor.u32 %v2866_v14, %v2863_v13  ;;  %v4337_v12 = vld [vmem:[%s4623_s19 + $0xc0] sm:$0xe] }
 0x279   : > { %v2900_v13 = vrot.slane %v2898_v4, 4  ;;  %v2887_v17 = vrot.slane %v2885_v7, 4  ;;  %v2896_v21 = vrot.slane %v2894_v10, 5 }
 0x27a   : > { %3287 = vrot.lane.b32.xlu1 %v3209_v16, %s4578_s27  ;;  %v2795_v33 = vor.u32 %v2794_v23, %v2791_v22  ;;  %v4357_v22 = vrot.slane %v4337_v12, 9 }
 0x27b   : > { %3285 = vrot.lane.b32.xlu0 %v3206_v19, %s4578_s27  ;;  %2962 = vrot.lane.b32.xlu2 %v2859_v24, %s4577_s26  ;;  %v2804_v19 = vrot.slane %v2802_v8, 4  ;;  %v2888_v8 = vshll.u32 %v4292_v63, 16 }
 0x27c   : > { %v2368_v29 = vpop.permute.xlu1 %2367 }
 0x27d   : > { %2454 = vst.msk [vmem:[#allocation2 + $0x28] sm:$0xf] %vm2443_vm12, %v2368_v29  ;;  %v3280_v36 = vpop.permute.xlu0 %3279  ;;  %v3256_v30 = vpop.permute.xlu2 %3255  ;;  %v4243_v29 = vld [vmem:[%s4623_s19 + $0xc0] sm:$0xf]  ;;  %v2805_v31 = vor.u32 %v2804_v19, %v2800_v18  ;;  %v4294_v19 = vld [vmem:[%s4623_s19 + $0xd4] sm:$0x1] }
 0x27e   : > { %3359 = vst.msk [vmem:[#allocation2 + $0x44] sm:$0xf] %vm3341_vm15, %v3280_v36  ;;  %v2868_v36 = vrot.slane %v2867_v27, 4  ;;  %v2904_v27 = vshll.u32 %v4294_v19, 16 }
 0x27f   : > { %3015 = vst.msk [vmem:[#allocation2 + $0x28] sm:$0xf] %vm3004_vm14, %v2929_v15 }
 0x280   : > { %v2873_v47 = vsel %vm4634_vm2, %v2868_v36, %v2872_v37  ;;  %v2906_v34 = vrot.slane %v2904_v27, 5 }
 0x282   : > { %2375 = vrot.lane.b32.xlu1 %v4229_v38, %s4576_s25  ;;  %v2806_v38 = vrot.slane %v2805_v31, 4 }
 0x283   : > { %3299 = vrot.lane.b32.xlu0 %v3230_v41, %s4578_s27  ;;  %3297 = vrot.lane.b32.xlu2 %v3227_v43, %s4578_s27  ;;  %v2796_v43 = vrot.slane %v2795_v33, 4 }
 0x284   : > { %v2919_v46 = vpop.permute.xlu1 %2918 }
 0x285   : > { %3010 = vst.msk [vmem:[#allocation2 + $0x14] sm:$0xf] %vm3004_vm14, %v2919_v46  ;;  %v2917_v48 = vpop.permute.xlu0 %2916  ;;  %v4458_v49 = vld [vmem:[#allocation2 + $0x40] sm:$0xff]  ;;  %v2384_v51 = vpop.permute.xlu2 %2383  ;;  %v4291_v46 = vld [vmem:[%s4623_s19 + $0xc8] sm:$0x1] }
 0x286   : > { %3009 = vst.msk [vmem:[#allocation2 + $0x10] sm:$0xf] %vm3004_vm14, %v2917_v48  ;;  %4439 = vmatmul.msk.bf16.vlgmr.msra.gmra.mxu2 %vm3506_vm0, %v4458_v49  ;;  %v3212_v48 = vrot.slane %v4329_v40, 5  ;;  %v2811_v49 = vsel %vm4634_vm2, %v2806_v38, %v2810_v39  ;;  %v2880_v55 = vshll.u32 %v4291_v46, 16 }
 0x287   : > { %3347 = vst.msk [vmem:[#allocation2 + $0x14] sm:$0xf] %vm3341_vm15, %v3256_v30 }
 0x288   : > { %2462 = vst.msk [vmem:[#allocation2 + $0x48] sm:$0xf] %vm2443_vm12, %v2384_v51  ;;  %v4328_v51 = vld [vmem:[%s4623_s19 + $0x9c] sm:$0xe]  ;;  %v3214_v56 = vrot.slane %v3212_v48, 4  ;;  %v2882_v58 = vrot.slane %v2880_v55, 5 }
 0x28a   : > { %2938 = vrot.lane.b32.xlu1 %v2715_v53, %s4577_s26  ;;  %v2801_v53 = vsel %vm4634_vm2, %v2796_v43, %v2800_v18  ;;  %v2890_v18 = vrot.slane %v2888_v8, 5  ;;  %v4246_v43 = vld [vmem:[%s4623_s19 + $0xd0] sm:$0xf] }
 0x28b   : > { %2936 = vrot.lane.b32.xlu0 %v2705_v54, %s4577_s26  ;;  %2377 = vrot.lane.b32.xlu2 %v4230_v57, %s4576_s25  ;;  %v2877_v54 = vor.u32 %v2876_v44, %v2872_v37  ;;  %v3215_v57 = vrot.slane %v4330_v50, 5  ;;  %v4340_v44 = vld [vmem:[%s4623_s19 + $0xcc] sm:$0xe] }
 0x28c   : > { %v3254_v60 = vpop.permute.xlu1 %3253  ;;  %v4358_v50 = vrot.slane %v4340_v44, 9 }
 0x28d   : > { %3346 = vst.msk [vmem:[#allocation2 + $0x10] sm:$0xf] %vm3341_vm15, %v3254_v60  ;;  %v2931_v52 = vpop.permute.xlu0 %2930  ;;  %v2398_v2 = vpop.permute.xlu2 %2397  ;;  %v4354_v60 = vrot.slane %v4328_v51, 9 }
 0x28e   : > { %3016 = vst.msk [vmem:[#allocation2 + $0x2c] sm:$0xf] %vm3004_vm14, %v2931_v52  ;;  %v2878_v52 = vrot.slane %v2877_v54, 4 }
 0x28f   : > { %2469 = vst.msk [vmem:[#allocation2 + $0x64] sm:$0xf] %vm2443_vm12, %v2398_v2  ;;  %v3213_v5 = vsel %vm4809_vm6, %v4354_v60, %v3212_v48 }
 0x290   : > { %v2883_v11 = vsel %vm4634_vm2, %v2878_v52, %v2882_v58 }
 0x292   : > { %2391 = vrot.lane.b32.xlu1 %v4237_v3, %s4576_s25  ;;  %v3216_v3 = vsel %vm4809_vm6, %v3214_v56, %v3215_v57 }
 0x293   : > { %3275 = vrot.lane.b32.xlu0 %v3188_v6, %s4578_s27  ;;  %3273 = vrot.lane.b32.xlu2 %v3185_v9, %s4578_s27  ;;  %v3233_v6 = vrot.slane %v4338_v61, 5  ;;  %v4339_v9 = vld [vmem:[%s4623_s19 + $0xc8] sm:$0x1] }
 0x294   : > { %v3268_v15 = vpop.permute.xlu1 %3267  ;;  %v4452_v16 = vld [vmem:[#allocation2 + $0x10] sm:$0xff] }
 0x295   : > { %3353 = vst.msk [vmem:[#allocation2 + $0x2c] sm:$0xf] %vm3341_vm15, %v3268_v15  ;;  %v3266_v20 = vpop.permute.xlu0 %3265  ;;  %4433 = vmatmul.msk.bf16.gmra.mxu0 %vm3506_vm0, %v4452_v16  ;;  %v2957_v24 = vpop.permute.xlu2 %2956  ;;  %v3235_v15 = vrot.slane %v3233_v6, 4  ;;  %v3236_v16 = vrot.slane %v4339_v9, 5  ;;  %v3234_v31 = vsel %vm4809_vm6, %v4357_v22, %v3233_v6 }
 0x296   : > { %3352 = vst.msk [vmem:[#allocation2 + $0x28] sm:$0xf] %vm3341_vm15, %v3266_v20 }
 0x297   : > { %v3237_v28 = vsel %vm4809_vm6, %v3235_v15, %v3236_v16 }
 0x29a   : > { %2405 = vrot.lane.b32.xlu1 %v4244_v26, %s4576_s25  ;;  %v2901_v26 = vor.u32 %v2900_v13, %v2896_v21 }
 0x29b   : > { %2403 = vrot.lane.b32.xlu0 %v4243_v29, %s4576_s25  ;;  %2393 = vrot.lane.b32.xlu2 %v4238_v35, %s4576_s25  ;;  %v2891_v29 = vor.u32 %v2890_v18, %v2887_v17 }
 0x29c   : > { %v2396_v30 = vpop.permute.xlu1 %2395  ;;  %v2902_v32 = vrot.slane %v2901_v26, 4 }
 0x29d   : > { %2468 = vst.msk [vmem:[#allocation2 + $0x60] sm:$0xf] %vm2443_vm12, %v2396_v30  ;;  %v2386_v41 = vpop.permute.xlu0 %2385  ;;  %v4455_v42 = vld [vmem:[#allocation2 + $0x28] sm:$0xff]  ;;  %v3284_v45 = vpop.permute.xlu2 %3283  ;;  %v2892_v36 = vrot.slane %v2891_v29, 4  ;;  %v4341_v30 = vld [vmem:[%s4623_s19 + $0xd0] sm:$0xf] }
 0x29e   : > { %2463 = vst.msk [vmem:[#allocation2 + $0x4c] sm:$0xf] %vm2443_vm12, %v2386_v41  ;;  %4436 = vmatmul.msk.bf16.gmra.mxu1 %vm3506_vm0, %v4455_v42  ;;  %v2907_v39 = vsel %vm4634_vm2, %v2902_v32, %v2906_v34  ;;  %v3240_v41 = vrot.slane %v4341_v30, 5  ;;  %v4342_v42 = vld [vmem:[%s4623_s19 + $0xd4] sm:$0x1] }
 0x29f   : > { %3029 = vst.msk [vmem:[#allocation2 + $0x60] sm:$0xf] %vm3004_vm14, %v2957_v24  ;;  %v4245_v24 = vld [vmem:[%s4623_s19 + $0xcc] sm:$0xf]  ;;  %v2897_v40 = vsel %vm4634_vm2, %v2892_v36, %v2896_v21  ;;  %vm3751_vm2 = vcmask 57344  }
 0x2a0   : > { %v3242_v46 = vrot.slane %v3240_v41, 4 }
 0x2a2   : > { %2964 = vrot.lane.b32.xlu1 %v2873_v47, %s4577_s26  ;;  %v3243_v47 = vrot.slane %v4342_v42, 5 }
 0x2a3   : > { %2954 = vrot.lane.b32.xlu0 %v2811_v49, %s4577_s26  ;;  %2952 = vrot.lane.b32.xlu2 %v2801_v53, %s4577_s26  ;;  %v3241_v53 = vsel %vm4809_vm6, %v4358_v50, %v3240_v41 }
 0x2a4   : > { %v2947_v59 = vpop.permute.xlu1 %2946  ;;  %v3244_v51 = vsel %vm4809_vm6, %v3242_v46, %v3243_v47 }
 0x2a5   : > { %3024 = vst.msk [vmem:[#allocation2 + $0x4c] sm:$0xf] %vm3004_vm14, %v2947_v59  ;;  %v2945_v62 = vpop.permute.xlu0 %2944  ;;  %v2362_v2 = vpop.permute.xlu2 %2361 }
 0x2a6   : > { %3023 = vst.msk [vmem:[#allocation2 + $0x48] sm:$0xf] %vm3004_vm14, %v2945_v62 }
 0x2a7   : > { %3361 = vst.msk [vmem:[#allocation2 + $0x4c] sm:$0xf] %vm3341_vm15, %v3284_v45 }
 0x2a8   : > { %2451 = vst.msk [vmem:[#allocation2 + $0x1c] sm:$0xf] %vm2443_vm12, %v2362_v2 }
 0x2aa   : > { %3291 = vrot.lane.b32.xlu1 %v3216_v3, %s4578_s27 }
 0x2ab   : > { %3289 = vrot.lane.b32.xlu0 %v3213_v5, %s4578_s27  ;;  %2966 = vrot.lane.b32.xlu2 %v2883_v11, %s4577_s26 }
 0x2ac   : > { %v3282_v14 = vpop.permute.xlu1 %3281 }
 0x2ad   : > { %3360 = vst.msk [vmem:[#allocation2 + $0x48] sm:$0xf] %vm3341_vm15, %v3282_v14  ;;  %v2959_v20 = vpop.permute.xlu0 %2958  ;;  %v2921_v23 = vpop.permute.xlu2 %2920 }
 0x2ae   : > { %3030 = vst.msk [vmem:[#allocation2 + $0x64] sm:$0xf] %vm3004_vm14, %v2959_v20 }
 0x2af   : > { %3011 = vst.msk [vmem:[#allocation2 + $0x18] sm:$0xf] %vm3004_vm14, %v2921_v23 }
 0x2b2   : > { %2407 = vrot.lane.b32.xlu1 %v4245_v24, %s4576_s25 }
 0x2b3   : > { %3303 = vrot.lane.b32.xlu0 %v3237_v28, %s4578_s27  ;;  %3301 = vrot.lane.b32.xlu2 %v3234_v31, %s4578_s27 }
 0x2b4   : > { %v3296_v35 = vpop.permute.xlu1 %3295  ;;  %v4459_v33 = vld [vmem:[#allocation2 + $0x48] sm:$0xff] }
 0x2b5   : > { %3367 = vst.msk [vmem:[#allocation2 + $0x64] sm:$0xf] %vm3341_vm15, %v3296_v35  ;;  %v3294_v37 = vpop.permute.xlu0 %3293  ;;  %4440 = vmatmul.msk.bf16.gmra.mxu2 %vm3506_vm0, %v4459_v33  ;;  %v2935_v38 = vpop.permute.xlu2 %2934 }
 0x2b6   : > { %3366 = vst.msk [vmem:[#allocation2 + $0x60] sm:$0xf] %vm3341_vm15, %v3294_v37 }
 0x2ba   : > { %2970 = vrot.lane.b32.xlu1 %v2907_v39, %s4577_s26 }
 0x2bb   : > { %2968 = vrot.lane.b32.xlu0 %v2897_v40, %s4577_s26  ;;  %2409 = vrot.lane.b32.xlu2 %v4246_v43, %s4576_s25 }
 0x2bc   : > { %v2374_v45 = vpop.permute.xlu1 %2373 }
 0x2bd   : > { %2457 = vst.msk [vmem:[#allocation2 + $0x34] sm:$0xf] %vm2443_vm12, %v2374_v45  ;;  %v2372_v48 = vpop.permute.xlu0 %2371  ;;  %v4462_v49 = vld [vmem:[#allocation2 + $0x60] sm:$0xff]  ;;  %v3270_v25 = vpop.permute.xlu2 %3269 }
 0x2be   : > { %2456 = vst.msk [vmem:[#allocation2 + $0x30] sm:$0xf] %vm2443_vm12, %v2372_v48  ;;  %4443 = vmatmul.msk.bf16.vlgmr.msra.gmra.mxu3 %vm3506_vm0, %v4462_v49 }
 0x2bf   : > { %3018 = vst.msk [vmem:[#allocation2 + $0x34] sm:$0xf] %vm3004_vm14, %v2935_v38 }
 0x2c3   : > { %3307 = vrot.lane.b32.xlu0 %v3244_v51, %s4578_s27  ;;  %3305 = vrot.lane.b32.xlu2 %v3241_v53, %s4578_s27 }
 0x2c4   : > { %v2933_v54 = vpop.permute.xlu1 %2932 }
 0x2c5   : > { %3017 = vst.msk [vmem:[#allocation2 + $0x30] sm:$0xf] %vm3004_vm14, %v2933_v54  ;;  %v2923_v55 = vpop.permute.xlu0 %2922  ;;  %v2390_v56 = vpop.permute.xlu2 %2389 }
 0x2c6   : > { %3012 = vst.msk [vmem:[#allocation2 + $0x1c] sm:$0xf] %vm3004_vm14, %v2923_v55 }
 0x2c7   : > { %3354 = vst.msk [vmem:[#allocation2 + $0x30] sm:$0xf] %vm3341_vm15, %v3270_v25 }
 0x2c8   : > { %2465 = vst.msk [vmem:[#allocation2 + $0x54] sm:$0xf] %vm2443_vm12, %v2390_v56 }
 0x2cc   : > { %v3260_v57 = vpop.permute.xlu1 %3259 }
 0x2cd   : > { %3349 = vst.msk [vmem:[#allocation2 + $0x1c] sm:$0xf] %vm3341_vm15, %v3260_v57  ;;  %v3258_v1 = vpop.permute.xlu0 %3257  ;;  %v2949_v59 = vpop.permute.xlu2 %2948 }
 0x2ce   : > { %3348 = vst.msk [vmem:[#allocation2 + $0x18] sm:$0xf] %vm3341_vm15, %v3258_v1 }
 0x2d3   : > { %v6021_v20 = vpop.f32.mrf.mxu0 }
 0x2d4   : > { %v2388_v60 = vpop.permute.xlu1 %2387  ;;  %v3649_v1 = vsel %vm3648_vm1, %v6021_v20, 0.0 }
 0x2d5   : > { %2464 = vst.msk [vmem:[#allocation2 + $0x50] sm:$0xf] %vm2443_vm12, %v2388_v60  ;;  %v3272_v61 = vpop.permute.xlu0 %3271  ;;  %v4453_v62 = vld [vmem:[#allocation2 + $0x18] sm:$0xff]  ;;  %v2963_v63 = vpop.permute.xlu2 %2962 }
 0x2d6   : > { %3355 = vst.msk [vmem:[#allocation2 + $0x34] sm:$0xf] %vm3341_vm15, %v3272_v61  ;;  %4434 = vmatmul.msk.bf16.gmra.mxu0 %vm3506_vm0, %v4453_v62 }
 0x2d7   : > { %3025 = vst.msk [vmem:[#allocation2 + $0x50] sm:$0xf] %vm3004_vm14, %v2949_v59 }
 0x2db   : > { %v6031_v28 = vpop.f32.mrf.mxu0 }
 0x2dc   : > { %v2402_v52 = vpop.permute.xlu1 %2401  ;;  %v3650_v57 = vsel %vm3648_vm1, %v6031_v28, 0.0 }
 0x2dd   : > { %2471 = vst.msk [vmem:[#allocation2 + $0x6c] sm:$0xf] %vm2443_vm12, %v2402_v52  ;;  %v2400_v58 = vpop.permute.xlu0 %2399  ;;  %v4456_v0 = vld [vmem:[#allocation2 + $0x30] sm:$0xff]  ;;  %v3298_v2 = vpop.permute.xlu2 %3297  ;;  %v3651_v60 = vadd.f32 %v3650_v57, %v3649_v1 }
 0x2de   : > { %2470 = vst.msk [vmem:[#allocation2 + $0x68] sm:$0xf] %vm2443_vm12, %v2400_v58  ;;  %4437 = vmatmul.msk.bf16.gmra.mxu1 %vm3506_vm0, %v4456_v0 }
 0x2df   : > { %3032 = vst.msk [vmem:[#allocation2 + $0x6c] sm:$0xf] %vm3004_vm14, %v2963_v63 }
 0x2e4   : > { %v2961_v3 = vpop.permute.xlu1 %2960 }
 0x2e5   : > { %3031 = vst.msk [vmem:[#allocation2 + $0x68] sm:$0xf] %vm3004_vm14, %v2961_v3  ;;  %v2951_v4 = vpop.permute.xlu0 %2950  ;;  %v2378_v5 = vpop.permute.xlu2 %2377 }
 0x2e6   : > { %3026 = vst.msk [vmem:[#allocation2 + $0x54] sm:$0xf] %vm3004_vm14, %v2951_v4 }
 0x2e7   : > { %3368 = vst.msk [vmem:[#allocation2 + $0x68] sm:$0xf] %vm3341_vm15, %v3298_v2 }
 0x2e8   : > { %2459 = vst.msk [vmem:[#allocation2 + $0x3c] sm:$0xf] %vm2443_vm12, %v2378_v5 }
 0x2eb   : > { %v6051_v44 = vpop.f32.mrf.mxu0 }
 0x2ec   : > { %v3288_v6 = vpop.permute.xlu1 %3287  ;;  %v3652_v59 = vsel %vm3648_vm1, %v6051_v44, 0.0 }
 0x2ed   : > { %3363 = vst.msk [vmem:[#allocation2 + $0x54] sm:$0xf] %vm3341_vm15, %v3288_v6  ;;  %v3286_v7 = vpop.permute.xlu0 %3285  ;;  %v3274_v8 = vpop.permute.xlu2 %3273  ;;  %v3653_v62 = vadd.f32 %v3652_v59, %v3651_v60 }
 0x2ee   : > { %3362 = vst.msk [vmem:[#allocation2 + $0x50] sm:$0xf] %vm3341_vm15, %v3286_v7 }
 0x2f3   : > { %v6058_v48 = vpop.f32.mrf.mxu0  ;;  %v6064_v25 = vpop.f32.mrf.mxu1 }
 0x2f4   : > { %v2376_v9 = vpop.permute.xlu1 %2375  ;;  %v3654_v61 = vsel %vm3648_vm1, %v6058_v48, 0.0 }
 0x2f5   : > { %2458 = vst.msk [vmem:[#allocation2 + $0x38] sm:$0xf] %vm2443_vm12, %v2376_v9  ;;  %v3300_v10 = vpop.permute.xlu0 %3299  ;;  %v4460_v11 = vld [vmem:[#allocation2 + $0x50] sm:$0xff]  ;;  %v2394_v12 = vpop.permute.xlu2 %2393  ;;  %v3655_v58 = vadd.f32 %v3654_v61, %v3653_v62 }
 0x2f6   : > { %3369 = vst.msk [vmem:[#allocation2 + $0x6c] sm:$0xf] %vm3341_vm15, %v3300_v10  ;;  %4441 = vmatmul.msk.bf16.gmra.mxu2 %vm3506_vm0, %v4460_v11 }
 0x2f7   : > { %2467 = vst.msk [vmem:[#allocation2 + $0x5c] sm:$0xf] %vm2443_vm12, %v2394_v12  ;;  %v3664_v12 = vsel %vm3648_vm1, %v6064_v25, 0.0 }
 0x2fb   : > { %v6068_v53 = vpop.f32.mrf.mxu1 }
 0x2fc   : > { %v2939_v13 = vpop.permute.xlu1 %2938 }
 0x2fd   : > { %3020 = vst.msk [vmem:[#allocation2 + $0x3c] sm:$0xf] %vm3004_vm14, %v2939_v13  ;;  %v2937_v14 = vpop.permute.xlu0 %2936  ;;  %v4463_v15 = vld [vmem:[#allocation2 + $0x68] sm:$0xff]  ;;  %v2953_v16 = vpop.permute.xlu2 %2952 }
 0x2fe   : > { %3019 = vst.msk [vmem:[#allocation2 + $0x38] sm:$0xf] %vm3004_vm14, %v2937_v14  ;;  %4444 = vmatmul.msk.bf16.gmra.mxu3 %vm3506_vm0, %v4463_v15  ;;  %v3666_v15 = vsel %vm3648_vm1, %v6068_v53, 0.0 }
 0x2ff   : > { %3356 = vst.msk [vmem:[#allocation2 + $0x38] sm:$0xf] %vm3341_vm15, %v3274_v8 }
 0x304   : > { %v2392_v17 = vpop.permute.xlu1 %2391 }
 0x305   : > { %2466 = vst.msk [vmem:[#allocation2 + $0x58] sm:$0xf] %vm2443_vm12, %v2392_v17  ;;  %v3276_v18 = vpop.permute.xlu0 %3275  ;;  %v2967_v19 = vpop.permute.xlu2 %2966 }
 0x306   : > { %3357 = vst.msk [vmem:[#allocation2 + $0x3c] sm:$0xf] %vm3341_vm15, %v3276_v18 }
 0x307   : > { %3027 = vst.msk [vmem:[#allocation2 + $0x58] sm:$0xf] %vm3004_vm14, %v2953_v16 }
 0x309   : > { %v6023_v21 = vpop.f32.mrf.mxu2 }
 0x30a   : > { %v4510_v22 = vpack.i.bf16 %v6023_v21, %v6021_v20 }
 0x30c   : > { %v2406_v23 = vpop.permute.xlu1 %2405  ;;  %4511 = vxpose.xlu1.b32.start [1/16] (narrow) %v4510_v22, 8 }
 0x30d   : > { %2473 = vst.msk [vmem:[#allocation2 + $0x74] sm:$0xf] %vm2443_vm12, %v2406_v23  ;;  %v2404_v24 = vpop.permute.xlu0 %2403  ;;  %v4457_v26 = vld [vmem:[#allocation2 + $0x38] sm:$0xff]  ;;  %v3302_v27 = vpop.permute.xlu2 %3301 }
 0x30e   : > { %2472 = vst.msk [vmem:[#allocation2 + $0x70] sm:$0xf] %vm2443_vm12, %v2404_v24  ;;  %4438 = vmatmul.msk.bf16.gmra.mxu1 %vm3506_vm0, %v4457_v26 }
 0x30f   : > { %3034 = vst.msk [vmem:[#allocation2 + $0x74] sm:$0xf] %vm3004_vm14, %v2967_v19 }
 0x311   : > { %v6033_v29 = vpop.f32.mrf.mxu2 }
 0x312   : > { %v4512_v31 = vpack.i.bf16 %v6033_v29, %v6031_v28  ;;  %v6066_v51 = vpop.f32.mrf.mxu0 }
 0x313   : > { %v3656_v52 = vsel %vm3648_vm1, %v6066_v51, 0.0 }
 0x314   : > { %v2965_v32 = vpop.permute.xlu1 %2964  ;;  %4513 = vxpose.xlu1.b32.cont [2/16] (narrow) %v4512_v31, 8  ;;  %v3657_v2 = vadd.f32 %v3656_v52, %v3655_v58 }
 0x315   : > { %3033 = vst.msk [vmem:[#allocation2 + $0x70] sm:$0xf] %vm3004_vm14, %v2965_v32  ;;  %v2955_v34 = vpop.permute.xlu0 %2954  ;;  %v2410_v35 = vpop.permute.xlu2 %2409 }
 0x316   : > { %3028 = vst.msk [vmem:[#allocation2 + $0x5c] sm:$0xf] %vm3004_vm14, %v2955_v34 }
 0x317   : > { %3370 = vst.msk [vmem:[#allocation2 + $0x70] sm:$0xf] %vm3341_vm15, %v3302_v27 }
 0x318   : > { %2475 = vst.msk [vmem:[#allocation2 + $0x7c] sm:$0xf] %vm2443_vm12, %v2410_v35 }
 0x31a   : > { %v6070_v54 = vpop.f32.mrf.mxu0 }
 0x31b   : > { %v6072_v55 = vpop.f32.mrf.mxu1  ;;  %v3658_v0 = vsel %vm3648_vm1, %v6070_v54, 0.0 }
 0x31c   : > { %v3292_v33 = vpop.permute.xlu1 %3291  ;;  %v3659_v5 = vadd.f32 %v3658_v0, %v3657_v2  ;;  %v3668_v19 = vsel %vm3648_vm1, %v6072_v55, 0.0 }
 0x31d   : > { %3365 = vst.msk [vmem:[#allocation2 + $0x5c] sm:$0xf] %vm3341_vm15, %v3292_v33  ;;  %v3290_v36 = vpop.permute.xlu0 %3289  ;;  %v3306_v40 = vpop.permute.xlu2 %3305 }
 0x31e   : > { %3364 = vst.msk [vmem:[#allocation2 + $0x58] sm:$0xf] %vm3341_vm15, %v3290_v36 }
 0x323   : > { %v6084_v63 = vpop.f32.mrf.mxu1 }
 0x324   : > { %v2408_v37 = vpop.permute.xlu1 %2407  ;;  %v3670_v23 = vsel %vm3648_vm1, %v6084_v63, 0.0 }
 0x325   : > { %v3304_v30 = vpop.permute.xlu0 %3303  ;;  %v4461_v38 = vld [vmem:[#allocation2 + $0x58] sm:$0xff]  ;;  %2474 = vst.msk [vmem:[#allocation2 + $0x78] sm:$0xf] %vm2443_vm12, %v2408_v37 }
 0x326   : > { %3371 = vst.msk [vmem:[#allocation2 + $0x74] sm:$0xf] %vm3341_vm15, %v3304_v30  ;;  %4442 = vmatmul.msk.bf16.gmra.mxu2 %vm3506_vm0, %v4461_v38 }
 0x32c   : > { %v2971_v39 = vpop.permute.xlu1 %2970 }
 0x32d   : > { %v2969_v41 = vpop.permute.xlu0 %2968  ;;  %v4464_v42 = vld [vmem:[#allocation2 + $0x70] sm:$0xff]  ;;  %3036 = vst.msk [vmem:[#allocation2 + $0x7c] sm:$0xf] %vm3004_vm14, %v2971_v39 }
 0x32e   : > { %3035 = vst.msk [vmem:[#allocation2 + $0x78] sm:$0xf] %vm3004_vm14, %v2969_v41  ;;  %4445 = vmatmul.msk.bf16.gmra.mxu3 %vm3506_vm0, %v4464_v42  ;;  %v3682_v42 = vsel %vm3648_vm1, %v6033_v29, 0.0 }
 0x32f   : > { %3372 = vst.msk [vmem:[#allocation2 + $0x78] sm:$0xf] %vm3341_vm15, %v3306_v40  ;;  %v3680_v40 = vsel %vm3648_vm1, %v6023_v21, 0.0 }
 0x335   : > { %v3308_v43 = vpop.permute.xlu0 %3307 }
 0x336   : > { %3373 = vst.msk [vmem:[#allocation2 + $0x7c] sm:$0xf] %vm3341_vm15, %v3308_v43 }
 0x338   : > { %v6053_v45 = vpop.f32.mrf.mxu2 }
 0x339   : > { %v4514_v46 = vpack.i.bf16 %v6053_v45, %v6051_v44 }
 0x33b   : > { %4515 = vxpose.xlu1.b32.cont [3/16] (narrow) %v4514_v46, 8 }
 0x33d   : > { %v4465_v47 = vld [vmem:[#allocation2 + $0x78] sm:$0xff] }
 0x33e   : > { %4446 = vmatmul.msk.bf16.gmra.mxu3 %vm3506_vm0, %v4465_v47  ;;  %v3684_v47 = vsel %vm3648_vm1, %v6053_v45, 0.0 }
 0x340   : > { %v6060_v49 = vpop.f32.mrf.mxu2 }
 0x341   : > { %v4516_v50 = vpack.i.bf16 %v6060_v49, %v6058_v48  ;;  %v6118_v27 = vpop.f32.mrf.mxu3  ;;  %v3686_v57 = vsel %vm3648_vm1, %v6060_v49, 0.0 }
 0x343   : > { %4517 = vxpose.xlu1.b32.cont [4/16] (narrow) %v4516_v50, 8 }
 0x349   : > { %v6130_v38 = vpop.f32.mrf.mxu3 }
 0x353   : > { %v6074_v56 = vpop.f32.mrf.mxu0 }
 0x354   : > { %v3660_v4 = vsel %vm3648_vm1, %v6074_v56, 0.0 }
 0x355   : > { %v3661_v7 = vadd.f32 %v3660_v4, %v3659_v5 }
 0x35b   : > { %v6090_v3 = vpop.f32.mrf.mxu0  ;;  %v6096_v8 = vpop.f32.mrf.mxu1 }
 0x35c   : > { %v3662_v6 = vsel %vm3648_vm1, %v6090_v3, 0.0  ;;  %v3672_v31 = vsel %vm3648_vm1, %v6096_v8, 0.0 }
 0x35d   : > { %v3663_v11 = vadd.f32 %v3662_v6, %v3661_v7 }
 0x35f   : > { %v3665_v13 = vadd.f32 %v3664_v12, %v3663_v11  ;;  %v3696_v12 = vsel %vm3648_vm1, %v6118_v27, 0.0 }
 0x361   : > { %v3667_v17 = vadd.f32 %v3666_v15, %v3665_v13  ;;  %v3698_v15 = vsel %vm3648_vm1, %v6130_v38, 0.0 }
 0x363   : > { %v6110_v18 = vpop.f32.mrf.mxu1  ;;  %v3669_v22 = vadd.f32 %v3668_v19, %v3667_v17  ;;  %v4526_v19 = vpack.i.bf16 %v6118_v27, %v6064_v25 }
 0x364   : > { %v3674_v34 = vsel %vm3648_vm1, %v6110_v18, 0.0 }
 0x365   : > { %v3671_v24 = vadd.f32 %v3670_v23, %v3669_v22 }
 0x367   : > { %v3673_v32 = vadd.f32 %v3672_v31, %v3671_v24 }
 0x369   : > { %v3675_v33 = vadd.f32 %v3674_v34, %v3673_v32  ;;  %v4528_v34 = vpack.i.bf16 %v6130_v38, %v6068_v53 }
 0x379   : > { %v6098_v9 = vpop.f32.mrf.mxu2 }
 0x37a   : > { %v4518_v10 = vpack.i.bf16 %v6098_v9, %v6066_v51  ;;  %v3688_v61 = vsel %vm3648_vm1, %v6098_v9, 0.0 }
 0x37c   : > { %4519 = vxpose.xlu1.b32.cont [5/16] (narrow) %v4518_v10, 8 }
 0x381   : > { %v6104_v14 = vpop.f32.mrf.mxu2  ;;  %v6136_v43 = vpop.f32.mrf.mxu3 }
 0x382   : > { %v4520_v16 = vpack.i.bf16 %v6104_v14, %v6070_v54  ;;  %v3690_v58 = vsel %vm3648_vm1, %v6104_v14, 0.0  ;;  %v3700_v22 = vsel %vm3648_vm1, %v6136_v43, 0.0 }
 0x384   : > { %4521 = vxpose.xlu1.b32.cont [6/16] (narrow) %v4520_v16, 8 }
 0x389   : > { %v6142_v59 = vpop.f32.mrf.mxu3 }
 0x38a   : > { %v3702_v24 = vsel %vm3648_vm1, %v6142_v59, 0.0 }
 0x38b   : > { %v6116_v26 = vpop.f32.mrf.mxu1 }
 0x38c   : > { %v3676_v35 = vsel %vm3648_vm1, %v6116_v26, 0.0 }
 0x38d   : > { %v3677_v30 = vadd.f32 %v3676_v35, %v3675_v33 }
 0x393   : > { %v6126_v36 = vpop.f32.mrf.mxu1 }
 0x394   : > { %v3678_v37 = vsel %vm3648_vm1, %v6126_v36, 0.0 }
 0x395   : > { %v3679_v39 = vadd.f32 %v3678_v37, %v3677_v30 }
 0x397   : > { %v3681_v41 = vadd.f32 %v3680_v40, %v3679_v39 }
 0x399   : > { %v3683_v46 = vadd.f32 %v3682_v42, %v3681_v41  ;;  %v4530_v42 = vpack.i.bf16 %v6136_v43, %v6072_v55 }
 0x39b   : > { %v3685_v50 = vadd.f32 %v3684_v47, %v3683_v46 }
 0x39d   : > { %v3687_v1 = vadd.f32 %v3686_v57, %v3685_v50 }
 0x39f   : > { %v3689_v52 = vadd.f32 %v3688_v61, %v3687_v1  ;;  %v4532_v61 = vpack.i.bf16 %v6142_v59, %v6084_v63 }
 0x3a1   : > { %v3691_v2 = vadd.f32 %v3690_v58, %v3689_v52 }
 0x3a9   : > { %v6144_v60 = vpop.f32.mrf.mxu2 }
 0x3aa   : > { %v4522_v62 = vpack.i.bf16 %v6144_v60, %v6074_v56  ;;  %v3692_v0 = vsel %vm3648_vm1, %v6144_v60, 0.0 }
 0x3ab   : > { %v3693_v4 = vadd.f32 %v3692_v0, %v3691_v2 }
 0x3ac   : > { %4523 = vxpose.xlu1.b32.cont [7/16] (narrow) %v4522_v62, 8 }
 0x3b1   : > { %v6154_v5 = vpop.f32.mrf.mxu2  ;;  %v6156_v6 = vpop.f32.mrf.mxu3 }
 0x3b2   : > { %v3694_v7 = vsel %vm3648_vm1, %v6154_v5, 0.0  ;;  %v4524_v10 = vpack.i.bf16 %v6154_v5, %v6090_v3  ;;  %v3704_v35 = vsel %vm3648_vm1, %v6156_v6, 0.0  ;;  %v4534_v0 = vpack.i.bf16 %v6156_v6, %v6096_v8 }
 0x3b3   : > { %v3695_v11 = vadd.f32 %v3694_v7, %v3693_v4 }
 0x3b4   : > { %4525 = vxpose.xlu1.b32.cont [8/16] (narrow) %v4524_v10, 8 }
 0x3b5   : > { %v3697_v13 = vadd.f32 %v3696_v12, %v3695_v11 }
 0x3b7   : > { %v3699_v16 = vadd.f32 %v3698_v15, %v3697_v13 }
 0x3b9   : > { %v6166_v17 = vpop.f32.mrf.mxu3  ;;  %v3701_v23 = vadd.f32 %v3700_v22, %v3699_v16 }
 0x3ba   : > { %v3706_v37 = vsel %vm3648_vm1, %v6166_v17, 0.0  ;;  %v4536_v4 = vpack.i.bf16 %v6166_v17, %v6110_v18 }
 0x3bb   : > { %v3703_v31 = vadd.f32 %v3702_v24, %v3701_v23 }
 0x3bc   : > { %4527 = vxpose.xlu1.b32.cont [9/16] (narrow) %v4526_v19, 8 }
 0x3bd   : > { %v3705_v33 = vadd.f32 %v3704_v35, %v3703_v31 }
 0x3bf   : > { %v3707_v39 = vadd.f32 %v3706_v37, %v3705_v33 }
 0x3c1   : > { %v6174_v32 = vpop.f32.mrf.mxu3 }
 0x3c2   : > { %v3708_v30 = vsel %vm3648_vm1, %v6174_v32, 0.0  ;;  %v4538_v22 = vpack.i.bf16 %v6174_v32, %v6116_v26 }
 0x3c3   : > { %v3709_v40 = vadd.f32 %v3708_v30, %v3707_v39 }
 0x3c4   : > { %4529 = vxpose.xlu1.b32.cont [10/16] (narrow) %v4528_v34, 8 }
 0x3c9   : > { %v6184_v41 = vpop.f32.mrf.mxu3 }
 0x3ca   : > { %v3710_v46 = vsel %vm3648_vm1, %v6184_v41, 0.0 }
 0x3cb   : > { %v3711_v47 = vadd.f32 %v3710_v46, %v3709_v40 }
 0x3cc   : > { %4531 = vxpose.xlu1.b32.cont [11/16] (narrow) %v4530_v42, 8 }
 0x3cd   : > { %v3712_v50 = vrot.slane %v3711_v47, 4 }
 0x3cf   : > { %v3713_v57 = vadd.f32 %v3712_v50, %v3711_v47 }
 0x3d1   : > { %v3714_v1 = vrot.slane %v3713_v57, 2 }
 0x3d3   : > { %v3715_v62 = vadd.f32 %v3714_v1, %v3713_v57 }
 0x3d4   : > { %4533 = vxpose.xlu1.b32.cont [12/16] (narrow) %v4532_v61, 8 }
 0x3d5   : > { %v3716_v52 = vrot.slane %v3715_v62, 1 }
 0x3d7   : > { %v3717_v58 = vadd.f32 %v3716_v52, %v3715_v62 }
 0x3d9   : > { %3752 = vst.msk [vmem:[%s6196_s10] sm:$0x1] %vm3751_vm2, %v3717_v58  ;;  %v6202_v2 = vmul.f32 0.00390625, %v3717_v58 }
 0x3db   : > { %v3719_v7 = vsub.f32 %v6021_v20, %v6202_v2  ;;  %v3720_v10 = vsub.f32 %v6031_v28, %v6202_v2  ;;  %v3721_v11 = vsub.f32 %v6051_v44, %v6202_v2  ;;  %v3722_v12 = vsub.f32 %v6058_v48, %v6202_v2 }
 0x3dc   : > { %4535 = vxpose.xlu1.b32.cont [13/16] (narrow) %v4534_v0, 8  ;;  %v3723_v16 = vsub.f32 %v6066_v51, %v6202_v2  ;;  %v3724_v20 = vsub.f32 %v6070_v54, %v6202_v2  ;;  %v3725_v48 = vsub.f32 %v6074_v56, %v6202_v2  ;;  %v3726_v35 = vsub.f32 %v6090_v3, %v6202_v2 }
 0x3dd   : > { %v3753_v13 = vmul.f32 %v3719_v7, %v3719_v7  ;;  %v3754_v15 = vmul.f32 %v3720_v10, %v3720_v10  ;;  %v3755_v19 = vmul.f32 %v3721_v11, %v3721_v11  ;;  %v3756_v28 = vmul.f32 %v3722_v12, %v3722_v12 }
 0x3de   : > { %v3757_v31 = vmul.f32 %v3723_v16, %v3723_v16  ;;  %v3758_v33 = vmul.f32 %v3724_v20, %v3724_v20  ;;  %v3727_v30 = vsub.f32 %v6064_v25, %v6202_v2  ;;  %v3759_v39 = vmul.f32 %v3725_v48, %v3725_v48 }
 0x3df   : > { %v3785_v23 = vsel %vm3648_vm1, %v3753_v13, 0.0  ;;  %v3786_v44 = vsel %vm3648_vm1, %v3754_v15, 0.0  ;;  %v3788_v51 = vsel %vm3648_vm1, %v3755_v19, 0.0  ;;  %v3790_v54 = vsel %vm3648_vm1, %v3756_v28, 0.0 }
 0x3e0   : > { %v3787_v24 = vadd.f32 %v3786_v44, %v3785_v23  ;;  %v3792_v40 = vsel %vm3648_vm1, %v3757_v31, 0.0  ;;  %v4540_v56 = vpack.i.bf16 %v6184_v41, %v6126_v36  ;;  %v3728_v46 = vsub.f32 %v6068_v53, %v6202_v2 }
 0x3e1   : > { %v3760_v47 = vmul.f32 %v3726_v35, %v3726_v35  ;;  %v3794_v3 = vsel %vm3648_vm1, %v3758_v33, 0.0  ;;  %v3729_v57 = vsub.f32 %v6072_v55, %v6202_v2  ;;  %v3761_v1 = vmul.f32 %v3727_v30, %v3727_v30 }
 0x3e2   : > { %v3789_v34 = vadd.f32 %v3788_v51, %v3787_v24  ;;  %v3796_v25 = vsel %vm3648_vm1, %v3759_v39, 0.0  ;;  %v3730_v62 = vsub.f32 %v6084_v63, %v6202_v2  ;;  %v3762_v52 = vmul.f32 %v3728_v46, %v3728_v46 }
 0x3e3   : > { %v3798_v58 = vsel %vm3648_vm1, %v3760_v47, 0.0  ;;  %v3731_v53 = vsub.f32 %v6096_v8, %v6202_v2  ;;  %v3800_v7 = vsel %vm3648_vm1, %v3761_v1, 0.0  ;;  %v3732_v55 = vsub.f32 %v6110_v18, %v6202_v2 }
 0x3e4   : > { %4537 = vxpose.xlu1.b32.cont [14/16] (narrow) %v4536_v4, 8  ;;  %v3791_v37 = vadd.f32 %v3790_v54, %v3789_v34  ;;  %v3763_v4 = vmul.f32 %v3729_v57, %v3729_v57  ;;  %v3764_v11 = vmul.f32 %v3730_v62, %v3730_v62  ;;  %v3802_v12 = vsel %vm3648_vm1, %v3762_v52, 0.0 }
 0x3e5   : > { %v3733_v63 = vsub.f32 %v6116_v26, %v6202_v2  ;;  %v3765_v15 = vmul.f32 %v3731_v53, %v3731_v53  ;;  %v3734_v8 = vsub.f32 %v6126_v36, %v6202_v2  ;;  %v3735_v18 = vsub.f32 %v6023_v21, %v6202_v2 }
 0x3e6   : > { %v3793_v42 = vadd.f32 %v3792_v40, %v3791_v37  ;;  %v3804_v16 = vsel %vm3648_vm1, %v3763_v4, 0.0  ;;  %v3806_v20 = vsel %vm3648_vm1, %v3764_v11, 0.0  ;;  %v3736_v26 = vsub.f32 %v6033_v29, %v6202_v2 }
 0x3e7   : > { %v3767_v23 = vmul.f32 %v3733_v63, %v3733_v63  ;;  %v3808_v44 = vsel %vm3648_vm1, %v3765_v15, 0.0  ;;  %v3768_v48 = vmul.f32 %v3734_v8, %v3734_v8  ;;  %v3737_v36 = vsub.f32 %v6053_v45, %v6202_v2 }
 0x3e8   : > { %v3795_v50 = vadd.f32 %v3794_v3, %v3793_v42  ;;  %v3769_v34 = vmul.f32 %v3735_v18, %v3735_v18  ;;  %v3738_v21 = vsub.f32 %v6060_v49, %v6202_v2  ;;  %v3770_v54 = vmul.f32 %v3736_v26, %v3736_v26 }
 0x3e9   : > { %v3812_v35 = vsel %vm3648_vm1, %v3767_v23, 0.0  ;;  %v3814_v37 = vsel %vm3648_vm1, %v3768_v48, 0.0  ;;  %v3739_v29 = vsub.f32 %v6098_v9, %v6202_v2  ;;  %v3771_v39 = vmul.f32 %v3737_v36, %v3737_v36 }
 0x3ea   : > { %v3797_v61 = vadd.f32 %v3796_v25, %v3795_v50  ;;  %v3816_v40 = vsel %vm3648_vm1, %v3769_v34, 0.0  ;;  %v3740_v45 = vsub.f32 %v6104_v14, %v6202_v2  ;;  %v3772_v42 = vmul.f32 %v3738_v21, %v3738_v21 }
 0x3eb   : > { %v3818_v46 = vsel %vm3648_vm1, %v3770_v54, 0.0  ;;  %v3741_v49 = vsub.f32 %v6144_v60, %v6202_v2  ;;  %v3773_v3 = vmul.f32 %v3739_v29, %v3739_v29  ;;  %v3820_v50 = vsel %vm3648_vm1, %v3771_v39, 0.0 }
 0x3ec   : > { %4539 = vxpose.xlu1.b32.cont [15/16] (narrow) %v4538_v22, 8  ;;  %v3799_v0 = vadd.f32 %v3798_v58, %v3797_v61  ;;  %v3766_v22 = vmul.f32 %v3732_v55, %v3732_v55  ;;  %v3742_v9 = vsub.f32 %v6154_v5, %v6202_v2  ;;  %v3774_v1 = vmul.f32 %v3740_v45, %v3740_v45 }
 0x3ed   : > { %v3822_v25 = vsel %vm3648_vm1, %v3772_v42, 0.0  ;;  %v3743_v14 = vsub.f32 %v6118_v27, %v6202_v2  ;;  %v3775_v62 = vmul.f32 %v3741_v49, %v3741_v49  ;;  %v3824_v52 = vsel %vm3648_vm1, %v3773_v3, 0.0 }
 0x3ee   : > { %v3801_v10 = vadd.f32 %v3800_v7, %v3799_v0  ;;  %v3810_v31 = vsel %vm3648_vm1, %v3766_v22, 0.0  ;;  %v3744_v60 = vsub.f32 %v6130_v38, %v6202_v2  ;;  %v3776_v0 = vmul.f32 %v3742_v9, %v3742_v9 }
 0x3ef   : > { %v3826_v53 = vsel %vm3648_vm1, %v3774_v1, 0.0  ;;  %v3745_v5 = vsub.f32 %v6136_v43, %v6202_v2  ;;  %v3777_v7 = vmul.f32 %v3743_v14, %v3743_v14  ;;  %v3746_v27 = vsub.f32 %v6142_v59, %v6202_v2 }
 0x3f0   : > { %v3803_v13 = vadd.f32 %v3802_v12, %v3801_v10  ;;  %v3828_v10 = vsel %vm3648_vm1, %v3775_v62, 0.0  ;;  %v3778_v11 = vmul.f32 %v3744_v60, %v3744_v60  ;;  %v3830_v12 = vsel %vm3648_vm1, %v3776_v0, 0.0 }
 0x3f1   : > { %v3747_v38 = vsub.f32 %v6156_v6, %v6202_v2  ;;  %v3779_v63 = vmul.f32 %v3745_v5, %v3745_v5  ;;  %v3832_v15 = vsel %vm3648_vm1, %v3777_v7, 0.0  ;;  %v3748_v43 = vsub.f32 %v6166_v17, %v6202_v2 }
 0x3f2   : > { %v3805_v19 = vadd.f32 %v3804_v16, %v3803_v13  ;;  %v3834_v8 = vsel %vm3648_vm1, %v3778_v11, 0.0  ;;  %v3749_v59 = vsub.f32 %v6174_v32, %v6202_v2  ;;  %v3750_v18 = vsub.f32 %v6184_v41, %v6202_v2 }
 0x3f3   : > { %v3781_v22 = vmul.f32 %v3747_v38, %v3747_v38  ;;  %v3782_v23 = vmul.f32 %v3748_v43, %v3748_v43 }
 0x3f4   : > { %4541 = vxpose.xlu1.b32.end [16/16] (narrow) %v4540_v56, 8  ;;  %v3807_v28 = vadd.f32 %v3806_v20, %v3805_v19  ;;  %v3780_v19 = vmul.f32 %v3746_v27, %v3746_v27  ;;  %v3784_v36 = vmul.f32 %v3750_v18, %v3750_v18 }
 0x3f5   : > { %v3840_v26 = vsel %vm3648_vm1, %v3781_v22, 0.0  ;;  %v3842_v41 = vsel %vm3648_vm1, %v3782_v23, 0.0 }
 0x3f6   : > { %v3809_v24 = vadd.f32 %v3808_v44, %v3807_v28  ;;  %v3836_v28 = vsel %vm3648_vm1, %v3779_v63, 0.0  ;;  %v3838_v44 = vsel %vm3648_vm1, %v3780_v19, 0.0  ;;  %v3846_v21 = vsel %vm3648_vm1, %v3784_v36, 0.0 }
 0x3f8   : > { %v3811_v51 = vadd.f32 %v3810_v31, %v3809_v24  ;;  %v3783_v24 = vmul.f32 %v3749_v59, %v3749_v59 }
 0x3fa   : > { %v3813_v33 = vadd.f32 %v3812_v35, %v3811_v51  ;;  %v3844_v35 = vsel %vm3648_vm1, %v3783_v24, 0.0 }
 0x3fc   : > { %v3815_v30 = vadd.f32 %v3814_v37, %v3813_v33 }
 0x3fe   : > { %v3817_v56 = vadd.f32 %v3816_v40, %v3815_v30 }
 0x400   : > { %v3819_v47 = vadd.f32 %v3818_v46, %v3817_v56 }
 0x402   : > { %v3821_v57 = vadd.f32 %v3820_v50, %v3819_v47 }
 0x404   : > { %v3823_v61 = vadd.f32 %v3822_v25, %v3821_v57 }
 0x406   : > { %v3825_v58 = vadd.f32 %v3824_v52, %v3823_v61 }
 0x408   : > { %v3827_v4 = vadd.f32 %v3826_v53, %v3825_v58 }
 0x40a   : > { %v3829_v55 = vadd.f32 %v3828_v10, %v3827_v4 }
 0x40c   : > { %v3831_v13 = vadd.f32 %v3830_v12, %v3829_v55 }
 0x40e   : > { %v3833_v16 = vadd.f32 %v3832_v15, %v3831_v13 }
 0x410   : > { %v3835_v20 = vadd.f32 %v3834_v8, %v3833_v16 }
 0x412   : > { %v3837_v6 = vadd.f32 %v3836_v28, %v3835_v20 }
 0x414   : > { %v3839_v17 = vadd.f32 %v3838_v44, %v3837_v6 }
 0x416   : > { %v3841_v32 = vadd.f32 %v3840_v26, %v3839_v17 }
 0x418   : > { %v3843_v34 = vadd.f32 %v3842_v41, %v3841_v32 }
 0x41a   : > { %v3845_v33 = vadd.f32 %v3844_v35, %v3843_v34 }
 0x41c   : > { %v3847_v54 = vadd.f32 %v3846_v21, %v3845_v33 }
 0x41e   : > { %v3848_v37 = vrot.slane %v3847_v54, 4 }
 0x420   : > { %v4542_v48 = vpop.trf.xlu1  ;;  %v3849_v30 = vadd.f32 %v3848_v37, %v3847_v54 }
 0x421   : > { %v4546_v31 = vunpack.i.h.bf16 %v4542_v48  ;;  %v4543_v51 = vunpack.i.l.bf16 %v4542_v48 }
 0x422   : > { %v3850_v29 = vrot.slane %v3849_v30, 2 }
 0x423   : > { %v3919_v2 = vpack.c.bf16 %v4546_v31, %v4543_v51 }
 0x424   : > { %v3851_v39 = vadd.f32 %v3850_v29, %v3849_v30 }
 0x425   : > { %3920 = vst [vmem:[%s202_s18] sm:$0xff] %v3919_v2 }
 0x426   : > { %v3852_v40 = vrot.slane %v3851_v39, 1 }
 0x428   : > { %v3853_v56 = vadd.f32 %v3852_v40, %v3851_v39 }
 0x42a   : > { %3854 = vst.msk [vmem:[%s6196_s10 + $0x1] sm:$0x1] %vm3751_vm2, %v3853_v56 }
 0x42b PF: > { %s14_s14 = sadd.s32 1, %s4569_s14   ;;  %s6329_s12 = smov %s4565_s13 }
 0x42c   : > { %p11_p5 = scmp.ge.s32.totalorder %s14_s14, 4   ;;  %s6330_s13 = smov %s6332_s15 }
 0x42e   :  { %13 = sbr.rel (!%p11_p5) target bundleno = 2 (0x2), region = 73 }

</bundles_post_ra>
